<compile_context>
chip_gen: v7x
topology: tpu7x:2x2x1
jax: 0.10.0
libtpu: 0.0.40
codegen_flags: <defaults>
</compile_context>

<pallas_src>
import functools
import math

import jax
import jax.numpy as jnp
from jax.experimental import pallas as pl
from jax.experimental.pallas import tpu as pltpu


CONFIG = {
    "unet": {
        "depth": 2,
        "in_channels": 1,
        "mid_channels": 8,
        "out_channels": 1,
        "max_channels": 32,
        "kernel_size": 3,
        "stride": 1,
        "growth": 2.0,
        "input_mel_dim": 16,
        "final_mel_dim": 32,   # != input_mel_dim -> final_fc branch is exercised
    }
}

_C_ROUND = 8  # sublane multiple for channel padding


# ----------------------------------------------------------------------------
# channel plan (mirrors UNetRadio2D.__init__ bookkeeping)
# ----------------------------------------------------------------------------
def _channel_plan(ucfg):
    depth = ucfg["depth"]
    in_ch, mid = ucfg["in_channels"], ucfg["mid_channels"]
    out_ch, max_ch, growth = ucfg["out_channels"], ucfg["max_channels"], ucfg["growth"]
    enc, dec = [], []
    for _ in range(depth):
        enc.append((in_ch, mid))       # Conv2d(in,mid,3,p=1) ; Conv2d(mid,mid,1)
        dec.insert(0, (mid, out_ch))   # Conv2d(mid,mid,1) ; ConvTranspose2d(mid,out,3,p=1)
        out_ch = mid
        in_ch = mid
        mid = min(int(growth * mid), max_ch)
    return enc, dec


def _c_max(ucfg):
    enc, dec = _channel_plan(ucfg)
    cm = max(max(a, b) for a, b in enc + dec)
    return max(_C_ROUND, ((cm + _C_ROUND - 1) // _C_ROUND) * _C_ROUND)


# ----------------------------------------------------------------------------
# deterministic parameters in PyTorch layouts
# ----------------------------------------------------------------------------
def init_params(key, ucfg):
    enc_plan, dec_plan = _channel_plan(ucfg)
    nb = len(enc_plan) + len(dec_plan)
    keys = jax.random.split(key, 4 * nb + 2)

    def rnd(k, shape, fan_in):
        return jax.random.normal(k, shape, jnp.float32) / math.sqrt(fan_in)

    blocks, ki = [], 0
    for (cin, cmid) in enc_plan:
        blocks.append(dict(
            kind="enc",
            w3=rnd(keys[ki + 0], (cmid, cin, 3, 3), cin * 9),     # Conv2d 3x3
            b3=rnd(keys[ki + 1], (cmid,), cin * 9),
            w1=rnd(keys[ki + 2], (cmid, cmid, 1, 1), cmid),       # Conv2d 1x1
            b1=rnd(keys[ki + 3], (cmid,), cmid)))
        ki += 4
    for (cmid, cout) in dec_plan:
        blocks.append(dict(
            kind="dec",
            w1=rnd(keys[ki + 0], (cmid, cmid, 1, 1), cmid),       # Conv2d 1x1
            b1=rnd(keys[ki + 1], (cmid,), cmid),
            wt=rnd(keys[ki + 2], (cmid, cout, 3, 3), cmid * 9),   # ConvTranspose2d
            bt=rnd(keys[ki + 3], (cout,), cmid * 9)))
        ki += 4

    fin, fout = ucfg["input_mel_dim"], ucfg["final_mel_dim"]
    fc = None
    if fout != fin:
        fc = dict(w=rnd(keys[ki], (fout, fin), fin),              # nn.Linear
                  b=rnd(keys[ki + 1], (fout,), fin))
    return blocks, fc


# ----------------------------------------------------------------------------
# host-side packing: PyTorch layouts -> matmul-ready, channel-padded tensors
#   w_all: (n_blocks, 10, C_MAX, C_MAX)   taps 0..8 = 3x3 / ConvT(flipped), 9 = 1x1
#   b_all: (n_blocks, 2,  C_MAX, 1)       slot 0 = 3x3/ConvT bias, slot 1 = 1x1 bias
# ----------------------------------------------------------------------------
def pack_params(blocks, fc, ucfg):
    cmax = _c_max(ucfg)
    nb = len(blocks)
    w_all = jnp.zeros((nb, 10, cmax, cmax), jnp.float32)
    b_all = jnp.zeros((nb, 2, cmax, 1), jnp.float32)

    for i, blk in enumerate(blocks):
        if blk["kind"] == "enc":
            cout, cin = blk["w3"].shape[0], blk["w3"].shape[1]
            taps = jnp.transpose(blk["w3"], (2, 3, 0, 1)).reshape(9, cout, cin)
            b3 = blk["b3"]
        else:
            # ConvTranspose2d (stride=1, padding=1) == forward conv with the
            # spatially flipped kernel and in/out channels swapped.
            cin, cout = blk["wt"].shape[0], blk["wt"].shape[1]
            wf = jnp.flip(blk["wt"], axis=(2, 3))
            taps = jnp.transpose(wf, (2, 3, 1, 0)).reshape(9, cout, cin)
            b3 = blk["bt"]
        w_all = w_all.at[i, 0:9, 0:cout, 0:cin].set(taps)
        b_all = b_all.at[i, 0, 0:cout, 0].set(b3)
        c1 = blk["w1"].shape[0]
        w_all = w_all.at[i, 9, 0:c1, 0:c1].set(blk["w1"][:, :, 0, 0])
        b_all = b_all.at[i, 1, 0:c1, 0].set(blk["b1"])

    fin = ucfg["input_mel_dim"]
    if fc is None:
        fc_w = jnp.eye(fin, dtype=jnp.float32)      # identity -> 'b (c f) t' branch
        fc_b = jnp.zeros((fin, 1), jnp.float32)
    else:
        fc_w = fc["w"].astype(jnp.float32)
        fc_b = fc["b"].reshape(-1, 1).astype(jnp.float32)
    return dict(w_all=w_all, b_all=b_all, fc_w=fc_w, fc_b=fc_b)


# ----------------------------------------------------------------------------
# fused UNet kernel (encoder + decoder + final_fc) -- one program per batch
# ----------------------------------------------------------------------------
def _make_kernel(depth, cmax, F, T, O):
    NL = F * T          # flat spatial axis, lives on lanes
    PAD = T + 1         # one zero F-row (+1 slack) on each side of the flat axis

    def glu(v):
        # GLU from the reference module: x * sigmoid(x); sigmoid via the exact
        # tanh identity so the transcendental runs on the EUP (no VALU divide).
        return v * (0.5 * (1.0 + jnp.tanh(0.5 * v)))

    def kernel(x_ref, mask_ref, w_ref, b_ref, fcw_ref, fcb_ref, out_ref, pad_ref):
        # Zero only the halo of the flat padded scratch (once per program).
        halo = jnp.zeros((cmax, PAD), jnp.float32)
        pad_ref[:, 0:PAD] = halo
        pad_ref[:, PAD + NL:PAD + NL + PAD] = halo

        def conv3x3(v, blk):
            # stride-1 padding-(1,1) 3x3 conv, channels-first, lane-dense:
            # 9 shifted slices of the flat-padded scratch; F halo comes from the
            # zero pad rows, T halo from the two precomputed lane masks.
            pad_ref[:, PAD:PAD + NL] = v
            acc = jnp.broadcast_to(b_ref[blk, 0], (cmax, NL))
            for k in range(9):
                dy, dx = k // 3 - 1, k % 3 - 1
                s = dy * T + dx
                xs = pad_ref[:, PAD + s:PAD + s + NL]
                if dx == -1:
                    xs = xs * mask_ref[0:1, :]
                elif dx == 1:
                    xs = xs * mask_ref[1:2, :]
                acc = acc + jnp.dot(w_ref[blk, k], xs,
                                    preferred_element_type=jnp.float32)
            return acc

        def conv1x1(v, blk):
            return (jnp.dot(w_ref[blk, 9], v, preferred_element_type=jnp.float32)
                    + b_ref[blk, 1])

        x = x_ref[...]                      # (C_MAX, F*T); padded channels are 0
        skips = []
        # ---- encoder -------------------------------------------------------
        for d in range(depth):
            x = glu(conv3x3(x, d))
            x = glu(conv1x1(x, d))
            skips.append(x)
        # ---- decoder (skip add BEFORE each block, as in the reference) ------
        for d in range(depth):
            blk = depth + d
            x = x + skips.pop()
            x = glu(conv1x1(x, blk))
            x = glu(conv3x3(x, blk))        # ConvTranspose2d as pre-flipped conv
        # ---- fused 'b c f t->(b t)(c f)' + Linear + '(b t) f->b f t' --------
        # (c == 1, so channel row 0 holds the whole (F, T) image)
        acc = jnp.broadcast_to(fcb_ref[...], (O, T))
        for f in range(F):
            acc = acc + fcw_ref[:, f:f + 1] * x[0:1, f * T:(f + 1) * T]
        out_ref[...] = acc

    return kernel


# ----------------------------------------------------------------------------
# full forward (matches UNetRadio2D.forward semantics for a 3-D input)
# ----------------------------------------------------------------------------
def unet_radio_2d(x, packed, *, ucfg):
    enc_plan, dec_plan = _channel_plan(ucfg)
    assert ucfg["kernel_size"] == 3 and ucfg["stride"] == 1  # TODO(synk): stride>1
    assert dec_plan[-1][1] == 1   # TODO(synk): '(c f)' flatten only for c == 1
    depth = ucfg["depth"]
    B, F, T = x.shape             # 'b (c f) t' with c = 1
    NL, PAD = F * T, T + 1
    cmax = packed["w_all"].shape[-1]
    nb = packed["w_all"].shape[0]
    O = packed["fc_w"].shape[0]

    # channels-first, lane-dense input: real data in channel row 0, rest zero
    x_in = jnp.zeros((B, cmax, NL), jnp.float32).at[:, 0, :].set(
        x.reshape(B, NL).astype(jnp.float32))

    # T-boundary masks for the flattened +-1 column shifts
    t_idx = jnp.arange(NL, dtype=jnp.int32) % T
    masks = jnp.stack([(t_idx >= 1), (t_idx <= T - 2)]).astype(jnp.float32)

    kernel = _make_kernel(depth, cmax, F, T, O)
    return pl.pallas_call(
        kernel,
        grid=(B,),
        out_shape=jax.ShapeDtypeStruct((B, O, T), jnp.float32),
        in_specs=[
            pl.BlockSpec((None, cmax, NL), lambda b: (b, 0, 0)),          # x
            pl.BlockSpec((2, NL), lambda b: (0, 0)),                      # masks
            pl.BlockSpec((nb, 10, cmax, cmax), lambda b: (0, 0, 0, 0)),   # w_all
            pl.BlockSpec((nb, 2, cmax, 1), lambda b: (0, 0, 0, 0)),       # b_all
            pl.BlockSpec((O, F), lambda b: (0, 0)),                       # fc_w
            pl.BlockSpec((O, 1), lambda b: (0, 0)),                       # fc_b
        ],
        out_specs=pl.BlockSpec((None, O, T), lambda b: (b, 0, 0)),
        scratch_shapes=[pltpu.VMEM((cmax, NL + 2 * PAD), jnp.float32)],
        compiler_params=pltpu.CompilerParams(dimension_semantics=("parallel",)),
    )(x_in, masks, packed["w_all"], packed["b_all"],
      packed["fc_w"], packed["fc_b"])


if __name__ == "__main__":
    ucfg = CONFIG["unet"]
    B, Fm, T = 2, ucfg["input_mel_dim"], 16

    key = jax.random.PRNGKey(0)
    kx, kp = jax.random.split(key)
    x = jax.random.normal(kx, (B, Fm, T), jnp.float32)   # 'b (c f) t' input, c = 1

    blocks, fc = init_params(kp, ucfg)
    packed = pack_params(blocks, fc, ucfg)

    fwd = jax.jit(functools.partial(unet_radio_2d, ucfg=ucfg))
    out = jax.block_until_ready(fwd(x, packed))

    assert out.shape == (B, ucfg["final_mel_dim"], T), out.shape
    assert bool(jnp.all(jnp.isfinite(out)))
    print("KERNEL_OK")
</pallas_src>

<mosaic_0001>
module attributes {stable_mosaic.version = 11 : i64} {
  func.func @kernel(%arg0: i32, %arg1: memref<1x16x256xf32, #tpu.memory_space<vmem>>, %arg2: memref<2x256xf32, #tpu.memory_space<vmem>>, %arg3: memref<4x10x16x16xf32, #tpu.memory_space<vmem>>, %arg4: memref<4x2x16x1xf32, #tpu.memory_space<vmem>>, %arg5: memref<32x16xf32, #tpu.memory_space<vmem>>, %arg6: memref<32x1xf32, #tpu.memory_space<vmem>>, %arg7: memref<1x32x16xf32, #tpu.memory_space<vmem>>, %arg8: memref<16x290xf32, #tpu.memory_space<vmem>>) attributes {dimension_semantics = [#tpu.dimension_semantics<parallel>], iteration_bounds = array<i64: 2>, scalar_prefetch = 0 : i64, scratch_operands = 1 : i64, tpu.core_type = #tpu.core_type<tc>, window_params = [{transform_indices = @transform_0, window_bounds = array<i64: 1, 16, 256>}, {pipeline_mode = #tpu.pipeline_mode<synchronous>, transform_indices = @transform_1, window_bounds = array<i64: 2, 256>}, {pipeline_mode = #tpu.pipeline_mode<synchronous>, transform_indices = @transform_2, window_bounds = array<i64: 4, 10, 16, 16>}, {pipeline_mode = #tpu.pipeline_mode<synchronous>, transform_indices = @transform_3, window_bounds = array<i64: 4, 2, 16, 1>}, {pipeline_mode = #tpu.pipeline_mode<synchronous>, transform_indices = @transform_4, window_bounds = array<i64: 32, 16>}, {pipeline_mode = #tpu.pipeline_mode<synchronous>, transform_indices = @transform_5, window_bounds = array<i64: 32, 1>}, {transform_indices = @transform_6, window_bounds = array<i64: 1, 32, 16>}]} {
    %cst = arith.constant 0.000000e+00 : f32
    %0 = vector.broadcast %cst : f32 to vector<16x17xf32>
    %c0 = arith.constant 0 : index
    %c0_0 = arith.constant 0 : index
    %1 = vector.load %arg8[%c0, %c0_0] : memref<16x290xf32, #tpu.memory_space<vmem>>, vector<16x17xf32>
    tpu.vector_store %arg8[%c0, %c0_0], %0 {strides = array<i32>} : memref<16x290xf32, #tpu.memory_space<vmem>>, vector<16x17xf32>,
    %c0_1 = arith.constant 0 : index
    %c273 = arith.constant 273 : index
    %2 = vector.load %arg8[%c0_1, %c273] : memref<16x290xf32, #tpu.memory_space<vmem>>, vector<16x17xf32>
    tpu.vector_store %arg8[%c0_1, %c273], %0 {strides = array<i32>} : memref<16x290xf32, #tpu.memory_space<vmem>>, vector<16x17xf32>,
    %c0_2 = arith.constant 0 : index
    %c0_3 = arith.constant 0 : index
    %c0_4 = arith.constant 0 : index
    %3 = vector.load %arg1[%c0_2, %c0_3, %c0_4] : memref<1x16x256xf32, #tpu.memory_space<vmem>>, vector<1x16x256xf32>
    %4 = vector.shape_cast %3 : vector<1x16x256xf32> to vector<16x256xf32>
    %c0_5 = arith.constant 0 : index
    %c17 = arith.constant 17 : index
    %5 = vector.load %arg8[%c0_5, %c17] : memref<16x290xf32, #tpu.memory_space<vmem>>, vector<16x256xf32>
    tpu.vector_store %arg8[%c0_5, %c17], %4 {strides = array<i32>} : memref<16x290xf32, #tpu.memory_space<vmem>>, vector<16x256xf32>,
    %c0_6 = arith.constant 0 : index
    %c0_7 = arith.constant 0 : index
    %c0_8 = arith.constant 0 : index
    %c0_9 = arith.constant 0 : index
    %6 = vector.load %arg4[%c0_6, %c0_7, %c0_8, %c0_9] : memref<4x2x16x1xf32, #tpu.memory_space<vmem>>, vector<1x1x16x1xf32>
    %7 = vector.shape_cast %6 : vector<1x1x16x1xf32> to vector<16x1xf32>
    %8 = vector.shape_cast %7 : vector<16x1xf32> to vector<16x1xf32>
    %9 = vector.broadcast %8 : vector<16x1xf32> to vector<16x256xf32>
    %c0_10 = arith.constant 0 : index
    %c0_11 = arith.constant 0 : index
    %10 = vector.load %arg8[%c0_10, %c0_11] : memref<16x290xf32, #tpu.memory_space<vmem>>, vector<16x256xf32>
    %c0_12 = arith.constant 0 : index
    %c0_13 = arith.constant 0 : index
    %11 = vector.load %arg2[%c0_12, %c0_13] : memref<2x256xf32, #tpu.memory_space<vmem>>, vector<1x256xf32>
    %12 = vector.broadcast %11 : vector<1x256xf32> to vector<16x256xf32>
    %13 = arith.mulf %10, %12 : vector<16x256xf32>
    %c0_14 = arith.constant 0 : index
    %c0_15 = arith.constant 0 : index
    %c0_16 = arith.constant 0 : index
    %c0_17 = arith.constant 0 : index
    %14 = vector.load %arg3[%c0_14, %c0_15, %c0_16, %c0_17] : memref<4x10x16x16xf32, #tpu.memory_space<vmem>>, vector<1x1x16x16xf32>
    %15 = vector.shape_cast %14 : vector<1x1x16x16xf32> to vector<16x16xf32>
    %cst_18 = arith.constant dense<0.000000e+00> : vector<16x256xf32>
    %16 = tpu.matmul %15, %13, %cst_18 {dimension_numbers = #tpu.dot_dimension_numbers<[1], [0], [0], [1], [0, 0, 1, 1], [], []>} : vector<16x16xf32>, vector<16x256xf32>, vector<16x256xf32> -> vector<16x256xf32>
    %17 = arith.addf %9, %16 : vector<16x256xf32>
    %c0_19 = arith.constant 0 : index
    %c1 = arith.constant 1 : index
    %18 = vector.load %arg8[%c0_19, %c1] : memref<16x290xf32, #tpu.memory_space<vmem>>, vector<16x256xf32>
    %c0_20 = arith.constant 0 : index
    %c1_21 = arith.constant 1 : index
    %c0_22 = arith.constant 0 : index
    %c0_23 = arith.constant 0 : index
    %19 = vector.load %arg3[%c0_20, %c1_21, %c0_22, %c0_23] : memref<4x10x16x16xf32, #tpu.memory_space<vmem>>, vector<1x1x16x16xf32>
    %20 = vector.shape_cast %19 : vector<1x1x16x16xf32> to vector<16x16xf32>
    %cst_24 = arith.constant dense<0.000000e+00> : vector<16x256xf32>
    %21 = tpu.matmul %20, %18, %cst_24 {dimension_numbers = #tpu.dot_dimension_numbers<[1], [0], [0], [1], [0, 0, 1, 1], [], []>} : vector<16x16xf32>, vector<16x256xf32>, vector<16x256xf32> -> vector<16x256xf32>
    %22 = arith.addf %17, %21 : vector<16x256xf32>
    %c0_25 = arith.constant 0 : index
    %c2 = arith.constant 2 : index
    %23 = vector.load %arg8[%c0_25, %c2] : memref<16x290xf32, #tpu.memory_space<vmem>>, vector<16x256xf32>
    %c1_26 = arith.constant 1 : index
    %c0_27 = arith.constant 0 : index
    %24 = vector.load %arg2[%c1_26, %c0_27] : memref<2x256xf32, #tpu.memory_space<vmem>>, vector<1x256xf32>
    %25 = vector.broadcast %24 : vector<1x256xf32> to vector<16x256xf32>
    %26 = arith.mulf %23, %25 : vector<16x256xf32>
    %c0_28 = arith.constant 0 : index
    %c2_29 = arith.constant 2 : index
    %c0_30 = arith.constant 0 : index
    %c0_31 = arith.constant 0 : index
    %27 = vector.load %arg3[%c0_28, %c2_29, %c0_30, %c0_31] : memref<4x10x16x16xf32, #tpu.memory_space<vmem>>, vector<1x1x16x16xf32>
    %28 = vector.shape_cast %27 : vector<1x1x16x16xf32> to vector<16x16xf32>
    %cst_32 = arith.constant dense<0.000000e+00> : vector<16x256xf32>
    %29 = tpu.matmul %28, %26, %cst_32 {dimension_numbers = #tpu.dot_dimension_numbers<[1], [0], [0], [1], [0, 0, 1, 1], [], []>} : vector<16x16xf32>, vector<16x256xf32>, vector<16x256xf32> -> vector<16x256xf32>
    %30 = arith.addf %22, %29 : vector<16x256xf32>
    %c0_33 = arith.constant 0 : index
    %c16 = arith.constant 16 : index
    %31 = vector.load %arg8[%c0_33, %c16] : memref<16x290xf32, #tpu.memory_space<vmem>>, vector<16x256xf32>
    %c0_34 = arith.constant 0 : index
    %c0_35 = arith.constant 0 : index
    %32 = vector.load %arg2[%c0_34, %c0_35] : memref<2x256xf32, #tpu.memory_space<vmem>>, vector<1x256xf32>
    %33 = vector.broadcast %32 : vector<1x256xf32> to vector<16x256xf32>
    %34 = arith.mulf %31, %33 : vector<16x256xf32>
    %c0_36 = arith.constant 0 : index
    %c3 = arith.constant 3 : index
    %c0_37 = arith.constant 0 : index
    %c0_38 = arith.constant 0 : index
    %35 = vector.load %arg3[%c0_36, %c3, %c0_37, %c0_38] : memref<4x10x16x16xf32, #tpu.memory_space<vmem>>, vector<1x1x16x16xf32>
    %36 = vector.shape_cast %35 : vector<1x1x16x16xf32> to vector<16x16xf32>
    %cst_39 = arith.constant dense<0.000000e+00> : vector<16x256xf32>
    %37 = tpu.matmul %36, %34, %cst_39 {dimension_numbers = #tpu.dot_dimension_numbers<[1], [0], [0], [1], [0, 0, 1, 1], [], []>} : vector<16x16xf32>, vector<16x256xf32>, vector<16x256xf32> -> vector<16x256xf32>
    %38 = arith.addf %30, %37 : vector<16x256xf32>
    %c0_40 = arith.constant 0 : index
    %c17_41 = arith.constant 17 : index
    %39 = vector.load %arg8[%c0_40, %c17_41] : memref<16x290xf32, #tpu.memory_space<vmem>>, vector<16x256xf32>
    %c0_42 = arith.constant 0 : index
    %c4 = arith.constant 4 : index
    %c0_43 = arith.constant 0 : index
    %c0_44 = arith.constant 0 : index
    %40 = vector.load %arg3[%c0_42, %c4, %c0_43, %c0_44] : memref<4x10x16x16xf32, #tpu.memory_space<vmem>>, vector<1x1x16x16xf32>
    %41 = vector.shape_cast %40 : vector<1x1x16x16xf32> to vector<16x16xf32>
    %cst_45 = arith.constant dense<0.000000e+00> : vector<16x256xf32>
    %42 = tpu.matmul %41, %39, %cst_45 {dimension_numbers = #tpu.dot_dimension_numbers<[1], [0], [0], [1], [0, 0, 1, 1], [], []>} : vector<16x16xf32>, vector<16x256xf32>, vector<16x256xf32> -> vector<16x256xf32>
    %43 = arith.addf %38, %42 : vector<16x256xf32>
    %c0_46 = arith.constant 0 : index
    %c18 = arith.constant 18 : index
    %44 = vector.load %arg8[%c0_46, %c18] : memref<16x290xf32, #tpu.memory_space<vmem>>, vector<16x256xf32>
    %c1_47 = arith.constant 1 : index
    %c0_48 = arith.constant 0 : index
    %45 = vector.load %arg2[%c1_47, %c0_48] : memref<2x256xf32, #tpu.memory_space<vmem>>, vector<1x256xf32>
    %46 = vector.broadcast %45 : vector<1x256xf32> to vector<16x256xf32>
    %47 = arith.mulf %44, %46 : vector<16x256xf32>
    %c0_49 = arith.constant 0 : index
    %c5 = arith.constant 5 : index
    %c0_50 = arith.constant 0 : index
    %c0_51 = arith.constant 0 : index
    %48 = vector.load %arg3[%c0_49, %c5, %c0_50, %c0_51] : memref<4x10x16x16xf32, #tpu.memory_space<vmem>>, vector<1x1x16x16xf32>
    %49 = vector.shape_cast %48 : vector<1x1x16x16xf32> to vector<16x16xf32>
    %cst_52 = arith.constant dense<0.000000e+00> : vector<16x256xf32>
    %50 = tpu.matmul %49, %47, %cst_52 {dimension_numbers = #tpu.dot_dimension_numbers<[1], [0], [0], [1], [0, 0, 1, 1], [], []>} : vector<16x16xf32>, vector<16x256xf32>, vector<16x256xf32> -> vector<16x256xf32>
    %51 = arith.addf %43, %50 : vector<16x256xf32>
    %c0_53 = arith.constant 0 : index
    %c32 = arith.constant 32 : index
    %52 = vector.load %arg8[%c0_53, %c32] : memref<16x290xf32, #tpu.memory_space<vmem>>, vector<16x256xf32>
    %c0_54 = arith.constant 0 : index
    %c0_55 = arith.constant 0 : index
    %53 = vector.load %arg2[%c0_54, %c0_55] : memref<2x256xf32, #tpu.memory_space<vmem>>, vector<1x256xf32>
    %54 = vector.broadcast %53 : vector<1x256xf32> to vector<16x256xf32>
    %55 = arith.mulf %52, %54 : vector<16x256xf32>
    %c0_56 = arith.constant 0 : index
    %c6 = arith.constant 6 : index
    %c0_57 = arith.constant 0 : index
    %c0_58 = arith.constant 0 : index
    %56 = vector.load %arg3[%c0_56, %c6, %c0_57, %c0_58] : memref<4x10x16x16xf32, #tpu.memory_space<vmem>>, vector<1x1x16x16xf32>
    %57 = vector.shape_cast %56 : vector<1x1x16x16xf32> to vector<16x16xf32>
    %cst_59 = arith.constant dense<0.000000e+00> : vector<16x256xf32>
    %58 = tpu.matmul %57, %55, %cst_59 {dimension_numbers = #tpu.dot_dimension_numbers<[1], [0], [0], [1], [0, 0, 1, 1], [], []>} : vector<16x16xf32>, vector<16x256xf32>, vector<16x256xf32> -> vector<16x256xf32>
    %59 = arith.addf %51, %58 : vector<16x256xf32>
    %c0_60 = arith.constant 0 : index
    %c33 = arith.constant 33 : index
    %60 = vector.load %arg8[%c0_60, %c33] : memref<16x290xf32, #tpu.memory_space<vmem>>, vector<16x256xf32>
    %c0_61 = arith.constant 0 : index
    %c7 = arith.constant 7 : index
    %c0_62 = arith.constant 0 : index
    %c0_63 = arith.constant 0 : index
    %61 = vector.load %arg3[%c0_61, %c7, %c0_62, %c0_63] : memref<4x10x16x16xf32, #tpu.memory_space<vmem>>, vector<1x1x16x16xf32>
    %62 = vector.shape_cast %61 : vector<1x1x16x16xf32> to vector<16x16xf32>
    %cst_64 = arith.constant dense<0.000000e+00> : vector<16x256xf32>
    %63 = tpu.matmul %62, %60, %cst_64 {dimension_numbers = #tpu.dot_dimension_numbers<[1], [0], [0], [1], [0, 0, 1, 1], [], []>} : vector<16x16xf32>, vector<16x256xf32>, vector<16x256xf32> -> vector<16x256xf32>
    %64 = arith.addf %59, %63 : vector<16x256xf32>
    %c0_65 = arith.constant 0 : index
    %c34 = arith.constant 34 : index
    %65 = vector.load %arg8[%c0_65, %c34] : memref<16x290xf32, #tpu.memory_space<vmem>>, vector<16x256xf32>
    %c1_66 = arith.constant 1 : index
    %c0_67 = arith.constant 0 : index
    %66 = vector.load %arg2[%c1_66, %c0_67] : memref<2x256xf32, #tpu.memory_space<vmem>>, vector<1x256xf32>
    %67 = vector.broadcast %66 : vector<1x256xf32> to vector<16x256xf32>
    %68 = arith.mulf %65, %67 : vector<16x256xf32>
    %c0_68 = arith.constant 0 : index
    %c8 = arith.constant 8 : index
    %c0_69 = arith.constant 0 : index
    %c0_70 = arith.constant 0 : index
    %69 = vector.load %arg3[%c0_68, %c8, %c0_69, %c0_70] : memref<4x10x16x16xf32, #tpu.memory_space<vmem>>, vector<1x1x16x16xf32>
    %70 = vector.shape_cast %69 : vector<1x1x16x16xf32> to vector<16x16xf32>
    %cst_71 = arith.constant dense<0.000000e+00> : vector<16x256xf32>
    %71 = tpu.matmul %70, %68, %cst_71 {dimension_numbers = #tpu.dot_dimension_numbers<[1], [0], [0], [1], [0, 0, 1, 1], [], []>} : vector<16x16xf32>, vector<16x256xf32>, vector<16x256xf32> -> vector<16x256xf32>
    %72 = arith.addf %64, %71 : vector<16x256xf32>
    %cst_72 = arith.constant 5.000000e-01 : f32
    %73 = vector.broadcast %cst_72 : f32 to vector<16x256xf32>
    %74 = arith.mulf %73, %72 : vector<16x256xf32>
    %75 = math.tanh %74 : vector<16x256xf32>
    %cst_73 = arith.constant 1.000000e+00 : f32
    %76 = vector.broadcast %cst_73 : f32 to vector<16x256xf32>
    %77 = arith.addf %76, %75 : vector<16x256xf32>
    %cst_74 = arith.constant 5.000000e-01 : f32
    %78 = vector.broadcast %cst_74 : f32 to vector<16x256xf32>
    %79 = arith.mulf %78, %77 : vector<16x256xf32>
    %80 = arith.mulf %72, %79 : vector<16x256xf32>
    %c0_75 = arith.constant 0 : index
    %c9 = arith.constant 9 : index
    %c0_76 = arith.constant 0 : index
    %c0_77 = arith.constant 0 : index
    %81 = vector.load %arg3[%c0_75, %c9, %c0_76, %c0_77] : memref<4x10x16x16xf32, #tpu.memory_space<vmem>>, vector<1x1x16x16xf32>
    %82 = vector.shape_cast %81 : vector<1x1x16x16xf32> to vector<16x16xf32>
    %cst_78 = arith.constant dense<0.000000e+00> : vector<16x256xf32>
    %83 = tpu.matmul %82, %80, %cst_78 {dimension_numbers = #tpu.dot_dimension_numbers<[1], [0], [0], [1], [0, 0, 1, 1], [], []>} : vector<16x16xf32>, vector<16x256xf32>, vector<16x256xf32> -> vector<16x256xf32>
    %c0_79 = arith.constant 0 : index
    %c1_80 = arith.constant 1 : index
    %c0_81 = arith.constant 0 : index
    %c0_82 = arith.constant 0 : index
    %84 = vector.load %arg4[%c0_79, %c1_80, %c0_81, %c0_82] : memref<4x2x16x1xf32, #tpu.memory_space<vmem>>, vector<1x1x16x1xf32>
    %85 = vector.shape_cast %84 : vector<1x1x16x1xf32> to vector<16x1xf32>
    %86 = vector.broadcast %85 : vector<16x1xf32> to vector<16x256xf32>
    %87 = arith.addf %83, %86 : vector<16x256xf32>
    %cst_83 = arith.constant 5.000000e-01 : f32
    %88 = vector.broadcast %cst_83 : f32 to vector<16x256xf32>
    %89 = arith.mulf %88, %87 : vector<16x256xf32>
    %90 = math.tanh %89 : vector<16x256xf32>
    %cst_84 = arith.constant 1.000000e+00 : f32
    %91 = vector.broadcast %cst_84 : f32 to vector<16x256xf32>
    %92 = arith.addf %91, %90 : vector<16x256xf32>
    %cst_85 = arith.constant 5.000000e-01 : f32
    %93 = vector.broadcast %cst_85 : f32 to vector<16x256xf32>
    %94 = arith.mulf %93, %92 : vector<16x256xf32>
    %95 = arith.mulf %87, %94 : vector<16x256xf32>
    %c0_86 = arith.constant 0 : index
    %c17_87 = arith.constant 17 : index
    %96 = vector.load %arg8[%c0_86, %c17_87] : memref<16x290xf32, #tpu.memory_space<vmem>>, vector<16x256xf32>
    tpu.vector_store %arg8[%c0_86, %c17_87], %95 {strides = array<i32>} : memref<16x290xf32, #tpu.memory_space<vmem>>, vector<16x256xf32>,
    %c1_88 = arith.constant 1 : index
    %c0_89 = arith.constant 0 : index
    %c0_90 = arith.constant 0 : index
    %c0_91 = arith.constant 0 : index
    %97 = vector.load %arg4[%c1_88, %c0_89, %c0_90, %c0_91] : memref<4x2x16x1xf32, #tpu.memory_space<vmem>>, vector<1x1x16x1xf32>
    %98 = vector.shape_cast %97 : vector<1x1x16x1xf32> to vector<16x1xf32>
    %99 = vector.shape_cast %98 : vector<16x1xf32> to vector<16x1xf32>
    %100 = vector.broadcast %99 : vector<16x1xf32> to vector<16x256xf32>
    %c0_92 = arith.constant 0 : index
    %c0_93 = arith.constant 0 : index
    %101 = vector.load %arg8[%c0_92, %c0_93] : memref<16x290xf32, #tpu.memory_space<vmem>>, vector<16x256xf32>
    %c0_94 = arith.constant 0 : index
    %c0_95 = arith.constant 0 : index
    %102 = vector.load %arg2[%c0_94, %c0_95] : memref<2x256xf32, #tpu.memory_space<vmem>>, vector<1x256xf32>
    %103 = vector.broadcast %102 : vector<1x256xf32> to vector<16x256xf32>
    %104 = arith.mulf %101, %103 : vector<16x256xf32>
    %c1_96 = arith.constant 1 : index
    %c0_97 = arith.constant 0 : index
    %c0_98 = arith.constant 0 : index
    %c0_99 = arith.constant 0 : index
    %105 = vector.load %arg3[%c1_96, %c0_97, %c0_98, %c0_99] : memref<4x10x16x16xf32, #tpu.memory_space<vmem>>, vector<1x1x16x16xf32>
    %106 = vector.shape_cast %105 : vector<1x1x16x16xf32> to vector<16x16xf32>
    %cst_100 = arith.constant dense<0.000000e+00> : vector<16x256xf32>
    %107 = tpu.matmul %106, %104, %cst_100 {dimension_numbers = #tpu.dot_dimension_numbers<[1], [0], [0], [1], [0, 0, 1, 1], [], []>} : vector<16x16xf32>, vector<16x256xf32>, vector<16x256xf32> -> vector<16x256xf32>
    %108 = arith.addf %100, %107 : vector<16x256xf32>
    %c0_101 = arith.constant 0 : index
    %c1_102 = arith.constant 1 : index
    %109 = vector.load %arg8[%c0_101, %c1_102] : memref<16x290xf32, #tpu.memory_space<vmem>>, vector<16x256xf32>
    %c1_103 = arith.constant 1 : index
    %c1_104 = arith.constant 1 : index
    %c0_105 = arith.constant 0 : index
    %c0_106 = arith.constant 0 : index
    %110 = vector.load %arg3[%c1_103, %c1_104, %c0_105, %c0_106] : memref<4x10x16x16xf32, #tpu.memory_space<vmem>>, vector<1x1x16x16xf32>
    %111 = vector.shape_cast %110 : vector<1x1x16x16xf32> to vector<16x16xf32>
    %cst_107 = arith.constant dense<0.000000e+00> : vector<16x256xf32>
    %112 = tpu.matmul %111, %109, %cst_107 {dimension_numbers = #tpu.dot_dimension_numbers<[1], [0], [0], [1], [0, 0, 1, 1], [], []>} : vector<16x16xf32>, vector<16x256xf32>, vector<16x256xf32> -> vector<16x256xf32>
    %113 = arith.addf %108, %112 : vector<16x256xf32>
    %c0_108 = arith.constant 0 : index
    %c2_109 = arith.constant 2 : index
    %114 = vector.load %arg8[%c0_108, %c2_109] : memref<16x290xf32, #tpu.memory_space<vmem>>, vector<16x256xf32>
    %c1_110 = arith.constant 1 : index
    %c0_111 = arith.constant 0 : index
    %115 = vector.load %arg2[%c1_110, %c0_111] : memref<2x256xf32, #tpu.memory_space<vmem>>, vector<1x256xf32>
    %116 = vector.broadcast %115 : vector<1x256xf32> to vector<16x256xf32>
    %117 = arith.mulf %114, %116 : vector<16x256xf32>
    %c1_112 = arith.constant 1 : index
    %c2_113 = arith.constant 2 : index
    %c0_114 = arith.constant 0 : index
    %c0_115 = arith.constant 0 : index
    %118 = vector.load %arg3[%c1_112, %c2_113, %c0_114, %c0_115] : memref<4x10x16x16xf32, #tpu.memory_space<vmem>>, vector<1x1x16x16xf32>
    %119 = vector.shape_cast %118 : vector<1x1x16x16xf32> to vector<16x16xf32>
    %cst_116 = arith.constant dense<0.000000e+00> : vector<16x256xf32>
    %120 = tpu.matmul %119, %117, %cst_116 {dimension_numbers = #tpu.dot_dimension_numbers<[1], [0], [0], [1], [0, 0, 1, 1], [], []>} : vector<16x16xf32>, vector<16x256xf32>, vector<16x256xf32> -> vector<16x256xf32>
    %121 = arith.addf %113, %120 : vector<16x256xf32>
    %c0_117 = arith.constant 0 : index
    %c16_118 = arith.constant 16 : index
    %122 = vector.load %arg8[%c0_117, %c16_118] : memref<16x290xf32, #tpu.memory_space<vmem>>, vector<16x256xf32>
    %c0_119 = arith.constant 0 : index
    %c0_120 = arith.constant 0 : index
    %123 = vector.load %arg2[%c0_119, %c0_120] : memref<2x256xf32, #tpu.memory_space<vmem>>, vector<1x256xf32>
    %124 = vector.broadcast %123 : vector<1x256xf32> to vector<16x256xf32>
    %125 = arith.mulf %122, %124 : vector<16x256xf32>
    %c1_121 = arith.constant 1 : index
    %c3_122 = arith.constant 3 : index
    %c0_123 = arith.constant 0 : index
    %c0_124 = arith.constant 0 : index
    %126 = vector.load %arg3[%c1_121, %c3_122, %c0_123, %c0_124] : memref<4x10x16x16xf32, #tpu.memory_space<vmem>>, vector<1x1x16x16xf32>
    %127 = vector.shape_cast %126 : vector<1x1x16x16xf32> to vector<16x16xf32>
    %cst_125 = arith.constant dense<0.000000e+00> : vector<16x256xf32>
    %128 = tpu.matmul %127, %125, %cst_125 {dimension_numbers = #tpu.dot_dimension_numbers<[1], [0], [0], [1], [0, 0, 1, 1], [], []>} : vector<16x16xf32>, vector<16x256xf32>, vector<16x256xf32> -> vector<16x256xf32>
    %129 = arith.addf %121, %128 : vector<16x256xf32>
    %c0_126 = arith.constant 0 : index
    %c17_127 = arith.constant 17 : index
    %130 = vector.load %arg8[%c0_126, %c17_127] : memref<16x290xf32, #tpu.memory_space<vmem>>, vector<16x256xf32>
    %c1_128 = arith.constant 1 : index
    %c4_129 = arith.constant 4 : index
    %c0_130 = arith.constant 0 : index
    %c0_131 = arith.constant 0 : index
    %131 = vector.load %arg3[%c1_128, %c4_129, %c0_130, %c0_131] : memref<4x10x16x16xf32, #tpu.memory_space<vmem>>, vector<1x1x16x16xf32>
    %132 = vector.shape_cast %131 : vector<1x1x16x16xf32> to vector<16x16xf32>
    %cst_132 = arith.constant dense<0.000000e+00> : vector<16x256xf32>
    %133 = tpu.matmul %132, %130, %cst_132 {dimension_numbers = #tpu.dot_dimension_numbers<[1], [0], [0], [1], [0, 0, 1, 1], [], []>} : vector<16x16xf32>, vector<16x256xf32>, vector<16x256xf32> -> vector<16x256xf32>
    %134 = arith.addf %129, %133 : vector<16x256xf32>
    %c0_133 = arith.constant 0 : index
    %c18_134 = arith.constant 18 : index
    %135 = vector.load %arg8[%c0_133, %c18_134] : memref<16x290xf32, #tpu.memory_space<vmem>>, vector<16x256xf32>
    %c1_135 = arith.constant 1 : index
    %c0_136 = arith.constant 0 : index
    %136 = vector.load %arg2[%c1_135, %c0_136] : memref<2x256xf32, #tpu.memory_space<vmem>>, vector<1x256xf32>
    %137 = vector.broadcast %136 : vector<1x256xf32> to vector<16x256xf32>
    %138 = arith.mulf %135, %137 : vector<16x256xf32>
    %c1_137 = arith.constant 1 : index
    %c5_138 = arith.constant 5 : index
    %c0_139 = arith.constant 0 : index
    %c0_140 = arith.constant 0 : index
    %139 = vector.load %arg3[%c1_137, %c5_138, %c0_139, %c0_140] : memref<4x10x16x16xf32, #tpu.memory_space<vmem>>, vector<1x1x16x16xf32>
    %140 = vector.shape_cast %139 : vector<1x1x16x16xf32> to vector<16x16xf32>
    %cst_141 = arith.constant dense<0.000000e+00> : vector<16x256xf32>
    %141 = tpu.matmul %140, %138, %cst_141 {dimension_numbers = #tpu.dot_dimension_numbers<[1], [0], [0], [1], [0, 0, 1, 1], [], []>} : vector<16x16xf32>, vector<16x256xf32>, vector<16x256xf32> -> vector<16x256xf32>
    %142 = arith.addf %134, %141 : vector<16x256xf32>
    %c0_142 = arith.constant 0 : index
    %c32_143 = arith.constant 32 : index
    %143 = vector.load %arg8[%c0_142, %c32_143] : memref<16x290xf32, #tpu.memory_space<vmem>>, vector<16x256xf32>
    %c0_144 = arith.constant 0 : index
    %c0_145 = arith.constant 0 : index
    %144 = vector.load %arg2[%c0_144, %c0_145] : memref<2x256xf32, #tpu.memory_space<vmem>>, vector<1x256xf32>
    %145 = vector.broadcast %144 : vector<1x256xf32> to vector<16x256xf32>
    %146 = arith.mulf %143, %145 : vector<16x256xf32>
    %c1_146 = arith.constant 1 : index
    %c6_147 = arith.constant 6 : index
    %c0_148 = arith.constant 0 : index
    %c0_149 = arith.constant 0 : index
    %147 = vector.load %arg3[%c1_146, %c6_147, %c0_148, %c0_149] : memref<4x10x16x16xf32, #tpu.memory_space<vmem>>, vector<1x1x16x16xf32>
    %148 = vector.shape_cast %147 : vector<1x1x16x16xf32> to vector<16x16xf32>
    %cst_150 = arith.constant dense<0.000000e+00> : vector<16x256xf32>
    %149 = tpu.matmul %148, %146, %cst_150 {dimension_numbers = #tpu.dot_dimension_numbers<[1], [0], [0], [1], [0, 0, 1, 1], [], []>} : vector<16x16xf32>, vector<16x256xf32>, vector<16x256xf32> -> vector<16x256xf32>
    %150 = arith.addf %142, %149 : vector<16x256xf32>
    %c0_151 = arith.constant 0 : index
    %c33_152 = arith.constant 33 : index
    %151 = vector.load %arg8[%c0_151, %c33_152] : memref<16x290xf32, #tpu.memory_space<vmem>>, vector<16x256xf32>
    %c1_153 = arith.constant 1 : index
    %c7_154 = arith.constant 7 : index
    %c0_155 = arith.constant 0 : index
    %c0_156 = arith.constant 0 : index
    %152 = vector.load %arg3[%c1_153, %c7_154, %c0_155, %c0_156] : memref<4x10x16x16xf32, #tpu.memory_space<vmem>>, vector<1x1x16x16xf32>
    %153 = vector.shape_cast %152 : vector<1x1x16x16xf32> to vector<16x16xf32>
    %cst_157 = arith.constant dense<0.000000e+00> : vector<16x256xf32>
    %154 = tpu.matmul %153, %151, %cst_157 {dimension_numbers = #tpu.dot_dimension_numbers<[1], [0], [0], [1], [0, 0, 1, 1], [], []>} : vector<16x16xf32>, vector<16x256xf32>, vector<16x256xf32> -> vector<16x256xf32>
    %155 = arith.addf %150, %154 : vector<16x256xf32>
    %c0_158 = arith.constant 0 : index
    %c34_159 = arith.constant 34 : index
    %156 = vector.load %arg8[%c0_158, %c34_159] : memref<16x290xf32, #tpu.memory_space<vmem>>, vector<16x256xf32>
    %c1_160 = arith.constant 1 : index
    %c0_161 = arith.constant 0 : index
    %157 = vector.load %arg2[%c1_160, %c0_161] : memref<2x256xf32, #tpu.memory_space<vmem>>, vector<1x256xf32>
    %158 = vector.broadcast %157 : vector<1x256xf32> to vector<16x256xf32>
    %159 = arith.mulf %156, %158 : vector<16x256xf32>
    %c1_162 = arith.constant 1 : index
    %c8_163 = arith.constant 8 : index
    %c0_164 = arith.constant 0 : index
    %c0_165 = arith.constant 0 : index
    %160 = vector.load %arg3[%c1_162, %c8_163, %c0_164, %c0_165] : memref<4x10x16x16xf32, #tpu.memory_space<vmem>>, vector<1x1x16x16xf32>
    %161 = vector.shape_cast %160 : vector<1x1x16x16xf32> to vector<16x16xf32>
    %cst_166 = arith.constant dense<0.000000e+00> : vector<16x256xf32>
    %162 = tpu.matmul %161, %159, %cst_166 {dimension_numbers = #tpu.dot_dimension_numbers<[1], [0], [0], [1], [0, 0, 1, 1], [], []>} : vector<16x16xf32>, vector<16x256xf32>, vector<16x256xf32> -> vector<16x256xf32>
    %163 = arith.addf %155, %162 : vector<16x256xf32>
    %cst_167 = arith.constant 5.000000e-01 : f32
    %164 = vector.broadcast %cst_167 : f32 to vector<16x256xf32>
    %165 = arith.mulf %164, %163 : vector<16x256xf32>
    %166 = math.tanh %165 : vector<16x256xf32>
    %cst_168 = arith.constant 1.000000e+00 : f32
    %167 = vector.broadcast %cst_168 : f32 to vector<16x256xf32>
    %168 = arith.addf %167, %166 : vector<16x256xf32>
    %cst_169 = arith.constant 5.000000e-01 : f32
    %169 = vector.broadcast %cst_169 : f32 to vector<16x256xf32>
    %170 = arith.mulf %169, %168 : vector<16x256xf32>
    %171 = arith.mulf %163, %170 : vector<16x256xf32>
    %c1_170 = arith.constant 1 : index
    %c9_171 = arith.constant 9 : index
    %c0_172 = arith.constant 0 : index
    %c0_173 = arith.constant 0 : index
    %172 = vector.load %arg3[%c1_170, %c9_171, %c0_172, %c0_173] : memref<4x10x16x16xf32, #tpu.memory_space<vmem>>, vector<1x1x16x16xf32>
    %173 = vector.shape_cast %172 : vector<1x1x16x16xf32> to vector<16x16xf32>
    %cst_174 = arith.constant dense<0.000000e+00> : vector<16x256xf32>
    %174 = tpu.matmul %173, %171, %cst_174 {dimension_numbers = #tpu.dot_dimension_numbers<[1], [0], [0], [1], [0, 0, 1, 1], [], []>} : vector<16x16xf32>, vector<16x256xf32>, vector<16x256xf32> -> vector<16x256xf32>
    %c1_175 = arith.constant 1 : index
    %c1_176 = arith.constant 1 : index
    %c0_177 = arith.constant 0 : index
    %c0_178 = arith.constant 0 : index
    %175 = vector.load %arg4[%c1_175, %c1_176, %c0_177, %c0_178] : memref<4x2x16x1xf32, #tpu.memory_space<vmem>>, vector<1x1x16x1xf32>
    %176 = vector.shape_cast %175 : vector<1x1x16x1xf32> to vector<16x1xf32>
    %177 = vector.broadcast %176 : vector<16x1xf32> to vector<16x256xf32>
    %178 = arith.addf %174, %177 : vector<16x256xf32>
    %cst_179 = arith.constant 5.000000e-01 : f32
    %179 = vector.broadcast %cst_179 : f32 to vector<16x256xf32>
    %180 = arith.mulf %179, %178 : vector<16x256xf32>
    %181 = math.tanh %180 : vector<16x256xf32>
    %cst_180 = arith.constant 1.000000e+00 : f32
    %182 = vector.broadcast %cst_180 : f32 to vector<16x256xf32>
    %183 = arith.addf %182, %181 : vector<16x256xf32>
    %cst_181 = arith.constant 5.000000e-01 : f32
    %184 = vector.broadcast %cst_181 : f32 to vector<16x256xf32>
    %185 = arith.mulf %184, %183 : vector<16x256xf32>
    %186 = arith.mulf %178, %185 : vector<16x256xf32>
    %187 = arith.addf %186, %186 : vector<16x256xf32>
    %c2_182 = arith.constant 2 : index
    %c9_183 = arith.constant 9 : index
    %c0_184 = arith.constant 0 : index
    %c0_185 = arith.constant 0 : index
    %188 = vector.load %arg3[%c2_182, %c9_183, %c0_184, %c0_185] : memref<4x10x16x16xf32, #tpu.memory_space<vmem>>, vector<1x1x16x16xf32>
    %189 = vector.shape_cast %188 : vector<1x1x16x16xf32> to vector<16x16xf32>
    %cst_186 = arith.constant dense<0.000000e+00> : vector<16x256xf32>
    %190 = tpu.matmul %189, %187, %cst_186 {dimension_numbers = #tpu.dot_dimension_numbers<[1], [0], [0], [1], [0, 0, 1, 1], [], []>} : vector<16x16xf32>, vector<16x256xf32>, vector<16x256xf32> -> vector<16x256xf32>
    %c2_187 = arith.constant 2 : index
    %c1_188 = arith.constant 1 : index
    %c0_189 = arith.constant 0 : index
    %c0_190 = arith.constant 0 : index
    %191 = vector.load %arg4[%c2_187, %c1_188, %c0_189, %c0_190] : memref<4x2x16x1xf32, #tpu.memory_space<vmem>>, vector<1x1x16x1xf32>
    %192 = vector.shape_cast %191 : vector<1x1x16x1xf32> to vector<16x1xf32>
    %193 = vector.broadcast %192 : vector<16x1xf32> to vector<16x256xf32>
    %194 = arith.addf %190, %193 : vector<16x256xf32>
    %cst_191 = arith.constant 5.000000e-01 : f32
    %195 = vector.broadcast %cst_191 : f32 to vector<16x256xf32>
    %196 = arith.mulf %195, %194 : vector<16x256xf32>
    %197 = math.tanh %196 : vector<16x256xf32>
    %cst_192 = arith.constant 1.000000e+00 : f32
    %198 = vector.broadcast %cst_192 : f32 to vector<16x256xf32>
    %199 = arith.addf %198, %197 : vector<16x256xf32>
    %cst_193 = arith.constant 5.000000e-01 : f32
    %200 = vector.broadcast %cst_193 : f32 to vector<16x256xf32>
    %201 = arith.mulf %200, %199 : vector<16x256xf32>
    %202 = arith.mulf %194, %201 : vector<16x256xf32>
    %c0_194 = arith.constant 0 : index
    %c17_195 = arith.constant 17 : index
    %203 = vector.load %arg8[%c0_194, %c17_195] : memref<16x290xf32, #tpu.memory_space<vmem>>, vector<16x256xf32>
    tpu.vector_store %arg8[%c0_194, %c17_195], %202 {strides = array<i32>} : memref<16x290xf32, #tpu.memory_space<vmem>>, vector<16x256xf32>,
    %c2_196 = arith.constant 2 : index
    %c0_197 = arith.constant 0 : index
    %c0_198 = arith.constant 0 : index
    %c0_199 = arith.constant 0 : index
    %204 = vector.load %arg4[%c2_196, %c0_197, %c0_198, %c0_199] : memref<4x2x16x1xf32, #tpu.memory_space<vmem>>, vector<1x1x16x1xf32>
    %205 = vector.shape_cast %204 : vector<1x1x16x1xf32> to vector<16x1xf32>
    %206 = vector.shape_cast %205 : vector<16x1xf32> to vector<16x1xf32>
    %207 = vector.broadcast %206 : vector<16x1xf32> to vector<16x256xf32>
    %c0_200 = arith.constant 0 : index
    %c0_201 = arith.constant 0 : index
    %208 = vector.load %arg8[%c0_200, %c0_201] : memref<16x290xf32, #tpu.memory_space<vmem>>, vector<16x256xf32>
    %c0_202 = arith.constant 0 : index
    %c0_203 = arith.constant 0 : index
    %209 = vector.load %arg2[%c0_202, %c0_203] : memref<2x256xf32, #tpu.memory_space<vmem>>, vector<1x256xf32>
    %210 = vector.broadcast %209 : vector<1x256xf32> to vector<16x256xf32>
    %211 = arith.mulf %208, %210 : vector<16x256xf32>
    %c2_204 = arith.constant 2 : index
    %c0_205 = arith.constant 0 : index
    %c0_206 = arith.constant 0 : index
    %c0_207 = arith.constant 0 : index
    %212 = vector.load %arg3[%c2_204, %c0_205, %c0_206, %c0_207] : memref<4x10x16x16xf32, #tpu.memory_space<vmem>>, vector<1x1x16x16xf32>
    %213 = vector.shape_cast %212 : vector<1x1x16x16xf32> to vector<16x16xf32>
    %cst_208 = arith.constant dense<0.000000e+00> : vector<16x256xf32>
    %214 = tpu.matmul %213, %211, %cst_208 {dimension_numbers = #tpu.dot_dimension_numbers<[1], [0], [0], [1], [0, 0, 1, 1], [], []>} : vector<16x16xf32>, vector<16x256xf32>, vector<16x256xf32> -> vector<16x256xf32>
    %215 = arith.addf %207, %214 : vector<16x256xf32>
    %c0_209 = arith.constant 0 : index
    %c1_210 = arith.constant 1 : index
    %216 = vector.load %arg8[%c0_209, %c1_210] : memref<16x290xf32, #tpu.memory_space<vmem>>, vector<16x256xf32>
    %c2_211 = arith.constant 2 : index
    %c1_212 = arith.constant 1 : index
    %c0_213 = arith.constant 0 : index
    %c0_214 = arith.constant 0 : index
    %217 = vector.load %arg3[%c2_211, %c1_212, %c0_213, %c0_214] : memref<4x10x16x16xf32, #tpu.memory_space<vmem>>, vector<1x1x16x16xf32>
    %218 = vector.shape_cast %217 : vector<1x1x16x16xf32> to vector<16x16xf32>
    %cst_215 = arith.constant dense<0.000000e+00> : vector<16x256xf32>
    %219 = tpu.matmul %218, %216, %cst_215 {dimension_numbers = #tpu.dot_dimension_numbers<[1], [0], [0], [1], [0, 0, 1, 1], [], []>} : vector<16x16xf32>, vector<16x256xf32>, vector<16x256xf32> -> vector<16x256xf32>
    %220 = arith.addf %215, %219 : vector<16x256xf32>
    %c0_216 = arith.constant 0 : index
    %c2_217 = arith.constant 2 : index
    %221 = vector.load %arg8[%c0_216, %c2_217] : memref<16x290xf32, #tpu.memory_space<vmem>>, vector<16x256xf32>
    %c1_218 = arith.constant 1 : index
    %c0_219 = arith.constant 0 : index
    %222 = vector.load %arg2[%c1_218, %c0_219] : memref<2x256xf32, #tpu.memory_space<vmem>>, vector<1x256xf32>
    %223 = vector.broadcast %222 : vector<1x256xf32> to vector<16x256xf32>
    %224 = arith.mulf %221, %223 : vector<16x256xf32>
    %c2_220 = arith.constant 2 : index
    %c2_221 = arith.constant 2 : index
    %c0_222 = arith.constant 0 : index
    %c0_223 = arith.constant 0 : index
    %225 = vector.load %arg3[%c2_220, %c2_221, %c0_222, %c0_223] : memref<4x10x16x16xf32, #tpu.memory_space<vmem>>, vector<1x1x16x16xf32>
    %226 = vector.shape_cast %225 : vector<1x1x16x16xf32> to vector<16x16xf32>
    %cst_224 = arith.constant dense<0.000000e+00> : vector<16x256xf32>
    %227 = tpu.matmul %226, %224, %cst_224 {dimension_numbers = #tpu.dot_dimension_numbers<[1], [0], [0], [1], [0, 0, 1, 1], [], []>} : vector<16x16xf32>, vector<16x256xf32>, vector<16x256xf32> -> vector<16x256xf32>
    %228 = arith.addf %220, %227 : vector<16x256xf32>
    %c0_225 = arith.constant 0 : index
    %c16_226 = arith.constant 16 : index
    %229 = vector.load %arg8[%c0_225, %c16_226] : memref<16x290xf32, #tpu.memory_space<vmem>>, vector<16x256xf32>
    %c0_227 = arith.constant 0 : index
    %c0_228 = arith.constant 0 : index
    %230 = vector.load %arg2[%c0_227, %c0_228] : memref<2x256xf32, #tpu.memory_space<vmem>>, vector<1x256xf32>
    %231 = vector.broadcast %230 : vector<1x256xf32> to vector<16x256xf32>
    %232 = arith.mulf %229, %231 : vector<16x256xf32>
    %c2_229 = arith.constant 2 : index
    %c3_230 = arith.constant 3 : index
    %c0_231 = arith.constant 0 : index
    %c0_232 = arith.constant 0 : index
    %233 = vector.load %arg3[%c2_229, %c3_230, %c0_231, %c0_232] : memref<4x10x16x16xf32, #tpu.memory_space<vmem>>, vector<1x1x16x16xf32>
    %234 = vector.shape_cast %233 : vector<1x1x16x16xf32> to vector<16x16xf32>
    %cst_233 = arith.constant dense<0.000000e+00> : vector<16x256xf32>
    %235 = tpu.matmul %234, %232, %cst_233 {dimension_numbers = #tpu.dot_dimension_numbers<[1], [0], [0], [1], [0, 0, 1, 1], [], []>} : vector<16x16xf32>, vector<16x256xf32>, vector<16x256xf32> -> vector<16x256xf32>
    %236 = arith.addf %228, %235 : vector<16x256xf32>
    %c0_234 = arith.constant 0 : index
    %c17_235 = arith.constant 17 : index
    %237 = vector.load %arg8[%c0_234, %c17_235] : memref<16x290xf32, #tpu.memory_space<vmem>>, vector<16x256xf32>
    %c2_236 = arith.constant 2 : index
    %c4_237 = arith.constant 4 : index
    %c0_238 = arith.constant 0 : index
    %c0_239 = arith.constant 0 : index
    %238 = vector.load %arg3[%c2_236, %c4_237, %c0_238, %c0_239] : memref<4x10x16x16xf32, #tpu.memory_space<vmem>>, vector<1x1x16x16xf32>
    %239 = vector.shape_cast %238 : vector<1x1x16x16xf32> to vector<16x16xf32>
    %cst_240 = arith.constant dense<0.000000e+00> : vector<16x256xf32>
    %240 = tpu.matmul %239, %237, %cst_240 {dimension_numbers = #tpu.dot_dimension_numbers<[1], [0], [0], [1], [0, 0, 1, 1], [], []>} : vector<16x16xf32>, vector<16x256xf32>, vector<16x256xf32> -> vector<16x256xf32>
    %241 = arith.addf %236, %240 : vector<16x256xf32>
    %c0_241 = arith.constant 0 : index
    %c18_242 = arith.constant 18 : index
    %242 = vector.load %arg8[%c0_241, %c18_242] : memref<16x290xf32, #tpu.memory_space<vmem>>, vector<16x256xf32>
    %c1_243 = arith.constant 1 : index
    %c0_244 = arith.constant 0 : index
    %243 = vector.load %arg2[%c1_243, %c0_244] : memref<2x256xf32, #tpu.memory_space<vmem>>, vector<1x256xf32>
    %244 = vector.broadcast %243 : vector<1x256xf32> to vector<16x256xf32>
    %245 = arith.mulf %242, %244 : vector<16x256xf32>
    %c2_245 = arith.constant 2 : index
    %c5_246 = arith.constant 5 : index
    %c0_247 = arith.constant 0 : index
    %c0_248 = arith.constant 0 : index
    %246 = vector.load %arg3[%c2_245, %c5_246, %c0_247, %c0_248] : memref<4x10x16x16xf32, #tpu.memory_space<vmem>>, vector<1x1x16x16xf32>
    %247 = vector.shape_cast %246 : vector<1x1x16x16xf32> to vector<16x16xf32>
    %cst_249 = arith.constant dense<0.000000e+00> : vector<16x256xf32>
    %248 = tpu.matmul %247, %245, %cst_249 {dimension_numbers = #tpu.dot_dimension_numbers<[1], [0], [0], [1], [0, 0, 1, 1], [], []>} : vector<16x16xf32>, vector<16x256xf32>, vector<16x256xf32> -> vector<16x256xf32>
    %249 = arith.addf %241, %248 : vector<16x256xf32>
    %c0_250 = arith.constant 0 : index
    %c32_251 = arith.constant 32 : index
    %250 = vector.load %arg8[%c0_250, %c32_251] : memref<16x290xf32, #tpu.memory_space<vmem>>, vector<16x256xf32>
    %c0_252 = arith.constant 0 : index
    %c0_253 = arith.constant 0 : index
    %251 = vector.load %arg2[%c0_252, %c0_253] : memref<2x256xf32, #tpu.memory_space<vmem>>, vector<1x256xf32>
    %252 = vector.broadcast %251 : vector<1x256xf32> to vector<16x256xf32>
    %253 = arith.mulf %250, %252 : vector<16x256xf32>
    %c2_254 = arith.constant 2 : index
    %c6_255 = arith.constant 6 : index
    %c0_256 = arith.constant 0 : index
    %c0_257 = arith.constant 0 : index
    %254 = vector.load %arg3[%c2_254, %c6_255, %c0_256, %c0_257] : memref<4x10x16x16xf32, #tpu.memory_space<vmem>>, vector<1x1x16x16xf32>
    %255 = vector.shape_cast %254 : vector<1x1x16x16xf32> to vector<16x16xf32>
    %cst_258 = arith.constant dense<0.000000e+00> : vector<16x256xf32>
    %256 = tpu.matmul %255, %253, %cst_258 {dimension_numbers = #tpu.dot_dimension_numbers<[1], [0], [0], [1], [0, 0, 1, 1], [], []>} : vector<16x16xf32>, vector<16x256xf32>, vector<16x256xf32> -> vector<16x256xf32>
    %257 = arith.addf %249, %256 : vector<16x256xf32>
    %c0_259 = arith.constant 0 : index
    %c33_260 = arith.constant 33 : index
    %258 = vector.load %arg8[%c0_259, %c33_260] : memref<16x290xf32, #tpu.memory_space<vmem>>, vector<16x256xf32>
    %c2_261 = arith.constant 2 : index
    %c7_262 = arith.constant 7 : index
    %c0_263 = arith.constant 0 : index
    %c0_264 = arith.constant 0 : index
    %259 = vector.load %arg3[%c2_261, %c7_262, %c0_263, %c0_264] : memref<4x10x16x16xf32, #tpu.memory_space<vmem>>, vector<1x1x16x16xf32>
    %260 = vector.shape_cast %259 : vector<1x1x16x16xf32> to vector<16x16xf32>
    %cst_265 = arith.constant dense<0.000000e+00> : vector<16x256xf32>
    %261 = tpu.matmul %260, %258, %cst_265 {dimension_numbers = #tpu.dot_dimension_numbers<[1], [0], [0], [1], [0, 0, 1, 1], [], []>} : vector<16x16xf32>, vector<16x256xf32>, vector<16x256xf32> -> vector<16x256xf32>
    %262 = arith.addf %257, %261 : vector<16x256xf32>
    %c0_266 = arith.constant 0 : index
    %c34_267 = arith.constant 34 : index
    %263 = vector.load %arg8[%c0_266, %c34_267] : memref<16x290xf32, #tpu.memory_space<vmem>>, vector<16x256xf32>
    %c1_268 = arith.constant 1 : index
    %c0_269 = arith.constant 0 : index
    %264 = vector.load %arg2[%c1_268, %c0_269] : memref<2x256xf32, #tpu.memory_space<vmem>>, vector<1x256xf32>
    %265 = vector.broadcast %264 : vector<1x256xf32> to vector<16x256xf32>
    %266 = arith.mulf %263, %265 : vector<16x256xf32>
    %c2_270 = arith.constant 2 : index
    %c8_271 = arith.constant 8 : index
    %c0_272 = arith.constant 0 : index
    %c0_273 = arith.constant 0 : index
    %267 = vector.load %arg3[%c2_270, %c8_271, %c0_272, %c0_273] : memref<4x10x16x16xf32, #tpu.memory_space<vmem>>, vector<1x1x16x16xf32>
    %268 = vector.shape_cast %267 : vector<1x1x16x16xf32> to vector<16x16xf32>
    %cst_274 = arith.constant dense<0.000000e+00> : vector<16x256xf32>
    %269 = tpu.matmul %268, %266, %cst_274 {dimension_numbers = #tpu.dot_dimension_numbers<[1], [0], [0], [1], [0, 0, 1, 1], [], []>} : vector<16x16xf32>, vector<16x256xf32>, vector<16x256xf32> -> vector<16x256xf32>
    %270 = arith.addf %262, %269 : vector<16x256xf32>
    %cst_275 = arith.constant 5.000000e-01 : f32
    %271 = vector.broadcast %cst_275 : f32 to vector<16x256xf32>
    %272 = arith.mulf %271, %270 : vector<16x256xf32>
    %273 = math.tanh %272 : vector<16x256xf32>
    %cst_276 = arith.constant 1.000000e+00 : f32
    %274 = vector.broadcast %cst_276 : f32 to vector<16x256xf32>
    %275 = arith.addf %274, %273 : vector<16x256xf32>
    %cst_277 = arith.constant 5.000000e-01 : f32
    %276 = vector.broadcast %cst_277 : f32 to vector<16x256xf32>
    %277 = arith.mulf %276, %275 : vector<16x256xf32>
    %278 = arith.mulf %270, %277 : vector<16x256xf32>
    %279 = arith.addf %278, %95 : vector<16x256xf32>
    %c3_278 = arith.constant 3 : index
    %c9_279 = arith.constant 9 : index
    %c0_280 = arith.constant 0 : index
    %c0_281 = arith.constant 0 : index
    %280 = vector.load %arg3[%c3_278, %c9_279, %c0_280, %c0_281] : memref<4x10x16x16xf32, #tpu.memory_space<vmem>>, vector<1x1x16x16xf32>
    %281 = vector.shape_cast %280 : vector<1x1x16x16xf32> to vector<16x16xf32>
    %cst_282 = arith.constant dense<0.000000e+00> : vector<16x256xf32>
    %282 = tpu.matmul %281, %279, %cst_282 {dimension_numbers = #tpu.dot_dimension_numbers<[1], [0], [0], [1], [0, 0, 1, 1], [], []>} : vector<16x16xf32>, vector<16x256xf32>, vector<16x256xf32> -> vector<16x256xf32>
    %c3_283 = arith.constant 3 : index
    %c1_284 = arith.constant 1 : index
    %c0_285 = arith.constant 0 : index
    %c0_286 = arith.constant 0 : index
    %283 = vector.load %arg4[%c3_283, %c1_284, %c0_285, %c0_286] : memref<4x2x16x1xf32, #tpu.memory_space<vmem>>, vector<1x1x16x1xf32>
    %284 = vector.shape_cast %283 : vector<1x1x16x1xf32> to vector<16x1xf32>
    %285 = vector.broadcast %284 : vector<16x1xf32> to vector<16x256xf32>
    %286 = arith.addf %282, %285 : vector<16x256xf32>
    %cst_287 = arith.constant 5.000000e-01 : f32
    %287 = vector.broadcast %cst_287 : f32 to vector<16x256xf32>
    %288 = arith.mulf %287, %286 : vector<16x256xf32>
    %289 = math.tanh %288 : vector<16x256xf32>
    %cst_288 = arith.constant 1.000000e+00 : f32
    %290 = vector.broadcast %cst_288 : f32 to vector<16x256xf32>
    %291 = arith.addf %290, %289 : vector<16x256xf32>
    %cst_289 = arith.constant 5.000000e-01 : f32
    %292 = vector.broadcast %cst_289 : f32 to vector<16x256xf32>
    %293 = arith.mulf %292, %291 : vector<16x256xf32>
    %294 = arith.mulf %286, %293 : vector<16x256xf32>
    %c0_290 = arith.constant 0 : index
    %c17_291 = arith.constant 17 : index
    %295 = vector.load %arg8[%c0_290, %c17_291] : memref<16x290xf32, #tpu.memory_space<vmem>>, vector<16x256xf32>
    tpu.vector_store %arg8[%c0_290, %c17_291], %294 {strides = array<i32>} : memref<16x290xf32, #tpu.memory_space<vmem>>, vector<16x256xf32>,
    %c3_292 = arith.constant 3 : index
    %c0_293 = arith.constant 0 : index
    %c0_294 = arith.constant 0 : index
    %c0_295 = arith.constant 0 : index
    %296 = vector.load %arg4[%c3_292, %c0_293, %c0_294, %c0_295] : memref<4x2x16x1xf32, #tpu.memory_space<vmem>>, vector<1x1x16x1xf32>
    %297 = vector.shape_cast %296 : vector<1x1x16x1xf32> to vector<16x1xf32>
    %298 = vector.shape_cast %297 : vector<16x1xf32> to vector<16x1xf32>
    %299 = vector.broadcast %298 : vector<16x1xf32> to vector<16x256xf32>
    %c0_296 = arith.constant 0 : index
    %c0_297 = arith.constant 0 : index
    %300 = vector.load %arg8[%c0_296, %c0_297] : memref<16x290xf32, #tpu.memory_space<vmem>>, vector<16x256xf32>
    %c0_298 = arith.constant 0 : index
    %c0_299 = arith.constant 0 : index
    %301 = vector.load %arg2[%c0_298, %c0_299] : memref<2x256xf32, #tpu.memory_space<vmem>>, vector<1x256xf32>
    %302 = vector.broadcast %301 : vector<1x256xf32> to vector<16x256xf32>
    %303 = arith.mulf %300, %302 : vector<16x256xf32>
    %c3_300 = arith.constant 3 : index
    %c0_301 = arith.constant 0 : index
    %c0_302 = arith.constant 0 : index
    %c0_303 = arith.constant 0 : index
    %304 = vector.load %arg3[%c3_300, %c0_301, %c0_302, %c0_303] : memref<4x10x16x16xf32, #tpu.memory_space<vmem>>, vector<1x1x16x16xf32>
    %305 = vector.shape_cast %304 : vector<1x1x16x16xf32> to vector<16x16xf32>
    %cst_304 = arith.constant dense<0.000000e+00> : vector<16x256xf32>
    %306 = tpu.matmul %305, %303, %cst_304 {dimension_numbers = #tpu.dot_dimension_numbers<[1], [0], [0], [1], [0, 0, 1, 1], [], []>} : vector<16x16xf32>, vector<16x256xf32>, vector<16x256xf32> -> vector<16x256xf32>
    %307 = arith.addf %299, %306 : vector<16x256xf32>
    %c0_305 = arith.constant 0 : index
    %c1_306 = arith.constant 1 : index
    %308 = vector.load %arg8[%c0_305, %c1_306] : memref<16x290xf32, #tpu.memory_space<vmem>>, vector<16x256xf32>
    %c3_307 = arith.constant 3 : index
    %c1_308 = arith.constant 1 : index
    %c0_309 = arith.constant 0 : index
    %c0_310 = arith.constant 0 : index
    %309 = vector.load %arg3[%c3_307, %c1_308, %c0_309, %c0_310] : memref<4x10x16x16xf32, #tpu.memory_space<vmem>>, vector<1x1x16x16xf32>
    %310 = vector.shape_cast %309 : vector<1x1x16x16xf32> to vector<16x16xf32>
    %cst_311 = arith.constant dense<0.000000e+00> : vector<16x256xf32>
    %311 = tpu.matmul %310, %308, %cst_311 {dimension_numbers = #tpu.dot_dimension_numbers<[1], [0], [0], [1], [0, 0, 1, 1], [], []>} : vector<16x16xf32>, vector<16x256xf32>, vector<16x256xf32> -> vector<16x256xf32>
    %312 = arith.addf %307, %311 : vector<16x256xf32>
    %c0_312 = arith.constant 0 : index
    %c2_313 = arith.constant 2 : index
    %313 = vector.load %arg8[%c0_312, %c2_313] : memref<16x290xf32, #tpu.memory_space<vmem>>, vector<16x256xf32>
    %c1_314 = arith.constant 1 : index
    %c0_315 = arith.constant 0 : index
    %314 = vector.load %arg2[%c1_314, %c0_315] : memref<2x256xf32, #tpu.memory_space<vmem>>, vector<1x256xf32>
    %315 = vector.broadcast %314 : vector<1x256xf32> to vector<16x256xf32>
    %316 = arith.mulf %313, %315 : vector<16x256xf32>
    %c3_316 = arith.constant 3 : index
    %c2_317 = arith.constant 2 : index
    %c0_318 = arith.constant 0 : index
    %c0_319 = arith.constant 0 : index
    %317 = vector.load %arg3[%c3_316, %c2_317, %c0_318, %c0_319] : memref<4x10x16x16xf32, #tpu.memory_space<vmem>>, vector<1x1x16x16xf32>
    %318 = vector.shape_cast %317 : vector<1x1x16x16xf32> to vector<16x16xf32>
    %cst_320 = arith.constant dense<0.000000e+00> : vector<16x256xf32>
    %319 = tpu.matmul %318, %316, %cst_320 {dimension_numbers = #tpu.dot_dimension_numbers<[1], [0], [0], [1], [0, 0, 1, 1], [], []>} : vector<16x16xf32>, vector<16x256xf32>, vector<16x256xf32> -> vector<16x256xf32>
    %320 = arith.addf %312, %319 : vector<16x256xf32>
    %c0_321 = arith.constant 0 : index
    %c16_322 = arith.constant 16 : index
    %321 = vector.load %arg8[%c0_321, %c16_322] : memref<16x290xf32, #tpu.memory_space<vmem>>, vector<16x256xf32>
    %c0_323 = arith.constant 0 : index
    %c0_324 = arith.constant 0 : index
    %322 = vector.load %arg2[%c0_323, %c0_324] : memref<2x256xf32, #tpu.memory_space<vmem>>, vector<1x256xf32>
    %323 = vector.broadcast %322 : vector<1x256xf32> to vector<16x256xf32>
    %324 = arith.mulf %321, %323 : vector<16x256xf32>
    %c3_325 = arith.constant 3 : index
    %c3_326 = arith.constant 3 : index
    %c0_327 = arith.constant 0 : index
    %c0_328 = arith.constant 0 : index
    %325 = vector.load %arg3[%c3_325, %c3_326, %c0_327, %c0_328] : memref<4x10x16x16xf32, #tpu.memory_space<vmem>>, vector<1x1x16x16xf32>
    %326 = vector.shape_cast %325 : vector<1x1x16x16xf32> to vector<16x16xf32>
    %cst_329 = arith.constant dense<0.000000e+00> : vector<16x256xf32>
    %327 = tpu.matmul %326, %324, %cst_329 {dimension_numbers = #tpu.dot_dimension_numbers<[1], [0], [0], [1], [0, 0, 1, 1], [], []>} : vector<16x16xf32>, vector<16x256xf32>, vector<16x256xf32> -> vector<16x256xf32>
    %328 = arith.addf %320, %327 : vector<16x256xf32>
    %c0_330 = arith.constant 0 : index
    %c17_331 = arith.constant 17 : index
    %329 = vector.load %arg8[%c0_330, %c17_331] : memref<16x290xf32, #tpu.memory_space<vmem>>, vector<16x256xf32>
    %c3_332 = arith.constant 3 : index
    %c4_333 = arith.constant 4 : index
    %c0_334 = arith.constant 0 : index
    %c0_335 = arith.constant 0 : index
    %330 = vector.load %arg3[%c3_332, %c4_333, %c0_334, %c0_335] : memref<4x10x16x16xf32, #tpu.memory_space<vmem>>, vector<1x1x16x16xf32>
    %331 = vector.shape_cast %330 : vector<1x1x16x16xf32> to vector<16x16xf32>
    %cst_336 = arith.constant dense<0.000000e+00> : vector<16x256xf32>
    %332 = tpu.matmul %331, %329, %cst_336 {dimension_numbers = #tpu.dot_dimension_numbers<[1], [0], [0], [1], [0, 0, 1, 1], [], []>} : vector<16x16xf32>, vector<16x256xf32>, vector<16x256xf32> -> vector<16x256xf32>
    %333 = arith.addf %328, %332 : vector<16x256xf32>
    %c0_337 = arith.constant 0 : index
    %c18_338 = arith.constant 18 : index
    %334 = vector.load %arg8[%c0_337, %c18_338] : memref<16x290xf32, #tpu.memory_space<vmem>>, vector<16x256xf32>
    %c1_339 = arith.constant 1 : index
    %c0_340 = arith.constant 0 : index
    %335 = vector.load %arg2[%c1_339, %c0_340] : memref<2x256xf32, #tpu.memory_space<vmem>>, vector<1x256xf32>
    %336 = vector.broadcast %335 : vector<1x256xf32> to vector<16x256xf32>
    %337 = arith.mulf %334, %336 : vector<16x256xf32>
    %c3_341 = arith.constant 3 : index
    %c5_342 = arith.constant 5 : index
    %c0_343 = arith.constant 0 : index
    %c0_344 = arith.constant 0 : index
    %338 = vector.load %arg3[%c3_341, %c5_342, %c0_343, %c0_344] : memref<4x10x16x16xf32, #tpu.memory_space<vmem>>, vector<1x1x16x16xf32>
    %339 = vector.shape_cast %338 : vector<1x1x16x16xf32> to vector<16x16xf32>
    %cst_345 = arith.constant dense<0.000000e+00> : vector<16x256xf32>
    %340 = tpu.matmul %339, %337, %cst_345 {dimension_numbers = #tpu.dot_dimension_numbers<[1], [0], [0], [1], [0, 0, 1, 1], [], []>} : vector<16x16xf32>, vector<16x256xf32>, vector<16x256xf32> -> vector<16x256xf32>
    %341 = arith.addf %333, %340 : vector<16x256xf32>
    %c0_346 = arith.constant 0 : index
    %c32_347 = arith.constant 32 : index
    %342 = vector.load %arg8[%c0_346, %c32_347] : memref<16x290xf32, #tpu.memory_space<vmem>>, vector<16x256xf32>
    %c0_348 = arith.constant 0 : index
    %c0_349 = arith.constant 0 : index
    %343 = vector.load %arg2[%c0_348, %c0_349] : memref<2x256xf32, #tpu.memory_space<vmem>>, vector<1x256xf32>
    %344 = vector.broadcast %343 : vector<1x256xf32> to vector<16x256xf32>
    %345 = arith.mulf %342, %344 : vector<16x256xf32>
    %c3_350 = arith.constant 3 : index
    %c6_351 = arith.constant 6 : index
    %c0_352 = arith.constant 0 : index
    %c0_353 = arith.constant 0 : index
    %346 = vector.load %arg3[%c3_350, %c6_351, %c0_352, %c0_353] : memref<4x10x16x16xf32, #tpu.memory_space<vmem>>, vector<1x1x16x16xf32>
    %347 = vector.shape_cast %346 : vector<1x1x16x16xf32> to vector<16x16xf32>
    %cst_354 = arith.constant dense<0.000000e+00> : vector<16x256xf32>
    %348 = tpu.matmul %347, %345, %cst_354 {dimension_numbers = #tpu.dot_dimension_numbers<[1], [0], [0], [1], [0, 0, 1, 1], [], []>} : vector<16x16xf32>, vector<16x256xf32>, vector<16x256xf32> -> vector<16x256xf32>
    %349 = arith.addf %341, %348 : vector<16x256xf32>
    %c0_355 = arith.constant 0 : index
    %c33_356 = arith.constant 33 : index
    %350 = vector.load %arg8[%c0_355, %c33_356] : memref<16x290xf32, #tpu.memory_space<vmem>>, vector<16x256xf32>
    %c3_357 = arith.constant 3 : index
    %c7_358 = arith.constant 7 : index
    %c0_359 = arith.constant 0 : index
    %c0_360 = arith.constant 0 : index
    %351 = vector.load %arg3[%c3_357, %c7_358, %c0_359, %c0_360] : memref<4x10x16x16xf32, #tpu.memory_space<vmem>>, vector<1x1x16x16xf32>
    %352 = vector.shape_cast %351 : vector<1x1x16x16xf32> to vector<16x16xf32>
    %cst_361 = arith.constant dense<0.000000e+00> : vector<16x256xf32>
    %353 = tpu.matmul %352, %350, %cst_361 {dimension_numbers = #tpu.dot_dimension_numbers<[1], [0], [0], [1], [0, 0, 1, 1], [], []>} : vector<16x16xf32>, vector<16x256xf32>, vector<16x256xf32> -> vector<16x256xf32>
    %354 = arith.addf %349, %353 : vector<16x256xf32>
    %c0_362 = arith.constant 0 : index
    %c34_363 = arith.constant 34 : index
    %355 = vector.load %arg8[%c0_362, %c34_363] : memref<16x290xf32, #tpu.memory_space<vmem>>, vector<16x256xf32>
    %c1_364 = arith.constant 1 : index
    %c0_365 = arith.constant 0 : index
    %356 = vector.load %arg2[%c1_364, %c0_365] : memref<2x256xf32, #tpu.memory_space<vmem>>, vector<1x256xf32>
    %357 = vector.broadcast %356 : vector<1x256xf32> to vector<16x256xf32>
    %358 = arith.mulf %355, %357 : vector<16x256xf32>
    %c3_366 = arith.constant 3 : index
    %c8_367 = arith.constant 8 : index
    %c0_368 = arith.constant 0 : index
    %c0_369 = arith.constant 0 : index
    %359 = vector.load %arg3[%c3_366, %c8_367, %c0_368, %c0_369] : memref<4x10x16x16xf32, #tpu.memory_space<vmem>>, vector<1x1x16x16xf32>
    %360 = vector.shape_cast %359 : vector<1x1x16x16xf32> to vector<16x16xf32>
    %cst_370 = arith.constant dense<0.000000e+00> : vector<16x256xf32>
    %361 = tpu.matmul %360, %358, %cst_370 {dimension_numbers = #tpu.dot_dimension_numbers<[1], [0], [0], [1], [0, 0, 1, 1], [], []>} : vector<16x16xf32>, vector<16x256xf32>, vector<16x256xf32> -> vector<16x256xf32>
    %362 = arith.addf %354, %361 : vector<16x256xf32>
    %cst_371 = arith.constant 5.000000e-01 : f32
    %363 = vector.broadcast %cst_371 : f32 to vector<16x256xf32>
    %364 = arith.mulf %363, %362 : vector<16x256xf32>
    %365 = math.tanh %364 : vector<16x256xf32>
    %cst_372 = arith.constant 1.000000e+00 : f32
    %366 = vector.broadcast %cst_372 : f32 to vector<16x256xf32>
    %367 = arith.addf %366, %365 : vector<16x256xf32>
    %cst_373 = arith.constant 5.000000e-01 : f32
    %368 = vector.broadcast %cst_373 : f32 to vector<16x256xf32>
    %369 = arith.mulf %368, %367 : vector<16x256xf32>
    %370 = arith.mulf %362, %369 : vector<16x256xf32>
    %c0_374 = arith.constant 0 : index
    %c0_375 = arith.constant 0 : index
    %371 = vector.load %arg6[%c0_374, %c0_375] : memref<32x1xf32, #tpu.memory_space<vmem>>, vector<32x1xf32>
    %372 = vector.shape_cast %371 : vector<32x1xf32> to vector<32x1xf32>
    %373 = vector.broadcast %372 : vector<32x1xf32> to vector<32x16xf32>
    %c0_376 = arith.constant 0 : index
    %c0_377 = arith.constant 0 : index
    %374 = vector.load %arg5[%c0_376, %c0_377] : memref<32x16xf32, #tpu.memory_space<vmem>>, vector<32x1xf32>
    %375 = vector.extract_strided_slice %370 {offsets = [0, 0], sizes = [1, 16], strides = [1, 1]} : vector<16x256xf32> to vector<1x16xf32>
    %376 = vector.broadcast %374 : vector<32x1xf32> to vector<32x16xf32>
    %377 = vector.broadcast %375 : vector<1x16xf32> to vector<32x16xf32>
    %378 = arith.mulf %376, %377 : vector<32x16xf32>
    %379 = arith.addf %373, %378 : vector<32x16xf32>
    %c0_378 = arith.constant 0 : index
    %c1_379 = arith.constant 1 : index
    %380 = vector.load %arg5[%c0_378, %c1_379] : memref<32x16xf32, #tpu.memory_space<vmem>>, vector<32x1xf32>
    %381 = vector.extract_strided_slice %370 {offsets = [0, 16], sizes = [1, 16], strides = [1, 1]} : vector<16x256xf32> to vector<1x16xf32>
    %382 = vector.broadcast %380 : vector<32x1xf32> to vector<32x16xf32>
    %383 = vector.broadcast %381 : vector<1x16xf32> to vector<32x16xf32>
    %384 = arith.mulf %382, %383 : vector<32x16xf32>
    %385 = arith.addf %379, %384 : vector<32x16xf32>
    %c0_380 = arith.constant 0 : index
    %c2_381 = arith.constant 2 : index
    %386 = vector.load %arg5[%c0_380, %c2_381] : memref<32x16xf32, #tpu.memory_space<vmem>>, vector<32x1xf32>
    %387 = vector.extract_strided_slice %370 {offsets = [0, 32], sizes = [1, 16], strides = [1, 1]} : vector<16x256xf32> to vector<1x16xf32>
    %388 = vector.broadcast %386 : vector<32x1xf32> to vector<32x16xf32>
    %389 = vector.broadcast %387 : vector<1x16xf32> to vector<32x16xf32>
    %390 = arith.mulf %388, %389 : vector<32x16xf32>
    %391 = arith.addf %385, %390 : vector<32x16xf32>
    %c0_382 = arith.constant 0 : index
    %c3_383 = arith.constant 3 : index
    %392 = vector.load %arg5[%c0_382, %c3_383] : memref<32x16xf32, #tpu.memory_space<vmem>>, vector<32x1xf32>
    %393 = vector.extract_strided_slice %370 {offsets = [0, 48], sizes = [1, 16], strides = [1, 1]} : vector<16x256xf32> to vector<1x16xf32>
    %394 = vector.broadcast %392 : vector<32x1xf32> to vector<32x16xf32>
    %395 = vector.broadcast %393 : vector<1x16xf32> to vector<32x16xf32>
    %396 = arith.mulf %394, %395 : vector<32x16xf32>
    %397 = arith.addf %391, %396 : vector<32x16xf32>
    %c0_384 = arith.constant 0 : index
    %c4_385 = arith.constant 4 : index
    %398 = vector.load %arg5[%c0_384, %c4_385] : memref<32x16xf32, #tpu.memory_space<vmem>>, vector<32x1xf32>
    %399 = vector.extract_strided_slice %370 {offsets = [0, 64], sizes = [1, 16], strides = [1, 1]} : vector<16x256xf32> to vector<1x16xf32>
    %400 = vector.broadcast %398 : vector<32x1xf32> to vector<32x16xf32>
    %401 = vector.broadcast %399 : vector<1x16xf32> to vector<32x16xf32>
    %402 = arith.mulf %400, %401 : vector<32x16xf32>
    %403 = arith.addf %397, %402 : vector<32x16xf32>
    %c0_386 = arith.constant 0 : index
    %c5_387 = arith.constant 5 : index
    %404 = vector.load %arg5[%c0_386, %c5_387] : memref<32x16xf32, #tpu.memory_space<vmem>>, vector<32x1xf32>
    %405 = vector.extract_strided_slice %370 {offsets = [0, 80], sizes = [1, 16], strides = [1, 1]} : vector<16x256xf32> to vector<1x16xf32>
    %406 = vector.broadcast %404 : vector<32x1xf32> to vector<32x16xf32>
    %407 = vector.broadcast %405 : vector<1x16xf32> to vector<32x16xf32>
    %408 = arith.mulf %406, %407 : vector<32x16xf32>
    %409 = arith.addf %403, %408 : vector<32x16xf32>
    %c0_388 = arith.constant 0 : index
    %c6_389 = arith.constant 6 : index
    %410 = vector.load %arg5[%c0_388, %c6_389] : memref<32x16xf32, #tpu.memory_space<vmem>>, vector<32x1xf32>
    %411 = vector.extract_strided_slice %370 {offsets = [0, 96], sizes = [1, 16], strides = [1, 1]} : vector<16x256xf32> to vector<1x16xf32>
    %412 = vector.broadcast %410 : vector<32x1xf32> to vector<32x16xf32>
    %413 = vector.broadcast %411 : vector<1x16xf32> to vector<32x16xf32>
    %414 = arith.mulf %412, %413 : vector<32x16xf32>
    %415 = arith.addf %409, %414 : vector<32x16xf32>
    %c0_390 = arith.constant 0 : index
    %c7_391 = arith.constant 7 : index
    %416 = vector.load %arg5[%c0_390, %c7_391] : memref<32x16xf32, #tpu.memory_space<vmem>>, vector<32x1xf32>
    %417 = vector.extract_strided_slice %370 {offsets = [0, 112], sizes = [1, 16], strides = [1, 1]} : vector<16x256xf32> to vector<1x16xf32>
    %418 = vector.broadcast %416 : vector<32x1xf32> to vector<32x16xf32>
    %419 = vector.broadcast %417 : vector<1x16xf32> to vector<32x16xf32>
    %420 = arith.mulf %418, %419 : vector<32x16xf32>
    %421 = arith.addf %415, %420 : vector<32x16xf32>
    %c0_392 = arith.constant 0 : index
    %c8_393 = arith.constant 8 : index
    %422 = vector.load %arg5[%c0_392, %c8_393] : memref<32x16xf32, #tpu.memory_space<vmem>>, vector<32x1xf32>
    %423 = vector.extract_strided_slice %370 {offsets = [0, 128], sizes = [1, 16], strides = [1, 1]} : vector<16x256xf32> to vector<1x16xf32>
    %424 = vector.broadcast %422 : vector<32x1xf32> to vector<32x16xf32>
    %425 = vector.broadcast %423 : vector<1x16xf32> to vector<32x16xf32>
    %426 = arith.mulf %424, %425 : vector<32x16xf32>
    %427 = arith.addf %421, %426 : vector<32x16xf32>
    %c0_394 = arith.constant 0 : index
    %c9_395 = arith.constant 9 : index
    %428 = vector.load %arg5[%c0_394, %c9_395] : memref<32x16xf32, #tpu.memory_space<vmem>>, vector<32x1xf32>
    %429 = vector.extract_strided_slice %370 {offsets = [0, 144], sizes = [1, 16], strides = [1, 1]} : vector<16x256xf32> to vector<1x16xf32>
    %430 = vector.broadcast %428 : vector<32x1xf32> to vector<32x16xf32>
    %431 = vector.broadcast %429 : vector<1x16xf32> to vector<32x16xf32>
    %432 = arith.mulf %430, %431 : vector<32x16xf32>
    %433 = arith.addf %427, %432 : vector<32x16xf32>
    %c0_396 = arith.constant 0 : index
    %c10 = arith.constant 10 : index
    %434 = vector.load %arg5[%c0_396, %c10] : memref<32x16xf32, #tpu.memory_space<vmem>>, vector<32x1xf32>
    %435 = vector.extract_strided_slice %370 {offsets = [0, 160], sizes = [1, 16], strides = [1, 1]} : vector<16x256xf32> to vector<1x16xf32>
    %436 = vector.broadcast %434 : vector<32x1xf32> to vector<32x16xf32>
    %437 = vector.broadcast %435 : vector<1x16xf32> to vector<32x16xf32>
    %438 = arith.mulf %436, %437 : vector<32x16xf32>
    %439 = arith.addf %433, %438 : vector<32x16xf32>
    %c0_397 = arith.constant 0 : index
    %c11 = arith.constant 11 : index
    %440 = vector.load %arg5[%c0_397, %c11] : memref<32x16xf32, #tpu.memory_space<vmem>>, vector<32x1xf32>
    %441 = vector.extract_strided_slice %370 {offsets = [0, 176], sizes = [1, 16], strides = [1, 1]} : vector<16x256xf32> to vector<1x16xf32>
    %442 = vector.broadcast %440 : vector<32x1xf32> to vector<32x16xf32>
    %443 = vector.broadcast %441 : vector<1x16xf32> to vector<32x16xf32>
    %444 = arith.mulf %442, %443 : vector<32x16xf32>
    %445 = arith.addf %439, %444 : vector<32x16xf32>
    %c0_398 = arith.constant 0 : index
    %c12 = arith.constant 12 : index
    %446 = vector.load %arg5[%c0_398, %c12] : memref<32x16xf32, #tpu.memory_space<vmem>>, vector<32x1xf32>
    %447 = vector.extract_strided_slice %370 {offsets = [0, 192], sizes = [1, 16], strides = [1, 1]} : vector<16x256xf32> to vector<1x16xf32>
    %448 = vector.broadcast %446 : vector<32x1xf32> to vector<32x16xf32>
    %449 = vector.broadcast %447 : vector<1x16xf32> to vector<32x16xf32>
    %450 = arith.mulf %448, %449 : vector<32x16xf32>
    %451 = arith.addf %445, %450 : vector<32x16xf32>
    %c0_399 = arith.constant 0 : index
    %c13 = arith.constant 13 : index
    %452 = vector.load %arg5[%c0_399, %c13] : memref<32x16xf32, #tpu.memory_space<vmem>>, vector<32x1xf32>
    %453 = vector.extract_strided_slice %370 {offsets = [0, 208], sizes = [1, 16], strides = [1, 1]} : vector<16x256xf32> to vector<1x16xf32>
    %454 = vector.broadcast %452 : vector<32x1xf32> to vector<32x16xf32>
    %455 = vector.broadcast %453 : vector<1x16xf32> to vector<32x16xf32>
    %456 = arith.mulf %454, %455 : vector<32x16xf32>
    %457 = arith.addf %451, %456 : vector<32x16xf32>
    %c0_400 = arith.constant 0 : index
    %c14 = arith.constant 14 : index
    %458 = vector.load %arg5[%c0_400, %c14] : memref<32x16xf32, #tpu.memory_space<vmem>>, vector<32x1xf32>
    %459 = vector.extract_strided_slice %370 {offsets = [0, 224], sizes = [1, 16], strides = [1, 1]} : vector<16x256xf32> to vector<1x16xf32>
    %460 = vector.broadcast %458 : vector<32x1xf32> to vector<32x16xf32>
    %461 = vector.broadcast %459 : vector<1x16xf32> to vector<32x16xf32>
    %462 = arith.mulf %460, %461 : vector<32x16xf32>
    %463 = arith.addf %457, %462 : vector<32x16xf32>
    %c0_401 = arith.constant 0 : index
    %c15 = arith.constant 15 : index
    %464 = vector.load %arg5[%c0_401, %c15] : memref<32x16xf32, #tpu.memory_space<vmem>>, vector<32x1xf32>
    %465 = vector.extract_strided_slice %370 {offsets = [0, 240], sizes = [1, 16], strides = [1, 1]} : vector<16x256xf32> to vector<1x16xf32>
    %466 = vector.broadcast %464 : vector<32x1xf32> to vector<32x16xf32>
    %467 = vector.broadcast %465 : vector<1x16xf32> to vector<32x16xf32>
    %468 = arith.mulf %466, %467 : vector<32x16xf32>
    %469 = arith.addf %463, %468 : vector<32x16xf32>
    %c0_402 = arith.constant 0 : index
    %c0_403 = arith.constant 0 : index
    %c0_404 = arith.constant 0 : index
    %470 = vector.load %arg7[%c0_402, %c0_403, %c0_404] : memref<1x32x16xf32, #tpu.memory_space<vmem>>, vector<1x32x16xf32>
    %471 = vector.shape_cast %470 : vector<1x32x16xf32> to vector<32x16xf32>
    %472 = vector.shape_cast %469 : vector<32x16xf32> to vector<1x32x16xf32>
    tpu.vector_store %arg7[%c0_402, %c0_403, %c0_404], %472 {strides = array<i32>} : memref<1x32x16xf32, #tpu.memory_space<vmem>>, vector<1x32x16xf32>,
    return
  }
  func.func @transform_0(%arg0: i32) -> (i32, i32, i32) {
    %c0_i32 = arith.constant 0 : i32
    %c0_i32_0 = arith.constant 0 : i32
    %c0_i32_1 = arith.constant 0 : i32
    return %arg0, %c0_i32, %c0_i32_0 : i32, i32, i32
  }
  func.func @transform_1(%arg0: i32) -> (i32, i32) {
    %c0_i32 = arith.constant 0 : i32
    %c0_i32_0 = arith.constant 0 : i32
    %c0_i32_1 = arith.constant 0 : i32
    return %c0_i32, %c0_i32_0 : i32, i32
  }
  func.func @transform_2(%arg0: i32) -> (i32, i32, i32, i32) {
    %c0_i32 = arith.constant 0 : i32
    %c0_i32_0 = arith.constant 0 : i32
    %c0_i32_1 = arith.constant 0 : i32
    %c0_i32_2 = arith.constant 0 : i32
    %c0_i32_3 = arith.constant 0 : i32
    return %c0_i32, %c0_i32_0, %c0_i32_1, %c0_i32_2 : i32, i32, i32, i32
  }
  func.func @transform_3(%arg0: i32) -> (i32, i32, i32, i32) {
    %c0_i32 = arith.constant 0 : i32
    %c0_i32_0 = arith.constant 0 : i32
    %c0_i32_1 = arith.constant 0 : i32
    %c0_i32_2 = arith.constant 0 : i32
    %c0_i32_3 = arith.constant 0 : i32
    return %c0_i32, %c0_i32_0, %c0_i32_1, %c0_i32_2 : i32, i32, i32, i32
  }
  func.func @transform_4(%arg0: i32) -> (i32, i32) {
    %c0_i32 = arith.constant 0 : i32
    %c0_i32_0 = arith.constant 0 : i32
    %c0_i32_1 = arith.constant 0 : i32
    return %c0_i32, %c0_i32_0 : i32, i32
  }
  func.func @transform_5(%arg0: i32) -> (i32, i32) {
    %c0_i32 = arith.constant 0 : i32
    %c0_i32_0 = arith.constant 0 : i32
    %c0_i32_1 = arith.constant 0 : i32
    return %c0_i32, %c0_i32_0 : i32, i32
  }
  func.func @transform_6(%arg0: i32) -> (i32, i32, i32) {
    %c0_i32 = arith.constant 0 : i32
    %c0_i32_0 = arith.constant 0 : i32
    %c0_i32_1 = arith.constant 0 : i32
    return %arg0, %c0_i32, %c0_i32_0 : i32, i32, i32
  }
}

</mosaic_0001>

<bundles_post_ra>
// kernel: unet_radio_2d.1
= control target key start
LH: loop header
LB: loop body
LE: loop exit
PB: predicated region body
PF: predicated region fallthrough
CT: control target
= control target key end

     0   :  { %11 = vsyncpa [#allocation4], 0  ;;  %s7262_s21 = smov 0   ;;  %s8514_s0 = inlined_call_operand.vmem [shape: f32[2,16,256], index: 0, kind: input, shape index: {}]   ;;  %s8515_s1 = inlined_call_operand.vmem [shape: f32[2,256], index: 1, kind: input, shape index: {}]   ;;  %s8516_s2 = inlined_call_operand.hbm [shape: f32[4,10,16,16], index: 2, kind: input, shape index: {}]   ;;  %s8517_s3 = inlined_call_operand.vmem [shape: f32[4,2,16,1], index: 3, kind: input, shape index: {}]   ;;  %s8518_s4 = inlined_call_operand.vmem [shape: f32[32,16], index: 4, kind: input, shape index: {}]   ;;  %s8519_s5 = inlined_call_operand.vmem [shape: f32[32,1], index: 5, kind: input, shape index: {}]   ;;  %s8520_s6 = inlined_call_operand.vmem [shape: f32[2,32,16], index: 6, kind: output, shape index: {}]  }
   0x1 LB: > { %s7268_s22 = sadd.s32 4294967295, %s7188_s21   ;;  %p6127_p0 = scmp.ge.s32.totalorder %s7188_s21, 1  ;;  %s7188_s21 = sphi %s7262_s21, %s17_s21  }
   0x2   : > { %p179_p1 = scmp.lt.s32.totalorder %s7188_s21, 3  ;;  %s7190_s23 = smov [#allocation3]  }
   0x3   : > { %s194_s24 = sshll.u32 %s7190_s23, 4  ;;  %p8521_p3 = scmp.eq.s32.totalorder %s7268_s22, 0  ;;  %s195_s24 = int_to_ptr.vmem [resolvable:$true] %s194_s24 }
   0x4   : > { %p7272_p2 = pnand %p6127_p0, %p179_p1  ;;  %s7150_s29 = scalar_lea.hbm %s8516_s2, 10240 }
   0x5   : > { %p7151_p6 = scmp.ne.s32.totalorder %s8516_s2, %s7150_s29  ;;  %p7157_p10 = scmp.lt.u32.totalorder %s7150_s29, %s8516_s2 }
   0x6   : > { %s8528_s25 = scalar_select %p7272_p2, 1, 0 }
   0x7   : > { %p6527_p4 = pneg %p7272_p2 }
   0x9   : > { %p7281_p5 = pnand %p8521_p3, %p6527_p4 }
   0xb   : > { %p7152_p7 = pneg %p7281_p5 }
   0xd   : > { %p7153_p8 = pnand %p7152_p7, %p7151_p6 }
   0xf   : > { %p7154_p9 = pneg %p7153_p8 }
  0x11   : > { %p7159_p11 = pnand %p7157_p10, %p7154_p9 }
  0x13   : > { %7162 = shalt.err (!%p7159_p11)
}
  0x14   : > { %s7163_s10 = scalar_lea.vmem %s195_s24, 10240  ;;  %p7171_p1 = scmp.lt.s32.totalorder %s195_s24, %s195_s24 }
  0x15   : > { %p7164_p12 = scmp.ne.s32.totalorder %s195_s24, %s7163_s10  ;;  %p7172_p4 = scmp.lt.s32.totalorder %s7163_s10, %s7163_s10 }
  0x17   : > { %p7166_p13 = pnand %p7164_p12, %p7152_p7  ;;  %p7173_p3 = por %p7172_p4, %p7171_p1 }
  0x19   : > { %p7167_p0 = pneg %p7166_p13 }
  0x1b   : > { %p7174_p2 = pnand %p7173_p3, %p7167_p0 }
  0x1d   : > { %7177 = shalt.err (!%p7174_p2)
}
  0x1e   : > { %s7191_s11 = smov 128   ;;  %s7192_s12 = smov 8  }
  0x1f   : > { %6530 = dma.hbm_to_vmem [thread:$0]  (!%p7281_p5), %s8516_s2, 10240, %s195_s24, [#allocation4], %s7191_s11, %s7191_s11, %s7192_s12  }
  0x20   : > { %p8530_p6 = scmp.ne.s32.totalorder %s8528_s25, 0 }
  0x21   : > { %p8531_p8 = scmp.eq.s32.totalorder (!%p8530_p6), %s7268_s22, 0 }
  0x22   : > { %227 = sbr.rel (%p8530_p6) target bundleno = 3535 (0xdcf), region = 44 }
  0x29   : > { %7183 = dma.done.wait (%p8531_p8), [#allocation4], 10240   ;;  %p8532_p7 = pmov %p8531_p8 }
  0x2a   : > { %p257_p2 = scmp.lt.s32.totalorder %s7268_s22, 1  ;;  %v322_v0 = vlaneseq  ;;  %vm267_vm0 = vcmask 138240   ;;  %v7193_v1 = vmov 0.0   ;;  %vm270_vm1 = vcmask 277640   ;;  %s7194_s19 = smov 17  }
  0x2b   : > { %7185 = vsyncadd (%p8532_p7), [#allocation4], 4294957056  ;;  %269 = vst.msk [vmem:[#allocation2 + $0x18] sm:$0xff] %vm267_vm0, %v7193_v1  ;;  %532 = vmatprep.mubr.f32.mxu0 %v7193_v1  ;;  %409 = vmatprep.mubr.f32.mxu1 %v7193_v1  ;;  %v6140_v9 = vld [vmem:[%s8515_s1 + $0x1] ss:$2 sm:$0x3] }
  0x2c   : > { %268 = vst.msk [vmem:[#allocation2] sm:$0xff] %vm267_vm0, %v7193_v1  ;;  %s8537_s22 = smov (!%p257_p2, %s7268_s22), 1  ;;  %v323_v2 = vshrl.u32 %v322_v0, 7  ;;  %v320_v12 = vld [vmem:[%s8515_s1] ss:$2 sm:$0x3] }
  0x2d   : > { %272 = vst.msk [vmem:[#allocation2 + $0x28] sm:$0xff] %vm270_vm1, %v7193_v1  ;;  %271 = vst.msk [vmem:[#allocation2 + $0x10] sm:$0xff] %vm270_vm1, %v7193_v1  ;;  %s8523_s15 = sshll.u32 %s8537_s22, 5  ;;  %s7195_s26 = smov 2   ;;  %vm297_vm2 = vcmask 1047688   ;;  %vm564_vm3 = vcmask 15360  }
  0x2e   : > { %s261_s18 = scalar_lea.vmem %s8514_s0, %s8523_s15  ;;  %v7327_v5 = vsub.s32 0, %v323_v2  ;;  %v7329_v6 = vsub.s32 1, %v323_v2  ;;  %s7196_s27 = smov 16   ;;  %vm338_vm4 = vcmask 130048   ;;  %vm938_vm5 = vcmask 146432  }
  0x2f   : > { %v275_v3 = vld [vmem:[%s261_s18 + $0x10] sm:$0xff]  ;;  %v273_v4 = vld [vmem:[%s261_s18] sm:$0xff]  ;;  %v276_v7 = vld [vmem:[%s261_s18 + $0x18] sm:$0xff]  ;;  %s7197_s28 = smov 18   ;;  %s7198_s29 = smov 32   ;;  %vm1070_vm6 = vcmask 261120  }
  0x30   : > { %285 = vrot.lane.b32.xlu1 %v275_v3, %s7194_s19  ;;  %281 = vrot.lane.b32.xlu0 %v273_v4, %s7194_s19  ;;  %v274_v8 = vld [vmem:[%s261_s18 + $0x8] sm:$0xff]  ;;  %v559_v10 = vrot.slane %v6140_v9, %v7329_v6  ;;  %v555_v11 = vrot.slane %v6140_v9, %v7327_v5  ;;  %v329_v13 = vrot.slane %v320_v12, %v7329_v6  ;;  %s7199_s30 = smov 34   ;;  %s7200_s7 = smov 127   ;;  %vm1313_vm7 = vcmask 277504  }
  0x31   : > { %v325_v14 = vrot.slane %v320_v12, %v7327_v5  ;;  %s7201_s8 = smov 126   ;;  %s7202_s9 = smov 112   ;;  %vm453_vm8 = vcmask 1039360   ;;  %vm596_vm9 = vcmask 1031168   ;;  %vm727_vm10 = vcmask 916480  }
  0x32   : > { %s7203_s10 = smov 111   ;;  %s7204_s11 = smov 110   ;;  %vm838_vm11 = vcmask 908288   ;;  %vm970_vm12 = vcmask 900096   ;;  %vm1102_vm13 = vcmask 785408   ;;  %vm1213_vm14 = vcmask 777216  }
  0x33   : > { %s7205_s12 = smov 96   ;;  %s8526_s13 = smov 95   ;;  %vm1345_vm15 = vcmask 769024  }
  0x34   : > { %287 = vrot.lane.b32.xlu1 %v276_v7, %s7194_s19  ;;  %283 = vrot.lane.b32.xlu0 %v274_v8, %s7194_s19  ;;  %s8524_s14 = smov 94   ;;  %s8533_s15 = smov 95  }
  0x35   : > { %s8534_s16 = smov 94  }
  0x38   : > { %562 = vrot.lane.b32.xlu1 %v559_v10, %s7195_s26  ;;  %560 = vrot.lane.b32.xlu0 %v555_v11, %s7195_s26 }
  0x3c   : > { %694 = vrot.lane.b32.xlu1 %v329_v13, %s7196_s27  ;;  %692 = vrot.lane.b32.xlu0 %v325_v14, %s7196_s27 }
  0x40   : > { %936 = vrot.lane.b32.xlu1 %v559_v10, %s7197_s28  ;;  %934 = vrot.lane.b32.xlu0 %v555_v11, %s7197_s28 }
  0x44   : > { %1068 = vrot.lane.b32.xlu1 %v329_v13, %s7198_s29  ;;  %1066 = vrot.lane.b32.xlu0 %v325_v14, %s7198_s29 }
  0x48   : > { %1311 = vrot.lane.b32.xlu1 %v559_v10, %s7199_s30  ;;  %1309 = vrot.lane.b32.xlu0 %v555_v11, %s7199_s30 }
  0xa2   : > { %v286_v15 = vpop.permute.xlu1 %285  ;;  %v282_v16 = vpop.permute.xlu0 %281 }
  0xa3   : > { %301 = vst.msk [vmem:[#allocation2 + $0x18] sm:$0xff] %vm297_vm2, %v286_v15  ;;  %298 = vst.msk [vmem:[#allocation2] sm:$0xff] %vm297_vm2, %v282_v16 }
  0xa6   : > { %v288_v17 = vpop.permute.xlu1 %287  ;;  %v284_v18 = vpop.permute.xlu0 %283 }
  0xa7   : > { %v7356_v19 = vsel %vm267_vm0, %v286_v15, %v288_v17  ;;  %303 = vst.msk [vmem:[#allocation2 + $0x28] sm:$0xff] %vm267_vm0, %v288_v17  ;;  %v7360_v20 = vsel %vm267_vm0, %v282_v16, %v284_v18  ;;  %300 = vst.msk [vmem:[#allocation2 + $0x10] sm:$0xff] %vm267_vm0, %v284_v18 }
  0xa8   : > { %v333_v21 = vmul.f32 %v329_v13, %v7360_v20  ;;  %v335_v22 = vmul.f32 %v329_v13, %v7356_v19 }
  0xaa   : > { %v7365_v23 = vld [vmem:[#allocation2] sm:$0xff]  ;;  %v7367_v24 = vld [vmem:[#allocation2 + $0x18] sm:$0xff]  ;;  %v6237_v25 = vpack.c.bf16 %v335_v22, %v333_v21  ;;  %v563_v27 = vpop.permute.xlu1 %562  ;;  %v561_v28 = vpop.permute.xlu0 %560 }
  0xab   : > { %v332_v26 = vmul.f32 %v7365_v23, %v325_v14  ;;  %v334_v29 = vmul.f32 %v7367_v24, %v325_v14  ;;  %v565_v33 = vsel %vm564_vm3, %v561_v28, %v563_v27  ;;  %v569_v40 = vmul.f32 %v561_v28, %v7365_v23 }
  0xac   : > { %6238 = vmatprep.subr.bf16.mxu1 %v6237_v25  ;;  %v570_v39 = vmul.f32 %v565_v33, %v7360_v20  ;;  %v572_v41 = vmul.f32 %v561_v28, %v7367_v24  ;;  %v7396_v45 = vpack.i.bf16 %v7367_v24, %v7365_v23  ;;  %v573_v46 = vmul.f32 %v565_v33, %v7356_v19 }
  0xad   : > { %v6239_v32 = vpack.c.bf16 %v334_v29, %v332_v26 }
  0xae   : > { %v7371_v30 = vld [vmem:[#allocation2 + $0x10] sm:$0xff]  ;;  %v7373_v31 = vld [vmem:[#allocation2 + $0x28] sm:$0xff]  ;;  %v695_v37 = vpop.permute.xlu1 %694  ;;  %v693_v38 = vpop.permute.xlu0 %692  ;;  %v6603_v48 = vpack.i.bf16 %v572_v41, %v569_v40 }
  0xaf   : > { %v571_v34 = vmul.f32 %v563_v27, %v7371_v30  ;;  %v7379_v35 = vpack.i.bf16 %v7373_v31, %v7356_v19  ;;  %6240 = vmatpush1.bf16.msra.mxu1 %v6239_v32  ;;  %v7383_v36 = vpack.i.bf16 %v7371_v30, %v7360_v20  ;;  %v574_v43 = vmul.f32 %v563_v27, %v7373_v31 }
  0xb0   : > { %v696_v44 = vsel %vm338_vm4, %v693_v38, %v695_v37  ;;  %v705_v47 = vmul.f32 %v695_v37, %v7373_v31  ;;  %v702_v50 = vmul.f32 %v695_v37, %v7371_v30  ;;  %v700_v56 = vmul.f32 %v693_v38, %v7365_v23 }
  0xb1   : > { %6584 = vrot.lane.b32.xlu1 %v7379_v35, %s7200_s7  ;;  %6579 = vrot.lane.b32.xlu0 %v7383_v36, %s7200_s7  ;;  %v6593_v42 = vpack.i.bf16 %v571_v34, %v570_v39  ;;  %v704_v49 = vmul.f32 %v696_v44, %v7356_v19  ;;  %v6598_v51 = vpack.i.bf16 %v574_v43, %v573_v46  ;;  %v6155_v39 = vld [vmem:[%s8517_s3 + $0x10] sm:$0xff] }
  0xb2   : > { %v701_v52 = vmul.f32 %v696_v44, %v7360_v20  ;;  %v937_v53 = vpop.permute.xlu1 %936  ;;  %v935_v54 = vpop.permute.xlu0 %934  ;;  %v703_v57 = vmul.f32 %v693_v38, %v7367_v24 }
  0xb3   : > { %v6613_v55 = vpack.i.bf16 %v705_v47, %v704_v49  ;;  %v939_v59 = vsel %vm938_vm5, %v935_v54, %v937_v53  ;;  %v948_v63 = vmul.f32 %v937_v53, %v7373_v31  ;;  %v945_v2 = vmul.f32 %v937_v53, %v7371_v30 }
  0xb4   : > { %v6608_v58 = vpack.i.bf16 %v702_v50, %v701_v52  ;;  %v6618_v60 = vpack.i.bf16 %v703_v57, %v700_v56  ;;  %v947_v0 = vmul.f32 %v939_v59, %v7356_v19  ;;  %v944_v4 = vmul.f32 %v939_v59, %v7360_v20 }
  0xb5   : > { %6594 = vrot.lane.b32.xlu1 %v6593_v42, %s7201_s8  ;;  %6589 = vrot.lane.b32.xlu0 %v7396_v45, %s7200_s7  ;;  %v943_v10 = vmul.f32 %v935_v54, %v7365_v23  ;;  %v946_v11 = vmul.f32 %v935_v54, %v7367_v24 }
  0xb6   : > { %v1069_v61 = vpop.permute.xlu1 %1068  ;;  %v1067_v62 = vpop.permute.xlu0 %1066  ;;  %v6643_v8 = vpack.i.bf16 %v948_v63, %v947_v0  ;;  %v6638_v12 = vpack.i.bf16 %v945_v2, %v944_v4  ;;  %v433_v2 = vld [vmem:[#allocation3 + $0x10] sm:$0xff] }
  0xb7   : > { %v1071_v3 = vsel %vm1070_vm6, %v1067_v62, %v1069_v61  ;;  %v1077_v7 = vmul.f32 %v1069_v61, %v7371_v30  ;;  %v1075_v13 = vmul.f32 %v1067_v62, %v7365_v23  ;;  %v1078_v14 = vmul.f32 %v1067_v62, %v7367_v24 }
  0xb8   : > { %v1076_v9 = vmul.f32 %v1071_v3, %v7360_v20  ;;  %v1080_v16 = vmul.f32 %v1069_v61, %v7373_v31  ;;  %v6648_v17 = vpack.i.bf16 %v946_v11, %v943_v10  ;;  %v1079_v18 = vmul.f32 %v1071_v3, %v7356_v19 }
  0xb9   : > { %6604 = vrot.lane.b32.xlu1 %v6603_v48, %s7201_s8  ;;  %6599 = vrot.lane.b32.xlu0 %v6598_v51, %s7201_s8  ;;  %v6663_v25 = vpack.i.bf16 %v1078_v14, %v1075_v13 }
  0xba   : > { %v6653_v15 = vpack.i.bf16 %v1077_v7, %v1076_v9  ;;  %v1312_v21 = vpop.permute.xlu1 %1311  ;;  %v1310_v22 = vpop.permute.xlu0 %1309  ;;  %v6658_v27 = vpack.i.bf16 %v1080_v16, %v1079_v18  ;;  %v434_v16 = vld [vmem:[#allocation3 + $0x18] sm:$0xff] }
  0xbb   : > { %v1314_v26 = vsel %vm1313_vm7, %v1310_v22, %v1312_v21  ;;  %v1320_v28 = vmul.f32 %v1312_v21, %v7371_v30  ;;  %v1318_v32 = vmul.f32 %v1310_v22, %v7365_v23  ;;  %v1321_v33 = vmul.f32 %v1310_v22, %v7367_v24  ;;  %v336_v23 = vld [vmem:[#allocation3] sm:$0xff]  ;;  %v337_v24 = vld [vmem:[#allocation3 + $0x8] sm:$0xff] }
  0xbc   : > { %v1319_v29 = vmul.f32 %v1314_v26, %v7360_v20  ;;  %v1323_v37 = vmul.f32 %v1312_v21, %v7373_v31  ;;  %v1322_v38 = vmul.f32 %v1314_v26, %v7356_v19  ;;  %6136 = vmatmul.mubr.msk.f32.vlgmr.msra.gmra.mrb[0].mxu1 %vm338_vm4, %v336_v23  ;;  %v304_v19 = vld [vmem:[%s8517_s3] sm:$0xff]  ;;  %v305_v31 = vld [vmem:[%s8517_s3 + $0x8] sm:$0xff] }
  0xbd   : > { %6614 = vrot.lane.b32.xlu1 %v6613_v55, %s7202_s9  ;;  %6609 = vrot.lane.b32.xlu0 %v6608_v58, %s7202_s9  ;;  %v6693_v20 = vpack.i.bf16 %v1321_v33, %v1318_v32 }
  0xbe   : > { %v6683_v34 = vpack.i.bf16 %v1320_v28, %v1319_v29  ;;  %v6688_v30 = vpack.i.bf16 %v1323_v37, %v1322_v38  ;;  %415 = vmatprep.mubr.f32.mxu1 %v7193_v1  ;;  %v576_v28 = vld [vmem:[#allocation3 + $0x20] sm:$0xff] }
  0xc0   : > { %6137 = vmatmul.mubr.msk.f32.gmra.mrb[2].mxu1 %vm338_vm4, %v337_v24 }
  0xc1   : > { %6624 = vrot.lane.b32.xlu1 %v7383_v36, %s7203_s10  ;;  %6619 = vrot.lane.b32.xlu0 %v6618_v60, %s7202_s9 }
  0xc2   : > { %1547 = vmatprep.mubr.f32.mxu1 %v7193_v1 }
  0xc5   : > { %6634 = vrot.lane.b32.xlu1 %v7396_v45, %s7203_s10  ;;  %6629 = vrot.lane.b32.xlu0 %v7379_v35, %s7203_s10 }
  0xc9   : > { %6644 = vrot.lane.b32.xlu1 %v6643_v8, %s7204_s11  ;;  %6639 = vrot.lane.b32.xlu0 %v6638_v12, %s7204_s11 }
  0xcd   : > { %6654 = vrot.lane.b32.xlu1 %v6653_v15, %s7205_s12  ;;  %6649 = vrot.lane.b32.xlu0 %v6648_v17, %s7204_s11 }
  0xd1   : > { %6664 = vrot.lane.b32.xlu1 %v6663_v25, %s7205_s12  ;;  %6659 = vrot.lane.b32.xlu0 %v6658_v27, %s7205_s12 }
  0xd5   : > { %6674 = vrot.lane.b32.xlu1 %v7379_v35, %s8526_s13  ;;  %6669 = vrot.lane.b32.xlu0 %v7383_v36, %s8526_s13  ;;  %v7208_v35 = vmov 0   ;;  %v6156_v36 = vld [vmem:[%s8517_s3 + $0x18] sm:$0xff] }
  0xd6   : > { %6698 = vset.pattern.permute.xlu0 %v7208_v35  ;;  %6699 = vset.pattern.permute.xlu1 %v7208_v35 }
  0xd9   : > { %6684 = vrot.lane.b32.xlu1 %v6683_v34, %s8524_s14  ;;  %6679 = vrot.lane.b32.xlu0 %v7396_v45, %s8526_s13 }
  0xdd   : > { %6694 = vrot.lane.b32.xlu1 %v6693_v20, %s8524_s14  ;;  %6689 = vrot.lane.b32.xlu0 %v6688_v30, %s8524_s14 }
  0xe1   : > { %308 = vperm.xlu0 %6698, %v304_v19   ;;  %313 = vperm.xlu1 %6699, %v305_v31   ;;  %v577_v31 = vld [vmem:[#allocation3 + $0x28] sm:$0xff] }
  0xe5   : > { %1474 = vperm.xlu0 %6698, %v6156_v36   ;;  %1469 = vperm.xlu1 %6699, %v6155_v39  }
 0x123   : > { %v6585_v40 = vpop.permute.xlu1 %6584  ;;  %v6580_v43 = vpop.permute.xlu0 %6579 }
 0x124   : > { %v6587_v41 = vunpack.i.h.bf16 %v6585_v40  ;;  %v6586_v42 = vunpack.i.l.bf16 %v6585_v40  ;;  %v6582_v44 = vunpack.i.h.bf16 %v6580_v43  ;;  %v6581_v45 = vunpack.i.l.bf16 %v6580_v43 }
 0x126   : > { %v457_v46 = vsel %vm453_vm8, %v6586_v42, %v6587_v41  ;;  %v455_v48 = vsel %vm453_vm8, %v6581_v45, %v6582_v44 }
 0x127   : > { %v6595_v47 = vpop.permute.xlu1 %6594  ;;  %v6590_v49 = vpop.permute.xlu0 %6589  ;;  %v6241_v50 = vpack.c.bf16 %v457_v46, %v455_v48  ;;  %v707_v48 = vld [vmem:[#allocation3 + $0x30] sm:$0xff] }
 0x128   : > { %v6592_v51 = vunpack.i.h.bf16 %v6590_v49  ;;  %v6591_v52 = vunpack.i.l.bf16 %v6590_v49  ;;  %v6597_v53 = vunpack.i.h.bf16 %v6595_v47  ;;  %v6596_v54 = vunpack.i.l.bf16 %v6595_v47 }
 0x129   : > { %6242 = vmatprep.subr.bf16.mxu0 %v6241_v50 }
 0x12a   : > { %v454_v56 = vsel %vm453_vm8, %v6591_v52, %v6581_v45  ;;  %v456_v57 = vsel %vm453_vm8, %v6592_v51, %v6586_v42  ;;  %v598_v7 = vsel %vm596_vm9, %v6596_v54, %v6597_v53 }
 0x12b   : > { %v6605_v55 = vpop.permute.xlu1 %6604  ;;  %v6600_v58 = vpop.permute.xlu0 %6599  ;;  %v6243_v61 = vpack.c.bf16 %v456_v57, %v454_v56  ;;  %v708_v57 = vld [vmem:[#allocation3 + $0x38] sm:$0xff] }
 0x12c   : > { %v6607_v59 = vunpack.i.h.bf16 %v6605_v55  ;;  %v6606_v60 = vunpack.i.l.bf16 %v6605_v55  ;;  %v6602_v62 = vunpack.i.h.bf16 %v6600_v58  ;;  %v6601_v63 = vunpack.i.l.bf16 %v6600_v58 }
 0x12d   : > { %6244 = vmatpush1.bf16.msra.mxu0 %v6243_v61 }
 0x12e   : > { %v597_v0 = vsel %vm596_vm9, %v6606_v60, %v6596_v54  ;;  %v599_v3 = vsel %vm596_vm9, %v6607_v59, %v6601_v63  ;;  %v600_v8 = vsel %vm596_vm9, %v6601_v63, %v6602_v62 }
 0x12f   : > { %v6615_v4 = vpop.permute.xlu1 %6614  ;;  %v6610_v9 = vpop.permute.xlu0 %6609  ;;  %v6245_v12 = vpack.c.bf16 %v600_v8, %v598_v7  ;;  %v6247_v13 = vpack.c.bf16 %v599_v3, %v597_v0  ;;  %v824_v3 = vld [vmem:[#allocation3 + $0x40] sm:$0xff] }
 0x130   : > { %v6617_v10 = vunpack.i.h.bf16 %v6615_v4  ;;  %v6616_v11 = vunpack.i.l.bf16 %v6615_v4  ;;  %v6612_v14 = vunpack.i.h.bf16 %v6610_v9  ;;  %v6611_v15 = vunpack.i.l.bf16 %v6610_v9  ;;  %6138 = vmatmul.mubr.msk.f32.vlgmr.msra.gmra.mrb[0].mxu0 %vm338_vm4, %v433_v2 }
 0x131   : > { %6246 = vmatprep.subr.bf16.mxu0 %v6245_v12  ;;  %538 = vmatprep.mubr.f32.mxu0 %v7193_v1 }
 0x132   : > { %v731_v17 = vsel %vm727_vm10, %v6616_v11, %v6617_v10  ;;  %6248 = vmatpush1.bf16.msra.mxu0 %v6247_v13  ;;  %v729_v21 = vsel %vm727_vm10, %v6611_v15, %v6612_v14 }
 0x133   : > { %v6625_v18 = vpop.permute.xlu1 %6624  ;;  %v6620_v22 = vpop.permute.xlu0 %6619  ;;  %v6249_v25 = vpack.c.bf16 %v731_v17, %v729_v21 }
 0x134   : > { %v6622_v26 = vunpack.i.h.bf16 %v6620_v22  ;;  %v6621_v27 = vunpack.i.l.bf16 %v6620_v22  ;;  %6139 = vmatmul.mubr.msk.f32.gmra.mrb[2].mxu0 %vm338_vm4, %v434_v16  ;;  %v6627_v33 = vunpack.i.h.bf16 %v6625_v18  ;;  %v6626_v34 = vunpack.i.l.bf16 %v6625_v18  ;;  %v825_v18 = vld [vmem:[#allocation3 + $0x48] sm:$0xff] }
 0x135   : > { %6250 = vmatprep.subr.bf16.mxu0 %v6249_v25  ;;  %675 = vmatprep.mubr.f32.mxu0 %v7193_v1 }
 0x136   : > { %v728_v29 = vsel %vm727_vm10, %v6621_v27, %v6611_v15  ;;  %v730_v32 = vsel %vm727_vm10, %v6622_v26, %v6616_v11  ;;  %v840_v36 = vsel %vm838_vm11, %v6626_v34, %v6627_v33  ;;  %v950_v26 = vld [vmem:[#allocation3 + $0x50] sm:$0xff] }
 0x137   : > { %v6635_v37 = vpop.permute.xlu1 %6634  ;;  %v6630_v38 = vpop.permute.xlu0 %6629  ;;  %v6251_v20 = vpack.c.bf16 %v730_v32, %v728_v29 }
 0x138   : > { %v6632_v30 = vunpack.i.h.bf16 %v6630_v38  ;;  %v6631_v23 = vunpack.i.l.bf16 %v6630_v38  ;;  %v6637_v24 = vunpack.i.h.bf16 %v6635_v37  ;;  %v6636_v19 = vunpack.i.l.bf16 %v6635_v37  ;;  %6141 = vmatmul.mubr.msk.f32.vlgmr.msra.gmra.mrb[0].mxu0 %vm338_vm4, %v576_v28 }
 0x139   : > { %6252 = vmatpush1.bf16.msra.mxu0 %v6251_v20  ;;  %681 = vmatprep.mubr.f32.mxu0 %v7193_v1 }
 0x13a   : > { %v842_v39 = vsel %vm838_vm11, %v6631_v23, %v6632_v30  ;;  %v841_v44 = vsel %vm838_vm11, %v6637_v24, %v6631_v23  ;;  %v839_v45 = vsel %vm838_vm11, %v6636_v19, %v6626_v34  ;;  %v951_v23 = vld [vmem:[#allocation3 + $0x58] sm:$0xff] }
 0x13b   : > { %v6645_v35 = vpop.permute.xlu1 %6644  ;;  %v6640_v40 = vpop.permute.xlu0 %6639  ;;  %v6253_v43 = vpack.c.bf16 %v842_v39, %v840_v36  ;;  %v6255_v53 = vpack.c.bf16 %v841_v44, %v839_v45  ;;  %v1082_v39 = vld [vmem:[#allocation3 + $0x60] sm:$0xff] }
 0x13c   : > { %v6647_v41 = vunpack.i.h.bf16 %v6645_v35  ;;  %v6646_v42 = vunpack.i.l.bf16 %v6645_v35  ;;  %v6642_v46 = vunpack.i.h.bf16 %v6640_v40  ;;  %v6641_v47 = vunpack.i.l.bf16 %v6640_v40  ;;  %6142 = vmatmul.mubr.msk.f32.gmra.mrb[2].mxu0 %vm338_vm4, %v577_v31 }
 0x13d   : > { %6254 = vmatprep.subr.bf16.mxu0 %v6253_v43  ;;  %806 = vmatprep.mubr.f32.mxu0 %v7193_v1 }
 0x13e   : > { %v974_v49 = vsel %vm970_vm12, %v6646_v42, %v6647_v41  ;;  %v972_v51 = vsel %vm970_vm12, %v6641_v47, %v6642_v46  ;;  %v1083_v46 = vld [vmem:[#allocation3 + $0x68] sm:$0xff] }
 0x13f   : > { %v6655_v50 = vpop.permute.xlu1 %6654  ;;  %v6650_v52 = vpop.permute.xlu0 %6649  ;;  %v6257_v54 = vpack.c.bf16 %v974_v49, %v972_v51  ;;  %v1199_v49 = vld [vmem:[#allocation3 + $0x70] sm:$0xff]  ;;  %v1200_v51 = vld [vmem:[#allocation3 + $0x78] sm:$0xff] }
 0x140   : > { %v6652_v55 = vunpack.i.h.bf16 %v6650_v52  ;;  %v6651_v56 = vunpack.i.l.bf16 %v6650_v52  ;;  %6143 = vmatmul.mubr.msk.f32.vlgmr.msra.gmra.mrb[0].mxu0 %vm338_vm4, %v707_v48  ;;  %v6657_v58 = vunpack.i.h.bf16 %v6655_v50  ;;  %v6656_v59 = vunpack.i.l.bf16 %v6655_v50  ;;  %v1325_v52 = vld [vmem:[#allocation3 + $0x80] sm:$0xff] }
 0x141   : > { %6256 = vmatpush1.bf16.msra.mxu0 %v6255_v53  ;;  %812 = vmatprep.mubr.f32.mxu0 %v7193_v1  ;;  %v1326_v53 = vld [vmem:[#allocation3 + $0x88] sm:$0xff] }
 0x142   : > { %6258 = vmatprep.subr.bf16.mxu0 %v6257_v54  ;;  %v971_v62 = vsel %vm970_vm12, %v6651_v56, %v6641_v47  ;;  %v973_v63 = vsel %vm970_vm12, %v6652_v55, %v6646_v42  ;;  %v1104_v7 = vsel %vm1102_vm13, %v6656_v59, %v6657_v58 }
 0x143   : > { %v6665_v60 = vpop.permute.xlu1 %6664  ;;  %v6660_v61 = vpop.permute.xlu0 %6659  ;;  %v6259_v10 = vpack.c.bf16 %v973_v63, %v971_v62 }
 0x144   : > { %v6662_v0 = vunpack.i.h.bf16 %v6660_v61  ;;  %v6661_v2 = vunpack.i.l.bf16 %v6660_v61  ;;  %6144 = vmatmul.mubr.msk.f32.gmra.mrb[2].mxu0 %vm338_vm4, %v708_v57  ;;  %v6667_v12 = vunpack.i.h.bf16 %v6665_v60  ;;  %v6666_v13 = vunpack.i.l.bf16 %v6665_v60 }
 0x145   : > { %917 = vmatprep.mubr.f32.mxu0 %v7193_v1 }
 0x146   : > { %v1106_v8 = vsel %vm1102_vm13, %v6661_v2, %v6662_v0  ;;  %v1105_v22 = vsel %vm1102_vm13, %v6667_v12, %v6661_v2  ;;  %v1103_v25 = vsel %vm1102_vm13, %v6666_v13, %v6656_v59 }
 0x147   : > { %v6675_v4 = vpop.permute.xlu1 %6674  ;;  %v6670_v9 = vpop.permute.xlu0 %6669  ;;  %v6261_v11 = vpack.c.bf16 %v1106_v8, %v1104_v7  ;;  %v6263_v33 = vpack.c.bf16 %v1105_v22, %v1103_v25 }
 0x148   : > { %6145 = vmatmul.mubr.msk.f32.vlgmr.msra.gmra.mrb[0].mxu0 %vm338_vm4, %v824_v3  ;;  %v6672_v14 = vunpack.i.h.bf16 %v6670_v9  ;;  %v6671_v15 = vunpack.i.l.bf16 %v6670_v9  ;;  %v6677_v16 = vunpack.i.h.bf16 %v6675_v4  ;;  %v6676_v17 = vunpack.i.l.bf16 %v6675_v4 }
 0x149   : > { %6260 = vmatpush1.bf16.msra.mxu0 %v6259_v10  ;;  %923 = vmatprep.mubr.f32.mxu0 %v7193_v1 }
 0x14a   : > { %6262 = vmatprep.subr.bf16.mxu0 %v6261_v11  ;;  %v1215_v27 = vsel %vm1213_vm14, %v6671_v15, %v6672_v14  ;;  %v1217_v28 = vsel %vm1213_vm14, %v6676_v17, %v6677_v16 }
 0x14b   : > { %v6680_v21 = vpop.permute.xlu0 %6679  ;;  %v6685_v29 = vpop.permute.xlu1 %6684  ;;  %v6265_v38 = vpack.c.bf16 %v1217_v28, %v1215_v27 }
 0x14c   : > { %6146 = vmatmul.mubr.msk.f32.gmra.mrb[2].mxu0 %vm338_vm4, %v825_v18  ;;  %v6682_v34 = vunpack.i.h.bf16 %v6680_v21  ;;  %v6681_v37 = vunpack.i.l.bf16 %v6680_v21  ;;  %v6687_v24 = vunpack.i.h.bf16 %v6685_v29  ;;  %v6686_v19 = vunpack.i.l.bf16 %v6685_v29 }
 0x14d   : > { %1049 = vmatprep.mubr.f32.mxu0 %v7193_v1 }
 0x14e   : > { %v1214_v31 = vsel %vm1213_vm14, %v6681_v37, %v6671_v15  ;;  %v1216_v35 = vsel %vm1213_vm14, %v6682_v34, %v6676_v17  ;;  %v1347_v42 = vsel %vm1345_vm15, %v6686_v19, %v6687_v24  ;;  %v1463_v24 = vld [vmem:[#allocation3 + $0x98] sm:$0xff] }
 0x14f   : > { %v6690_v32 = vpop.permute.xlu0 %6689  ;;  %v6695_v36 = vpop.permute.xlu1 %6694  ;;  %v6267_v41 = vpack.c.bf16 %v1216_v35, %v1214_v31 }
 0x150   : > { %6147 = vmatmul.mubr.msk.f32.vlgmr.msra.gmra.mrb[0].mxu0 %vm338_vm4, %v950_v26  ;;  %v6692_v20 = vunpack.i.h.bf16 %v6690_v32  ;;  %v6691_v30 = vunpack.i.l.bf16 %v6690_v32  ;;  %v6697_v43 = vunpack.i.h.bf16 %v6695_v36  ;;  %v6696_v44 = vunpack.i.l.bf16 %v6695_v36 }
 0x151   : > { %6264 = vmatpush1.bf16.msra.mxu0 %v6263_v33  ;;  %1055 = vmatprep.mubr.f32.mxu0 %v7193_v1 }
 0x152   : > { %6266 = vmatprep.subr.bf16.mxu0 %v6265_v38  ;;  %v1349_v40 = vsel %vm1345_vm15, %v6691_v30, %v6692_v20  ;;  %v1348_v47 = vsel %vm1345_vm15, %v6697_v43, %v6691_v30  ;;  %v1346_v48 = vsel %vm1345_vm15, %v6696_v44, %v6686_v19 }
 0x153   : > { %v6269_v45 = vpack.c.bf16 %v1349_v40, %v1347_v42  ;;  %v6271_v50 = vpack.c.bf16 %v1348_v47, %v1346_v48 }
 0x154   : > { %6148 = vmatmul.mubr.msk.f32.gmra.mrb[2].mxu0 %vm338_vm4, %v951_v23  ;;  %v1462_v23 = vld [vmem:[#allocation3 + $0x90] sm:$0xff] }
 0x155   : > { %1181 = vmatprep.mubr.f32.mxu0 %v7193_v1 }
 0x158   : > { %6149 = vmatmul.mubr.msk.f32.vlgmr.msra.gmra.mrb[0].mxu0 %vm338_vm4, %v1082_v39 }
 0x159   : > { %6268 = vmatpush1.bf16.msra.mxu0 %v6267_v41  ;;  %1187 = vmatprep.mubr.f32.mxu0 %v7193_v1 }
 0x15a   : > { %6270 = vmatprep.subr.bf16.mxu0 %v6269_v45 }
 0x15c   : > { %6150 = vmatmul.mubr.msk.f32.gmra.mrb[2].mxu0 %vm338_vm4, %v1083_v46 }
 0x15d   : > { %1292 = vmatprep.mubr.f32.mxu0 %v7193_v1 }
 0x160   : > { %6151 = vmatmul.mubr.msk.f32.vlgmr.msra.gmra.mrb[0].mxu0 %vm338_vm4, %v1199_v49  ;;  %v309_v58 = vpop.permute.xlu0 %308  ;;  %v314_v61 = vpop.permute.xlu1 %313 }
 0x161   : > { %6272 = vmatpush1.bf16.msra.mxu0 %v6271_v50  ;;  %1298 = vmatprep.mubr.f32.mxu0 %v7193_v1 }
 0x164   : > { %6152 = vmatmul.mubr.msk.f32.gmra.mrb[2].mxu0 %vm338_vm4, %v1200_v51  ;;  %v1470_v19 = vpop.permute.xlu1 %1469  ;;  %v1475_v41 = vpop.permute.xlu0 %1474 }
 0x165   : > { %1424 = vmatprep.mubr.f32.mxu0 %v7193_v1 }
 0x168   : > { %6153 = vmatmul.mubr.msk.f32.vlgmr.msra.gmra.mrb[0].mxu0 %vm338_vm4, %v1325_v52 }
 0x169   : > { %1430 = vmatprep.mubr.f32.mxu0 %v7193_v1 }
 0x16c   : > { %6154 = vmatmul.mubr.msk.f32.gmra.mrb[2].mxu0 %vm338_vm4, %v1326_v53 }
 0x16d   : > { %2837 = vmatprep.mubr.f32.mxu0 %v7193_v1 }
 0x18f   : > { %v411_v54 = vpop.f32.mrb[0].mxu1 }
 0x190   : > { %v413_v55 = vpop.f32.mrb[1].mxu1  ;;  %v422_v59 = vadd.f32 %v411_v54, %v309_v58 }
 0x191   : > { %v423_v60 = vadd.f32 %v413_v55, %v309_v58 }
 0x193   : > { %v417_v56 = vpop.f32.mrb[2].mxu1 }
 0x194   : > { %v419_v57 = vpop.f32.mrb[3].mxu1  ;;  %v424_v0 = vadd.f32 %v417_v56, %v314_v61 }
 0x195   : > { %v425_v4 = vadd.f32 %v419_v57, %v314_v61 }
 0x23b   : > { %v1426_v62 = vpop.f32.mrb[0].mxu0 }
 0x23c   : > { %v6398_v63 = vadd.f32 %v1426_v62, %v422_v59  ;;  %v1428_v2 = vpop.f32.mrb[1].mxu0 }
 0x23d   : > { %v6400_v3 = vadd.f32 %v1428_v2, %v423_v60 }
 0x23e   : > { %v1441_v7 = vmul.f32 0.5, %v6398_v63 }
 0x23f   : > { %v1442_v8 = vmul.f32 0.5, %v6400_v3  ;;  %v1432_v9 = vpop.f32.mrb[2].mxu0 }
 0x240   : > { %7090 = vtanh.f32 %v1441_v7  ;;  %v6402_v10 = vadd.f32 %v1432_v9, %v424_v0  ;;  %v1434_v11 = vpop.f32.mrb[3].mxu0  ;;  %v1623_v7 = vld [vmem:[%s8515_s1] ss:$2 sm:$0x3] }
 0x241   : > { %7092 = vtanh.f32 %v1442_v8  ;;  %v6404_v12 = vadd.f32 %v1434_v11, %v425_v4  ;;  %v1628_v8 = vrot.slane %v1623_v7, %v7327_v5  ;;  %v1632_v9 = vrot.slane %v1623_v7, %v7329_v6 }
 0x242   : > { %v1443_v13 = vmul.f32 0.5, %v6402_v10 }
 0x243   : > { %v1444_v14 = vmul.f32 0.5, %v6404_v12 }
 0x244   : > { %7094 = vtanh.f32 %v1443_v13 }
 0x245   : > { %7096 = vtanh.f32 %v1444_v14 }
 0x24a   : > { %v7091_v15 = vpop.eup %7090 }
 0x24b   : > { %v7093_v16 = vpop.eup %7092  ;;  %v1449_v17 = vadd.f32 1.0, %v7091_v15 }
 0x24c   : > { %v1450_v18 = vadd.f32 1.0, %v7093_v16 }
 0x24d   : > { %v1453_v25 = vmul.f32 0.5, %v1449_v17 }
 0x24e   : > { %v7095_v21 = vpop.eup %7094  ;;  %v1454_v27 = vmul.f32 0.5, %v1450_v18 }
 0x24f   : > { %v7097_v22 = vpop.eup %7096  ;;  %v1451_v26 = vadd.f32 1.0, %v7095_v21  ;;  %v1457_v33 = vmul.f32 %v6398_v63, %v1453_v25  ;;  %v6165_v63 = vld [vmem:[%s8515_s1 + $0x1] ss:$2 sm:$0x3] }
 0x250   : > { %v1452_v28 = vadd.f32 1.0, %v7097_v22  ;;  %v1458_v37 = vmul.f32 %v6400_v3, %v1454_v27  ;;  %v1856_v3 = vrot.slane %v6165_v63, %v7327_v5  ;;  %v1860_v4 = vrot.slane %v6165_v63, %v7329_v6 }
 0x251   : > { %v1455_v29 = vmul.f32 0.5, %v1451_v26 }
 0x252   : > { %v1456_v32 = vmul.f32 0.5, %v1452_v28 }
 0x253   : > { %v1459_v34 = vmul.f32 %v6402_v10, %v1455_v29 }
 0x254   : > { %v1460_v38 = vmul.f32 %v6404_v12, %v1456_v32 }
 0x255   : > { %v6275_v20 = vpack.c.bf16 %v1459_v34, %v1457_v33 }
 0x256   : > { %v6273_v30 = vpack.c.bf16 %v1460_v38, %v1458_v37 }
 0x258   : > { %6274 = vmatprep.subr.bf16.mxu1 %v6273_v30 }
 0x259   : > { %6276 = vmatpush1.bf16.msra.mxu1 %v6275_v20 }
 0x25c   : > { %6157 = vmatmul.mubr.msk.f32.vlgmr.msra.gmra.mrb[4].mxu1 %vm338_vm4, %v1462_v23 }
 0x25d   : > { %1553 = vmatprep.mubr.f32.mxu1 %v7193_v1 }
 0x260   : > { %6158 = vmatmul.mubr.msk.f32.gmra.mrb[6].mxu1 %vm338_vm4, %v1463_v24 }
 0x261   : > { %1712 = vmatprep.mubr.f32.mxu1 %v7193_v1 }
 0x32f   : > { %v1549_v31 = vpop.f32.mrb[4].mxu1 }
 0x330   : > { %v1550_v35 = vadd.f32 %v1549_v31, %v1470_v19  ;;  %v1551_v36 = vpop.f32.mrb[5].mxu1 }
 0x331   : > { %v1552_v39 = vadd.f32 %v1551_v36, %v1470_v19 }
 0x332   : > { %v1560_v40 = vmul.f32 0.5, %v1550_v35 }
 0x333   : > { %v1561_v42 = vmul.f32 0.5, %v1552_v39  ;;  %v1555_v43 = vpop.f32.mrb[6].mxu1 }
 0x334   : > { %7098 = vtanh.f32 %v1560_v40  ;;  %v1556_v44 = vadd.f32 %v1555_v43, %v1475_v41  ;;  %v1557_v45 = vpop.f32.mrb[7].mxu1 }
 0x335   : > { %7100 = vtanh.f32 %v1561_v42  ;;  %v1558_v46 = vadd.f32 %v1557_v45, %v1475_v41 }
 0x336   : > { %v1562_v47 = vmul.f32 0.5, %v1556_v44 }
 0x337   : > { %v1563_v48 = vmul.f32 0.5, %v1558_v46 }
 0x338   : > { %7102 = vtanh.f32 %v1562_v47 }
 0x339   : > { %7104 = vtanh.f32 %v1563_v48 }
 0x33e   : > { %v7099_v49 = vpop.eup %7098 }
 0x33f   : > { %v7101_v50 = vpop.eup %7100  ;;  %v1568_v51 = vadd.f32 1.0, %v7099_v49 }
 0x340   : > { %v1569_v52 = vadd.f32 1.0, %v7101_v50 }
 0x341   : > { %v1572_v53 = vmul.f32 0.5, %v1568_v51 }
 0x342   : > { %v7103_v54 = vpop.eup %7102  ;;  %v1573_v55 = vmul.f32 0.5, %v1569_v52  ;;  %v1641_v52 = vld [vmem:[#allocation3 + $0xa8] sm:$0xff] }
 0x343   : > { %v7105_v56 = vpop.eup %7104  ;;  %v7539_v57 = vmul.f32 %v1572_v53, %v1550_v35  ;;  %v1570_v58 = vadd.f32 1.0, %v7103_v54 }
 0x344   : > { %v7541_v59 = vmul.f32 %v1573_v55, %v1552_v39  ;;  %v1571_v60 = vadd.f32 1.0, %v7105_v56 }
 0x345   : > { %v1574_v61 = vmul.f32 0.5, %v1570_v58  ;;  %1584 = vrot.lane.b32.xlu1 %v7539_v57, %s7194_s19 }
 0x346   : > { %v1575_v62 = vmul.f32 0.5, %v1571_v60  ;;  %1586 = vrot.lane.b32.xlu0 %v7541_v59, %s7194_s19 }
 0x347   : > { %v7550_v0 = vmul.f32 %v1574_v61, %v1556_v44  ;;  %v1640_v44 = vld [vmem:[#allocation3 + $0xa0] sm:$0xff] }
 0x348   : > { %v7552_v2 = vmul.f32 %v1575_v62, %v1558_v46 }
 0x349   : > { %1588 = vrot.lane.b32.xlu1 %v7550_v0, %s7194_s19 }
 0x34a   : > { %1590 = vrot.lane.b32.xlu0 %v7552_v2, %s7194_s19 }
 0x34d   : > { %1861 = vrot.lane.b32.xlu1 %v1856_v3, %s7195_s26 }
 0x34e   : > { %1863 = vrot.lane.b32.xlu0 %v1860_v4, %s7195_s26 }
 0x351   : > { %1991 = vrot.lane.b32.xlu1 %v1628_v8, %s7196_s27 }
 0x352   : > { %1993 = vrot.lane.b32.xlu0 %v1632_v9, %s7196_s27 }
 0x355   : > { %2231 = vrot.lane.b32.xlu1 %v1856_v3, %s7197_s28 }
 0x356   : > { %2233 = vrot.lane.b32.xlu0 %v1860_v4, %s7197_s28 }
 0x359   : > { %2361 = vrot.lane.b32.xlu1 %v1628_v8, %s7198_s29 }
 0x35a   : > { %2363 = vrot.lane.b32.xlu0 %v1632_v9, %s7198_s29 }
 0x35d   : > { %2601 = vrot.lane.b32.xlu1 %v1856_v3, %s7199_s30 }
 0x35e   : > { %2603 = vrot.lane.b32.xlu0 %v1860_v4, %s7199_s30 }
 0x3b7   : > { %v1585_v10 = vpop.permute.xlu1 %1584 }
 0x3b8   : > { %1600 = vst.msk [vmem:[#allocation2] sm:$0xff] %vm297_vm2, %v1585_v10  ;;  %v1587_v11 = vpop.permute.xlu0 %1586 }
 0x3b9   : > { %1602 = vst.msk [vmem:[#allocation2 + $0x10] sm:$0xff] %vm267_vm0, %v1587_v11  ;;  %v7578_v12 = vsel %vm267_vm0, %v1585_v10, %v1587_v11 }
 0x3ba   : > { %v1636_v16 = vmul.f32 %v1632_v9, %v7578_v12 }
 0x3bb   : > { %v1589_v13 = vpop.permute.xlu1 %1588 }
 0x3bc   : > { %1603 = vst.msk [vmem:[#allocation2 + $0x18] sm:$0xff] %vm297_vm2, %v1589_v13  ;;  %v1591_v14 = vpop.permute.xlu0 %1590 }
 0x3bd   : > { %v7582_v15 = vsel %vm267_vm0, %v1589_v13, %v1591_v14  ;;  %1605 = vst.msk [vmem:[#allocation2 + $0x28] sm:$0xff] %vm267_vm0, %v1591_v14 }
 0x3be   : > { %v1638_v17 = vmul.f32 %v1632_v9, %v7582_v15 }
 0x3bf   : > { %v1862_v18 = vpop.permute.xlu1 %1861  ;;  %v7593_v27 = vld [vmem:[#allocation2] sm:$0xff] }
 0x3c0   : > { %v7587_v21 = vld [vmem:[#allocation2 + $0x10] sm:$0xff]  ;;  %v1864_v22 = vpop.permute.xlu0 %1863  ;;  %v6277_v25 = vpack.c.bf16 %v1638_v17, %v1636_v16  ;;  %v1635_v30 = vmul.f32 %v7593_v27, %v1628_v8  ;;  %v1869_v45 = vmul.f32 %v1862_v18, %v7593_v27 }
 0x3c1   : > { %v7591_v26 = vpack.i.bf16 %v7587_v21, %v7578_v12  ;;  %v1865_v29 = vsel %vm564_vm3, %v1862_v18, %v1864_v22  ;;  %v1871_v38 = vmul.f32 %v1864_v22, %v7587_v21 }
 0x3c2   : > { %6278 = vmatprep.subr.bf16.mxu1 %v6277_v25  ;;  %v1870_v31 = vmul.f32 %v1865_v29, %v7578_v12  ;;  %v1873_v35 = vmul.f32 %v1865_v29, %v7582_v15 }
 0x3c3   : > { %v7595_v28 = vld [vmem:[#allocation2 + $0x18] sm:$0xff]  ;;  %v1992_v32 = vpop.permute.xlu1 %1991  ;;  %6701 = vrot.lane.b32.xlu1 %v7591_v26, %s7200_s7 }
 0x3c4   : > { %v7600_v33 = vld [vmem:[#allocation2 + $0x28] sm:$0xff]  ;;  %v1994_v34 = vpop.permute.xlu0 %1993  ;;  %v7604_v37 = vpack.i.bf16 %v7595_v28, %v7593_v27  ;;  %v1637_v19 = vmul.f32 %v7595_v28, %v1628_v8  ;;  %v1872_v42 = vmul.f32 %v1862_v18, %v7595_v28  ;;  %v6715_v43 = vpack.i.bf16 %v1871_v38, %v1870_v31 }
 0x3c5   : > { %v1874_v20 = vmul.f32 %v1864_v22, %v7600_v33  ;;  %v1995_v23 = vsel %vm338_vm4, %v1992_v32, %v1994_v34  ;;  %v7612_v24 = vpack.i.bf16 %v7600_v33, %v7582_v15  ;;  %v2001_v39 = vmul.f32 %v1994_v34, %v7587_v21 }
 0x3c6   : > { %v6279_v36 = vpack.c.bf16 %v1637_v19, %v1635_v30  ;;  %v2000_v41 = vmul.f32 %v1995_v23, %v7578_v12  ;;  %v1999_v46 = vmul.f32 %v1992_v32, %v7593_v27  ;;  %v2002_v47 = vmul.f32 %v1992_v32, %v7595_v28 }
 0x3c7   : > { %6711 = vrot.lane.b32.xlu1 %v7604_v37, %s7200_s7  ;;  %6706 = vrot.lane.b32.xlu0 %v7612_v24, %s7200_s7  ;;  %v6720_v40 = vpack.i.bf16 %v1874_v20, %v1873_v35  ;;  %v2004_v49 = vmul.f32 %v1994_v34, %v7600_v33  ;;  %v6725_v50 = vpack.i.bf16 %v1872_v42, %v1869_v45  ;;  %v2232_v53 = vpop.permute.xlu1 %2231 }
 0x3c8   : > { %6280 = vmatpush1.bf16.msra.mxu1 %v6279_v36  ;;  %v6730_v48 = vpack.i.bf16 %v2001_v39, %v2000_v41  ;;  %v2003_v51 = vmul.f32 %v1995_v23, %v7582_v15  ;;  %v2234_v54 = vpop.permute.xlu0 %2233  ;;  %v6740_v55 = vpack.i.bf16 %v2002_v47, %v1999_v46  ;;  %v2239_v3 = vmul.f32 %v2232_v53, %v7593_v27 }
 0x3c9   : > { %v2235_v56 = vsel %vm938_vm5, %v2232_v53, %v2234_v54  ;;  %v2241_v60 = vmul.f32 %v2234_v54, %v7587_v21  ;;  %v2242_v4 = vmul.f32 %v2232_v53, %v7595_v28  ;;  %v2244_v8 = vmul.f32 %v2234_v54, %v7600_v33 }
 0x3ca   : > { %v6735_v58 = vpack.i.bf16 %v2004_v49, %v2003_v51  ;;  %v2240_v61 = vmul.f32 %v2235_v56, %v7578_v12  ;;  %v2243_v10 = vmul.f32 %v2235_v56, %v7582_v15 }
 0x3cb   : > { %6721 = vrot.lane.b32.xlu1 %v6720_v40, %s7201_s8  ;;  %6716 = vrot.lane.b32.xlu0 %v6715_v43, %s7201_s8  ;;  %v2362_v62 = vpop.permute.xlu1 %2361  ;;  %v6770_v13 = vpack.i.bf16 %v2242_v4, %v2239_v3  ;;  %v1736_v4 = vld [vmem:[#allocation3 + $0xb0] sm:$0xff] }
 0x3cc   : > { %6161 = vmatmul.mubr.msk.f32.vlgmr.msra.gmra.mrb[8].mxu1 %vm338_vm4, %v1640_v44  ;;  %v2364_v63 = vpop.permute.xlu0 %2363  ;;  %v6760_v7 = vpack.i.bf16 %v2241_v60, %v2240_v61  ;;  %v6765_v17 = vpack.i.bf16 %v2244_v8, %v2243_v10  ;;  %v2369_v25 = vmul.f32 %v2362_v62, %v7593_v27  ;;  %v2372_v29 = vmul.f32 %v2362_v62, %v7595_v28 }
 0x3cd   : > { %1718 = vmatprep.mubr.f32.mxu1 %v7193_v1  ;;  %v2365_v9 = vsel %vm1070_vm6, %v2362_v62, %v2364_v63  ;;  %v2374_v11 = vmul.f32 %v2364_v63, %v7600_v33  ;;  %v2371_v16 = vmul.f32 %v2364_v63, %v7587_v21 }
 0x3ce   : > { %v2373_v14 = vmul.f32 %v2365_v9, %v7582_v15  ;;  %v2370_v18 = vmul.f32 %v2365_v9, %v7578_v12  ;;  %v6785_v30 = vpack.i.bf16 %v2372_v29, %v2369_v25 }
 0x3cf   : > { %6731 = vrot.lane.b32.xlu1 %v6730_v48, %s7202_s9  ;;  %6726 = vrot.lane.b32.xlu0 %v6725_v50, %s7201_s8  ;;  %v2602_v34 = vpop.permute.xlu1 %2601 }
 0x3d0   : > { %6162 = vmatmul.mubr.msk.f32.gmra.mrb[10].mxu1 %vm338_vm4, %v1641_v52  ;;  %v6780_v22 = vpack.i.bf16 %v2374_v11, %v2373_v14  ;;  %v6775_v32 = vpack.i.bf16 %v2371_v16, %v2370_v18  ;;  %v2604_v38 = vpop.permute.xlu0 %2603  ;;  %v2609_v39 = vmul.f32 %v2602_v34, %v7593_v27  ;;  %v6160_v27 = vld [vmem:[%s8517_s3 + $0x28] sm:$0xff] }
 0x3d1   : > { %1834 = vmatprep.mubr.f32.mxu1 %v7193_v1  ;;  %v2605_v20 = vsel %vm1313_vm7, %v2602_v34, %v2604_v38  ;;  %v2614_v23 = vmul.f32 %v2604_v38, %v7600_v33  ;;  %v2611_v31 = vmul.f32 %v2604_v38, %v7587_v21  ;;  %v6180_v21 = vld [vmem:[%s8517_s3 + $0x30] sm:$0xff]  ;;  %v6181_v33 = vld [vmem:[%s8517_s3 + $0x38] sm:$0xff] }
 0x3d2   : > { %v2613_v19 = vmul.f32 %v2605_v20, %v7582_v15  ;;  %v2610_v35 = vmul.f32 %v2605_v20, %v7578_v12  ;;  %v6159_v12 = vld [vmem:[%s8517_s3 + $0x20] sm:$0xff] }
 0x3d3   : > { %6741 = vrot.lane.b32.xlu1 %v6740_v55, %s7202_s9  ;;  %6736 = vrot.lane.b32.xlu0 %v6735_v58, %s7202_s9 }
 0x3d4   : > { %v6810_v36 = vpack.i.bf16 %v2614_v23, %v2613_v19  ;;  %v6805_v40 = vpack.i.bf16 %v2611_v31, %v2610_v35  ;;  %v1876_v31 = vld [vmem:[#allocation3 + $0xc0] sm:$0xff] }
 0x3d7   : > { %6751 = vrot.lane.b32.xlu1 %v7612_v24, %s7203_s10  ;;  %6746 = vrot.lane.b32.xlu0 %v7591_v26, %s7203_s10 }
 0x3db   : > { %6761 = vrot.lane.b32.xlu1 %v6760_v7, %s7204_s11  ;;  %6756 = vrot.lane.b32.xlu0 %v7604_v37, %s7203_s10 }
 0x3df   : > { %6771 = vrot.lane.b32.xlu1 %v6770_v13, %s7204_s11  ;;  %6766 = vrot.lane.b32.xlu0 %v6765_v17, %s7204_s11 }
 0x3e3   : > { %6781 = vrot.lane.b32.xlu1 %v6780_v22, %s7205_s12  ;;  %6776 = vrot.lane.b32.xlu0 %v6775_v32, %s7205_s12  ;;  %v1737_v22 = vld [vmem:[#allocation3 + $0xb8] sm:$0xff] }
 0x3e7   : > { %6791 = vrot.lane.b32.xlu1 %v7591_v26, %s8526_s13  ;;  %6786 = vrot.lane.b32.xlu0 %v6785_v30, %s7205_s12  ;;  %v2612_v26 = vmul.f32 %v2602_v34, %v7595_v28  ;;  %v6184_v28 = vld [vmem:[%s8517_s3 + $0x50] sm:$0xff] }
 0x3e9   : > { %v6815_v15 = vpack.i.bf16 %v2612_v26, %v2609_v39 }
 0x3eb   : > { %6801 = vrot.lane.b32.xlu1 %v7604_v37, %s8526_s13  ;;  %6796 = vrot.lane.b32.xlu0 %v7612_v24, %s8526_s13  ;;  %v6185_v37 = vld [vmem:[%s8517_s3 + $0x58] sm:$0xff]  ;;  %s7224_s13 = smov 80  }
 0x3ef   : > { %6811 = vrot.lane.b32.xlu1 %v6810_v36, %s8524_s14  ;;  %6806 = vrot.lane.b32.xlu0 %v6805_v40, %s8524_s14 }
 0x3f3   : > { %1611 = vperm.xlu1 %6699, %v6159_v12   ;;  %6816 = vrot.lane.b32.xlu0 %v6815_v15, %s8524_s14  ;;  %s7225_s14 = smov 64  }
 0x3f7   : > { %2759 = vperm.xlu1 %6699, %v6180_v21   ;;  %1616 = vperm.xlu0 %6698, %v6160_v27  }
 0x3fb   : > { %2882 = vperm.xlu1 %6699, %v6184_v28   ;;  %2764 = vperm.xlu0 %6698, %v6181_v33  }
 0x3ff   : > { %2887 = vperm.xlu0 %6698, %v6185_v37   ;;  %v1877_v37 = vld [vmem:[#allocation3 + $0xc8] sm:$0xff] }
 0x435   : > { %v6702_v24 = vpop.permute.xlu1 %6701 }
 0x436   : > { %v6704_v41 = vunpack.i.h.bf16 %v6702_v24  ;;  %v6703_v42 = vunpack.i.l.bf16 %v6702_v24 }
 0x438   : > { %v1757_v52 = vsel %vm453_vm8, %v6703_v42, %v6704_v41 }
 0x439   : > { %v6712_v43 = vpop.permute.xlu1 %6711  ;;  %v6707_v44 = vpop.permute.xlu0 %6706 }
 0x43a   : > { %v6714_v45 = vunpack.i.h.bf16 %v6712_v43  ;;  %v6713_v46 = vunpack.i.l.bf16 %v6712_v43  ;;  %v6709_v47 = vunpack.i.h.bf16 %v6707_v44  ;;  %v6708_v48 = vunpack.i.l.bf16 %v6707_v44 }
 0x43c   : > { %v1756_v49 = vsel %vm453_vm8, %v6713_v46, %v6703_v42  ;;  %v1758_v50 = vsel %vm453_vm8, %v6714_v45, %v6708_v48  ;;  %v1759_v53 = vsel %vm453_vm8, %v6708_v48, %v6709_v47 }
 0x43d   : > { %v6722_v51 = vpop.permute.xlu1 %6721  ;;  %v6717_v54 = vpop.permute.xlu0 %6716  ;;  %v6281_v58 = vpack.c.bf16 %v1759_v53, %v1757_v52  ;;  %v6283_v60 = vpack.c.bf16 %v1758_v50, %v1756_v49  ;;  %v2006_v50 = vld [vmem:[#allocation3 + $0xd0] sm:$0xff] }
 0x43e   : > { %v6724_v55 = vunpack.i.h.bf16 %v6722_v51  ;;  %v6723_v56 = vunpack.i.l.bf16 %v6722_v51  ;;  %v6719_v61 = vunpack.i.h.bf16 %v6717_v54  ;;  %v6718_v62 = vunpack.i.l.bf16 %v6717_v54 }
 0x43f   : > { %6282 = vmatprep.subr.bf16.mxu1 %v6281_v58 }
 0x440   : > { %v1899_v63 = vsel %vm596_vm9, %v6723_v56, %v6724_v55  ;;  %6284 = vmatpush1.bf16.msra.mxu1 %v6283_v60  ;;  %v1897_v7 = vsel %vm596_vm9, %v6718_v62, %v6719_v61  ;;  %v2007_v60 = vld [vmem:[#allocation3 + $0xd8] sm:$0xff] }
 0x441   : > { %v6732_v3 = vpop.permute.xlu1 %6731  ;;  %v6727_v8 = vpop.permute.xlu0 %6726  ;;  %v6285_v9 = vpack.c.bf16 %v1899_v63, %v1897_v7 }
 0x442   : > { %v6729_v10 = vunpack.i.h.bf16 %v6727_v8  ;;  %v6728_v11 = vunpack.i.l.bf16 %v6727_v8  ;;  %v6734_v16 = vunpack.i.h.bf16 %v6732_v3  ;;  %v6733_v17 = vunpack.i.l.bf16 %v6732_v3 }
 0x443   : > { %6163 = vmatmul.mubr.msk.f32.vlgmr.msra.gmra.mrb[8].mxu1 %vm338_vm4, %v1736_v4  ;;  %6286 = vmatprep.subr.bf16.mxu1 %v6285_v9 }
 0x444   : > { %v1896_v13 = vsel %vm596_vm9, %v6728_v11, %v6718_v62  ;;  %v1898_v14 = vsel %vm596_vm9, %v6729_v10, %v6723_v56  ;;  %1840 = vmatprep.mubr.f32.mxu1 %v7193_v1  ;;  %v2027_v35 = vsel %vm727_vm10, %v6733_v17, %v6734_v16  ;;  %v2122_v16 = vld [vmem:[#allocation3 + $0xe0] sm:$0xff] }
 0x445   : > { %v6742_v18 = vpop.permute.xlu1 %6741  ;;  %v6737_v25 = vpop.permute.xlu0 %6736  ;;  %v6287_v34 = vpack.c.bf16 %v1898_v14, %v1896_v13 }
 0x446   : > { %v6744_v29 = vunpack.i.h.bf16 %v6742_v18  ;;  %v6743_v32 = vunpack.i.l.bf16 %v6742_v18  ;;  %v6739_v38 = vunpack.i.h.bf16 %v6737_v25  ;;  %v6738_v20 = vunpack.i.l.bf16 %v6737_v25 }
 0x447   : > { %6164 = vmatmul.mubr.msk.f32.gmra.mrb[10].mxu1 %vm338_vm4, %v1737_v22 }
 0x448   : > { %v2026_v30 = vsel %vm727_vm10, %v6743_v32, %v6733_v17  ;;  %v2028_v23 = vsel %vm727_vm10, %v6744_v29, %v6738_v20  ;;  %6288 = vmatpush1.bf16.msra.mxu1 %v6287_v34  ;;  %1974 = vmatprep.mubr.f32.mxu1 %v7193_v1  ;;  %v2029_v36 = vsel %vm727_vm10, %v6738_v20, %v6739_v38 }
 0x449   : > { %v6752_v19 = vpop.permute.xlu1 %6751  ;;  %v6747_v39 = vpop.permute.xlu0 %6746  ;;  %v6289_v12 = vpack.c.bf16 %v2029_v36, %v2027_v35  ;;  %v6291_v15 = vpack.c.bf16 %v2028_v23, %v2026_v30  ;;  %v2123_v30 = vld [vmem:[#allocation3 + $0xe8] sm:$0xff] }
 0x44a   : > { %v6754_v26 = vunpack.i.h.bf16 %v6752_v19  ;;  %v6753_v40 = vunpack.i.l.bf16 %v6752_v19  ;;  %v6749_v21 = vunpack.i.h.bf16 %v6747_v39  ;;  %v6748_v27 = vunpack.i.l.bf16 %v6747_v39  ;;  %v2246_v39 = vld [vmem:[#allocation3 + $0xf0] sm:$0xff] }
 0x44b   : > { %6166 = vmatmul.mubr.msk.f32.vlgmr.msra.gmra.mrb[8].mxu1 %vm338_vm4, %v1876_v31  ;;  %6290 = vmatprep.subr.bf16.mxu1 %v6289_v12 }
 0x44c   : > { %v2139_v28 = vsel %vm838_vm11, %v6753_v40, %v6754_v26  ;;  %6292 = vmatpush1.bf16.msra.mxu1 %v6291_v15  ;;  %1980 = vmatprep.mubr.f32.mxu1 %v7193_v1  ;;  %v2137_v24 = vsel %vm838_vm11, %v6748_v27, %v6749_v21 }
 0x44d   : > { %v6762_v33 = vpop.permute.xlu1 %6761  ;;  %v6757_v41 = vpop.permute.xlu0 %6756  ;;  %v6293_v42 = vpack.c.bf16 %v2139_v28, %v2137_v24 }
 0x44e   : > { %v6759_v43 = vunpack.i.h.bf16 %v6757_v41  ;;  %v6758_v44 = vunpack.i.l.bf16 %v6757_v41  ;;  %v6764_v47 = vunpack.i.h.bf16 %v6762_v33  ;;  %v6763_v48 = vunpack.i.l.bf16 %v6762_v33 }
 0x44f   : > { %6167 = vmatmul.mubr.msk.f32.gmra.mrb[10].mxu1 %vm338_vm4, %v1877_v37  ;;  %6294 = vmatprep.subr.bf16.mxu1 %v6293_v42 }
 0x450   : > { %v2136_v45 = vsel %vm838_vm11, %v6758_v44, %v6748_v27  ;;  %v2138_v46 = vsel %vm838_vm11, %v6759_v43, %v6753_v40  ;;  %2104 = vmatprep.mubr.f32.mxu1 %v7193_v1  ;;  %v2267_v61 = vsel %vm970_vm12, %v6763_v48, %v6764_v47  ;;  %v2247_v43 = vld [vmem:[#allocation3 + $0xf8] sm:$0xff]  ;;  %v2376_v47 = vld [vmem:[#allocation3 + $0x100] sm:$0xff] }
 0x451   : > { %v6772_v49 = vpop.permute.xlu1 %6771  ;;  %v6767_v51 = vpop.permute.xlu0 %6766  ;;  %v6295_v52 = vpack.c.bf16 %v2138_v46, %v2136_v45 }
 0x452   : > { %v6769_v53 = vunpack.i.h.bf16 %v6767_v51  ;;  %v6768_v54 = vunpack.i.l.bf16 %v6767_v51  ;;  %v6774_v55 = vunpack.i.h.bf16 %v6772_v49  ;;  %v6773_v56 = vunpack.i.l.bf16 %v6772_v49 }
 0x453   : > { %6168 = vmatmul.mubr.msk.f32.vlgmr.msra.gmra.mrb[8].mxu1 %vm338_vm4, %v2006_v50 }
 0x454   : > { %6296 = vmatpush1.bf16.msra.mxu1 %v6295_v52  ;;  %2110 = vmatprep.mubr.f32.mxu1 %v7193_v1  ;;  %v2269_v62 = vsel %vm970_vm12, %v6768_v54, %v6769_v53  ;;  %v2268_v10 = vsel %vm970_vm12, %v6774_v55, %v6768_v54  ;;  %v2266_v11 = vsel %vm970_vm12, %v6773_v56, %v6763_v48  ;;  %v2377_v54 = vld [vmem:[#allocation3 + $0x108] sm:$0xff] }
 0x455   : > { %v6782_v58 = vpop.permute.xlu1 %6781  ;;  %v6777_v63 = vpop.permute.xlu0 %6776  ;;  %v6297_v7 = vpack.c.bf16 %v2269_v62, %v2267_v61  ;;  %v6299_v25 = vpack.c.bf16 %v2268_v10, %v2266_v11  ;;  %v2493_v61 = vld [vmem:[#allocation3 + $0x118] sm:$0xff]  ;;  %v2616_v62 = vld [vmem:[#allocation3 + $0x120] sm:$0xff] }
 0x456   : > { %v6784_v3 = vunpack.i.h.bf16 %v6782_v58  ;;  %v6783_v4 = vunpack.i.l.bf16 %v6782_v58  ;;  %v6779_v8 = vunpack.i.h.bf16 %v6777_v63  ;;  %v6778_v9 = vunpack.i.l.bf16 %v6777_v63  ;;  %v2492_v58 = vld [vmem:[#allocation3 + $0x110] sm:$0xff]  ;;  %v2617_v63 = vld [vmem:[#allocation3 + $0x128] sm:$0xff] }
 0x457   : > { %6169 = vmatmul.mubr.msk.f32.gmra.mrb[10].mxu1 %vm338_vm4, %v2007_v60  ;;  %6298 = vmatprep.subr.bf16.mxu1 %v6297_v7 }
 0x458   : > { %v2399_v13 = vsel %vm1102_vm13, %v6783_v4, %v6784_v3  ;;  %2214 = vmatprep.mubr.f32.mxu1 %v7193_v1  ;;  %v2397_v17 = vsel %vm1102_vm13, %v6778_v9, %v6779_v8 }
 0x459   : > { %v6792_v14 = vpop.permute.xlu1 %6791  ;;  %v6787_v18 = vpop.permute.xlu0 %6786  ;;  %v6301_v22 = vpack.c.bf16 %v2399_v13, %v2397_v17 }
 0x45a   : > { %v6789_v29 = vunpack.i.h.bf16 %v6787_v18  ;;  %v6788_v32 = vunpack.i.l.bf16 %v6787_v18  ;;  %v6794_v34 = vunpack.i.h.bf16 %v6792_v14  ;;  %v6793_v38 = vunpack.i.l.bf16 %v6792_v14 }
 0x45b   : > { %6170 = vmatmul.mubr.msk.f32.vlgmr.msra.gmra.mrb[8].mxu1 %vm338_vm4, %v2122_v16 }
 0x45c   : > { %6300 = vmatpush1.bf16.msra.mxu1 %v6299_v25  ;;  %2220 = vmatprep.mubr.f32.mxu1 %v7193_v1  ;;  %v2396_v35 = vsel %vm1102_vm13, %v6788_v32, %v6778_v9  ;;  %v2398_v36 = vsel %vm1102_vm13, %v6789_v29, %v6783_v4  ;;  %v2507_v26 = vsel %vm1213_vm14, %v6793_v38, %v6794_v34 }
 0x45d   : > { %v6802_v20 = vpop.permute.xlu1 %6801  ;;  %6302 = vmatprep.subr.bf16.mxu1 %v6301_v22  ;;  %v6797_v23 = vpop.permute.xlu0 %6796  ;;  %v6303_v27 = vpack.c.bf16 %v2398_v36, %v2396_v35 }
 0x45e   : > { %v6799_v19 = vunpack.i.h.bf16 %v6797_v23  ;;  %v6798_v31 = vunpack.i.l.bf16 %v6797_v23  ;;  %v6804_v28 = vunpack.i.h.bf16 %v6802_v20  ;;  %v6803_v33 = vunpack.i.l.bf16 %v6802_v20 }
 0x45f   : > { %6171 = vmatmul.mubr.msk.f32.gmra.mrb[10].mxu1 %vm338_vm4, %v2123_v30 }
 0x460   : > { %2344 = vmatprep.mubr.f32.mxu1 %v7193_v1  ;;  %v2509_v40 = vsel %vm1213_vm14, %v6798_v31, %v6799_v19  ;;  %v2508_v44 = vsel %vm1213_vm14, %v6804_v28, %v6798_v31  ;;  %v2506_v45 = vsel %vm1213_vm14, %v6803_v33, %v6793_v38  ;;  %v2752_v28 = vld [vmem:[#allocation3 + $0x130] sm:$0xff]  ;;  %v2753_v33 = vld [vmem:[#allocation3 + $0x138] sm:$0xff] }
 0x461   : > { %v6807_v12 = vpop.permute.xlu0 %6806  ;;  %v6812_v15 = vpop.permute.xlu1 %6811  ;;  %v6305_v21 = vpack.c.bf16 %v2509_v40, %v2507_v26  ;;  %v6307_v50 = vpack.c.bf16 %v2508_v44, %v2506_v45 }
 0x462   : > { %v6809_v37 = vunpack.i.h.bf16 %v6807_v12  ;;  %v6808_v24 = vunpack.i.l.bf16 %v6807_v12  ;;  %v6814_v41 = vunpack.i.h.bf16 %v6812_v15  ;;  %v6813_v42 = vunpack.i.l.bf16 %v6812_v15 }
 0x463   : > { %6172 = vmatmul.mubr.msk.f32.vlgmr.msra.gmra.mrb[8].mxu1 %vm338_vm4, %v2246_v39 }
 0x464   : > { %6304 = vmatpush1.bf16.msra.mxu1 %v6303_v27  ;;  %2350 = vmatprep.mubr.f32.mxu1 %v7193_v1  ;;  %v2637_v48 = vsel %vm1345_vm15, %v6808_v24, %v6809_v37  ;;  %v2639_v49 = vsel %vm1345_vm15, %v6813_v42, %v6814_v41 }
 0x465   : > { %6306 = vmatprep.subr.bf16.mxu1 %v6305_v21  ;;  %v6817_v46 = vpop.permute.xlu0 %6816  ;;  %v6309_v53 = vpack.c.bf16 %v2639_v49, %v2637_v48 }
 0x466   : > { %v6819_v51 = vunpack.i.h.bf16 %v6817_v46  ;;  %v6818_v52 = vunpack.i.l.bf16 %v6817_v46 }
 0x467   : > { %6173 = vmatmul.mubr.msk.f32.gmra.mrb[10].mxu1 %vm338_vm4, %v2247_v43 }
 0x468   : > { %2474 = vmatprep.mubr.f32.mxu1 %v7193_v1  ;;  %v2636_v55 = vsel %vm1345_vm15, %v6818_v52, %v6808_v24  ;;  %v2638_v56 = vsel %vm1345_vm15, %v6819_v51, %v6813_v42 }
 0x469   : > { %v6311_v60 = vpack.c.bf16 %v2638_v56, %v2636_v55 }
 0x46b   : > { %6174 = vmatmul.mubr.msk.f32.vlgmr.msra.gmra.mrb[8].mxu1 %vm338_vm4, %v2376_v47 }
 0x46c   : > { %6308 = vmatpush1.bf16.msra.mxu1 %v6307_v50  ;;  %2480 = vmatprep.mubr.f32.mxu1 %v7193_v1 }
 0x46d   : > { %6310 = vmatprep.subr.bf16.mxu1 %v6309_v53 }
 0x46f   : > { %6175 = vmatmul.mubr.msk.f32.gmra.mrb[10].mxu1 %vm338_vm4, %v2377_v54 }
 0x470   : > { %2584 = vmatprep.mubr.f32.mxu1 %v7193_v1 }
 0x472   : > { %v1612_v3 = vpop.permute.xlu1 %1611 }
 0x473   : > { %6176 = vmatmul.mubr.msk.f32.vlgmr.msra.gmra.mrb[8].mxu1 %vm338_vm4, %v2492_v58 }
 0x474   : > { %6312 = vmatpush1.bf16.msra.mxu1 %v6311_v60  ;;  %2590 = vmatprep.mubr.f32.mxu1 %v7193_v1 }
 0x476   : > { %v1617_v11 = vpop.permute.xlu0 %1616  ;;  %v2760_v37 = vpop.permute.xlu1 %2759 }
 0x477   : > { %6177 = vmatmul.mubr.msk.f32.gmra.mrb[10].mxu1 %vm338_vm4, %v2493_v61 }
 0x478   : > { %2714 = vmatprep.mubr.f32.mxu1 %v7193_v1 }
 0x47a   : > { %v2765_v45 = vpop.permute.xlu0 %2764 }
 0x47b   : > { %6178 = vmatmul.mubr.msk.f32.vlgmr.msra.gmra.mrb[8].mxu1 %vm338_vm4, %v2616_v62 }
 0x47c   : > { %2720 = vmatprep.mubr.f32.mxu1 %v7193_v1 }
 0x47f   : > { %6179 = vmatmul.mubr.msk.f32.gmra.mrb[10].mxu1 %vm338_vm4, %v2617_v63 }
 0x480   : > { %3125 = vmatprep.mubr.f32.mxu1 %v7193_v1 }
 0x54e   : > { %v2716_v4 = vpop.f32.mrb[8].mxu1 }
 0x54f   : > { %v6405_v7 = vadd.f32 %v2716_v4, %v1612_v3  ;;  %v2718_v8 = vpop.f32.mrb[9].mxu1 }
 0x550   : > { %v6406_v9 = vadd.f32 %v2718_v8, %v1612_v3 }
 0x551   : > { %v2731_v10 = vmul.f32 0.5, %v6405_v7 }
 0x552   : > { %v2732_v13 = vmul.f32 0.5, %v6406_v9  ;;  %v2722_v14 = vpop.f32.mrb[10].mxu1 }
 0x553   : > { %7106 = vtanh.f32 %v2731_v10  ;;  %v6407_v16 = vadd.f32 %v2722_v14, %v1617_v11  ;;  %v2724_v17 = vpop.f32.mrb[11].mxu1 }
 0x554   : > { %7108 = vtanh.f32 %v2732_v13  ;;  %v6408_v18 = vadd.f32 %v2724_v17, %v1617_v11 }
 0x555   : > { %v2733_v22 = vmul.f32 0.5, %v6407_v16 }
 0x556   : > { %v2734_v25 = vmul.f32 0.5, %v6408_v18 }
 0x557   : > { %7110 = vtanh.f32 %v2733_v22 }
 0x558   : > { %7112 = vtanh.f32 %v2734_v25  ;;  %v2875_v25 = vld [vmem:[#allocation3 + $0x1d0] sm:$0xff] }
 0x55d   : > { %v7107_v29 = vpop.eup %7106 }
 0x55e   : > { %v7109_v32 = vpop.eup %7108  ;;  %v2739_v34 = vadd.f32 1.0, %v7107_v29  ;;  %v2876_v29 = vld [vmem:[#allocation3 + $0x1d8] sm:$0xff] }
 0x55f   : > { %v2740_v38 = vadd.f32 1.0, %v7109_v32  ;;  %v2883_v32 = vpop.permute.xlu1 %2882 }
 0x560   : > { %v2743_v23 = vmul.f32 0.5, %v2739_v34 }
 0x561   : > { %v7111_v20 = vpop.eup %7110  ;;  %v2744_v31 = vmul.f32 0.5, %v2740_v38 }
 0x562   : > { %v7113_v30 = vpop.eup %7112  ;;  %v2741_v19 = vadd.f32 1.0, %v7111_v20  ;;  %v2747_v26 = vmul.f32 %v6405_v7, %v2743_v23 }
 0x563   : > { %v2742_v35 = vadd.f32 1.0, %v7113_v30  ;;  %v2748_v12 = vmul.f32 %v6406_v9, %v2744_v31 }
 0x564   : > { %v2745_v36 = vmul.f32 0.5, %v2741_v19  ;;  %v2888_v19 = vpop.permute.xlu0 %2887 }
 0x565   : > { %v2746_v39 = vmul.f32 0.5, %v2742_v35 }
 0x566   : > { %v2749_v40 = vmul.f32 %v6407_v16, %v2745_v36 }
 0x567   : > { %v2750_v15 = vmul.f32 %v6408_v18, %v2746_v39 }
 0x568   : > { %v6315_v21 = vpack.c.bf16 %v2749_v40, %v2747_v26 }
 0x569   : > { %v6313_v27 = vpack.c.bf16 %v2750_v15, %v2748_v12 }
 0x56b   : > { %6314 = vmatprep.subr.bf16.mxu0 %v6313_v27 }
 0x56c   : > { %6316 = vmatpush1.bf16.msra.mxu0 %v6315_v21 }
 0x56f   : > { %6182 = vmatmul.mubr.msk.f32.vlgmr.msra.gmra.mrb[4].mxu0 %vm338_vm4, %v2752_v28 }
 0x570   : > { %2843 = vmatprep.mubr.f32.mxu0 %v7193_v1 }
 0x573   : > { %6183 = vmatmul.mubr.msk.f32.gmra.mrb[6].mxu0 %vm338_vm4, %v2753_v33 }
 0x574   : > { %2960 = vmatprep.mubr.f32.mxu0 %v7193_v1 }
 0x642   : > { %v2839_v24 = vpop.f32.mrb[4].mxu0 }
 0x643   : > { %v2840_v41 = vadd.f32 %v2839_v24, %v2760_v37  ;;  %v2841_v42 = vpop.f32.mrb[5].mxu0 }
 0x644   : > { %v2842_v43 = vadd.f32 %v2841_v42, %v2760_v37 }
 0x645   : > { %v2850_v44 = vmul.f32 0.5, %v2840_v41 }
 0x646   : > { %v2851_v46 = vmul.f32 0.5, %v2842_v43  ;;  %v2845_v47 = vpop.f32.mrb[6].mxu0 }
 0x647   : > { %7114 = vtanh.f32 %v2850_v44  ;;  %v2846_v48 = vadd.f32 %v2845_v47, %v2765_v45  ;;  %v2847_v49 = vpop.f32.mrb[7].mxu0 }
 0x648   : > { %7116 = vtanh.f32 %v2851_v46  ;;  %v2848_v50 = vadd.f32 %v2847_v49, %v2765_v45 }
 0x649   : > { %v2852_v51 = vmul.f32 0.5, %v2846_v48 }
 0x64a   : > { %v2853_v52 = vmul.f32 0.5, %v2848_v50 }
 0x64b   : > { %7118 = vtanh.f32 %v2852_v51 }
 0x64c   : > { %7120 = vtanh.f32 %v2853_v52 }
 0x651   : > { %v7115_v53 = vpop.eup %7114 }
 0x652   : > { %v7117_v54 = vpop.eup %7116  ;;  %v2858_v55 = vadd.f32 1.0, %v7115_v53  ;;  %v3036_v53 = vld [vmem:[%s8515_s1] ss:$2 sm:$0x3] }
 0x653   : > { %v2859_v56 = vadd.f32 1.0, %v7117_v54  ;;  %v3041_v54 = vrot.slane %v3036_v53, %v7327_v5 }
 0x654   : > { %v2862_v58 = vmul.f32 0.5, %v2858_v55  ;;  %v3045_v55 = vrot.slane %v3036_v53, %v7329_v6 }
 0x655   : > { %v7119_v60 = vpop.eup %7118  ;;  %v2863_v61 = vmul.f32 0.5, %v2859_v56 }
 0x656   : > { %v7121_v62 = vpop.eup %7120  ;;  %v2860_v63 = vadd.f32 1.0, %v7119_v60  ;;  %v2866_v4 = vmul.f32 %v2862_v58, %v2840_v41 }
 0x657   : > { %v2861_v3 = vadd.f32 1.0, %v7121_v62  ;;  %v2867_v8 = vmul.f32 %v2863_v61, %v2842_v43 }
 0x658   : > { %v2864_v7 = vmul.f32 0.5, %v2860_v63  ;;  %v2870_v13 = vadd.f32 %v2866_v4, %v2866_v4 }
 0x659   : > { %v2865_v9 = vmul.f32 0.5, %v2861_v3  ;;  %v2871_v16 = vadd.f32 %v2867_v8, %v2867_v8 }
 0x65a   : > { %v2868_v10 = vmul.f32 %v2864_v7, %v2846_v48  ;;  %v6194_v48 = vld [vmem:[%s8515_s1 + $0x1] ss:$2 sm:$0x3] }
 0x65b   : > { %v2869_v11 = vmul.f32 %v2865_v9, %v2848_v50  ;;  %v3269_v51 = vrot.slane %v6194_v48, %v7327_v5  ;;  %v3273_v52 = vrot.slane %v6194_v48, %v7329_v6 }
 0x65c   : > { %v2872_v14 = vadd.f32 %v2868_v10, %v2868_v10 }
 0x65d   : > { %v2873_v17 = vadd.f32 %v2869_v11, %v2869_v11 }
 0x65e   : > { %v6319_v18 = vpack.c.bf16 %v2872_v14, %v2870_v13 }
 0x65f   : > { %v6317_v22 = vpack.c.bf16 %v2873_v17, %v2871_v16 }
 0x661   : > { %6318 = vmatprep.subr.bf16.mxu0 %v6317_v22 }
 0x662   : > { %6320 = vmatpush1.bf16.msra.mxu0 %v6319_v18 }
 0x665   : > { %6186 = vmatmul.mubr.msk.f32.vlgmr.msra.gmra.mrb[8].mxu0 %vm338_vm4, %v2875_v25 }
 0x666   : > { %2966 = vmatprep.mubr.f32.mxu0 %v7193_v1 }
 0x669   : > { %6187 = vmatmul.mubr.msk.f32.gmra.mrb[10].mxu0 %vm338_vm4, %v2876_v29 }
 0x66a   : > { %4254 = vmatprep.mubr.f32.mxu0 %v7193_v1 }
 0x738   : > { %v2962_v34 = vpop.f32.mrb[8].mxu0 }
 0x739   : > { %v2963_v38 = vadd.f32 %v2962_v34, %v2883_v32  ;;  %v2964_v20 = vpop.f32.mrb[9].mxu0 }
 0x73a   : > { %v2965_v30 = vadd.f32 %v2964_v20, %v2883_v32 }
 0x73b   : > { %v2973_v23 = vmul.f32 0.5, %v2963_v38 }
 0x73c   : > { %v2974_v31 = vmul.f32 0.5, %v2965_v30  ;;  %v2968_v35 = vpop.f32.mrb[10].mxu0 }
 0x73d   : > { %7122 = vtanh.f32 %v2973_v23  ;;  %v2969_v36 = vadd.f32 %v2968_v35, %v2888_v19  ;;  %v2970_v39 = vpop.f32.mrb[11].mxu0 }
 0x73e   : > { %7124 = vtanh.f32 %v2974_v31  ;;  %v2971_v26 = vadd.f32 %v2970_v39, %v2888_v19 }
 0x73f   : > { %v2975_v40 = vmul.f32 0.5, %v2969_v36 }
 0x740   : > { %v2976_v12 = vmul.f32 0.5, %v2971_v26 }
 0x741   : > { %7126 = vtanh.f32 %v2975_v40 }
 0x742   : > { %7128 = vtanh.f32 %v2976_v12  ;;  %v3053_v12 = vld [vmem:[#allocation3 + $0x140] sm:$0xff] }
 0x747   : > { %v7123_v15 = vpop.eup %7122 }
 0x748   : > { %v7125_v21 = vpop.eup %7124  ;;  %v2981_v27 = vadd.f32 1.0, %v7123_v15 }
 0x749   : > { %v2982_v28 = vadd.f32 1.0, %v7125_v21 }
 0x74a   : > { %v2985_v33 = vmul.f32 0.5, %v2981_v27 }
 0x74b   : > { %v7127_v37 = vpop.eup %7126  ;;  %v2986_v24 = vmul.f32 0.5, %v2982_v28 }
 0x74c   : > { %v7129_v41 = vpop.eup %7128  ;;  %v2989_v42 = vmul.f32 %v2985_v33, %v2963_v38  ;;  %v2983_v43 = vadd.f32 1.0, %v7127_v37 }
 0x74d   : > { %v2990_v44 = vmul.f32 %v2986_v24, %v2965_v30  ;;  %v2984_v45 = vadd.f32 1.0, %v7129_v41  ;;  %v3054_v41 = vld [vmem:[#allocation3 + $0x148] sm:$0xff] }
 0x74e   : > { %v2987_v46 = vmul.f32 0.5, %v2983_v43  ;;  %2997 = vrot.lane.b32.xlu1 %v2989_v42, %s7194_s19 }
 0x74f   : > { %v2988_v47 = vmul.f32 0.5, %v2984_v45  ;;  %2999 = vrot.lane.b32.xlu0 %v2990_v44, %s7194_s19 }
 0x750   : > { %v2991_v49 = vmul.f32 %v2987_v46, %v2969_v36 }
 0x751   : > { %v2992_v50 = vmul.f32 %v2988_v47, %v2971_v26 }
 0x752   : > { %3001 = vrot.lane.b32.xlu1 %v2991_v49, %s7194_s19 }
 0x753   : > { %3003 = vrot.lane.b32.xlu0 %v2992_v50, %s7194_s19 }
 0x756   : > { %3274 = vrot.lane.b32.xlu1 %v3269_v51, %s7195_s26 }
 0x757   : > { %3276 = vrot.lane.b32.xlu0 %v3273_v52, %s7195_s26 }
 0x75a   : > { %3404 = vrot.lane.b32.xlu1 %v3041_v54, %s7196_s27 }
 0x75b   : > { %3406 = vrot.lane.b32.xlu0 %v3045_v55, %s7196_s27 }
 0x75e   : > { %3644 = vrot.lane.b32.xlu1 %v3269_v51, %s7197_s28 }
 0x75f   : > { %3646 = vrot.lane.b32.xlu0 %v3273_v52, %s7197_s28 }
 0x762   : > { %3774 = vrot.lane.b32.xlu1 %v3041_v54, %s7198_s29 }
 0x763   : > { %3776 = vrot.lane.b32.xlu0 %v3045_v55, %s7198_s29 }
 0x766   : > { %4014 = vrot.lane.b32.xlu1 %v3269_v51, %s7199_s30 }
 0x767   : > { %4016 = vrot.lane.b32.xlu0 %v3273_v52, %s7199_s30 }
 0x7c0   : > { %v2998_v56 = vpop.permute.xlu1 %2997 }
 0x7c1   : > { %3013 = vst.msk [vmem:[#allocation2] sm:$0xff] %vm297_vm2, %v2998_v56  ;;  %v3000_v58 = vpop.permute.xlu0 %2999 }
 0x7c2   : > { %3015 = vst.msk [vmem:[#allocation2 + $0x10] sm:$0xff] %vm267_vm0, %v3000_v58  ;;  %v7798_v60 = vsel %vm267_vm0, %v2998_v56, %v3000_v58 }
 0x7c3   : > { %v3049_v3 = vmul.f32 %v3045_v55, %v7798_v60 }
 0x7c4   : > { %v3002_v61 = vpop.permute.xlu1 %3001 }
 0x7c5   : > { %3016 = vst.msk [vmem:[#allocation2 + $0x18] sm:$0xff] %vm297_vm2, %v3002_v61  ;;  %v3004_v62 = vpop.permute.xlu0 %3003 }
 0x7c6   : > { %v7802_v63 = vsel %vm267_vm0, %v3002_v61, %v3004_v62  ;;  %3018 = vst.msk [vmem:[#allocation2 + $0x28] sm:$0xff] %vm267_vm0, %v3004_v62 }
 0x7c7   : > { %v3051_v4 = vmul.f32 %v3045_v55, %v7802_v63 }
 0x7c8   : > { %v3275_v7 = vpop.permute.xlu1 %3274  ;;  %v7813_v13 = vld [vmem:[#allocation2] sm:$0xff] }
 0x7c9   : > { %v7807_v8 = vld [vmem:[#allocation2 + $0x10] sm:$0xff]  ;;  %v3277_v9 = vpop.permute.xlu0 %3276  ;;  %v6321_v10 = vpack.c.bf16 %v3051_v4, %v3049_v3  ;;  %v3048_v34 = vmul.f32 %v7813_v13, %v3041_v54  ;;  %v3282_v15 = vmul.f32 %v3275_v7, %v7813_v13 }
 0x7ca   : > { %v7811_v11 = vpack.i.bf16 %v7807_v8, %v7798_v60  ;;  %v3278_v16 = vsel %vm564_vm3, %v3275_v7, %v3277_v9  ;;  %v3284_v29 = vmul.f32 %v3277_v9, %v7807_v8 }
 0x7cb   : > { %6322 = vmatprep.subr.bf16.mxu1 %v6321_v10  ;;  %v3283_v38 = vmul.f32 %v3278_v16, %v7798_v60  ;;  %v3286_v19 = vmul.f32 %v3278_v16, %v7802_v63 }
 0x7cc   : > { %v7815_v14 = vld [vmem:[#allocation2 + $0x18] sm:$0xff]  ;;  %v3405_v17 = vpop.permute.xlu1 %3404  ;;  %6821 = vrot.lane.b32.xlu1 %v7811_v11, %s7200_s7 }
 0x7cd   : > { %v7820_v18 = vld [vmem:[#allocation2 + $0x28] sm:$0xff]  ;;  %v3407_v22 = vpop.permute.xlu0 %3406  ;;  %v7824_v25 = vpack.i.bf16 %v7815_v14, %v7813_v13  ;;  %v3050_v23 = vmul.f32 %v7815_v14, %v3041_v54  ;;  %v3285_v26 = vmul.f32 %v3275_v7, %v7815_v14  ;;  %v6835_v40 = vpack.i.bf16 %v3284_v29, %v3283_v38 }
 0x7ce   : > { %v3287_v32 = vmul.f32 %v3277_v9, %v7820_v18  ;;  %v3408_v20 = vsel %vm338_vm4, %v3405_v17, %v3407_v22  ;;  %v7833_v30 = vpack.i.bf16 %v7820_v18, %v7802_v63  ;;  %v3414_v36 = vmul.f32 %v3407_v22, %v7807_v8 }
 0x7cf   : > { %v6323_v31 = vpack.c.bf16 %v3050_v23, %v3048_v34  ;;  %v3413_v35 = vmul.f32 %v3408_v20, %v7798_v60  ;;  %v3412_v21 = vmul.f32 %v3405_v17, %v7813_v13  ;;  %v3415_v27 = vmul.f32 %v3405_v17, %v7815_v14 }
 0x7d0   : > { %6831 = vrot.lane.b32.xlu1 %v7824_v25, %s7200_s7  ;;  %6826 = vrot.lane.b32.xlu0 %v7833_v30, %s7200_s7  ;;  %v6840_v39 = vpack.i.bf16 %v3287_v32, %v3286_v19  ;;  %v3416_v33 = vmul.f32 %v3408_v20, %v7802_v63  ;;  %v3417_v37 = vmul.f32 %v3407_v22, %v7820_v18  ;;  %v3645_v42 = vpop.permute.xlu1 %3644 }
 0x7d1   : > { %6324 = vmatpush1.bf16.msra.mxu1 %v6323_v31  ;;  %v6850_v28 = vpack.i.bf16 %v3414_v36, %v3413_v35  ;;  %v6845_v24 = vpack.i.bf16 %v3285_v26, %v3282_v15  ;;  %v3647_v43 = vpop.permute.xlu0 %3646  ;;  %v6860_v44 = vpack.i.bf16 %v3415_v27, %v3412_v21  ;;  %v3652_v51 = vmul.f32 %v3645_v42, %v7813_v13 }
 0x7d2   : > { %v3648_v45 = vsel %vm938_vm5, %v3645_v42, %v3647_v43  ;;  %v6855_v46 = vpack.i.bf16 %v3417_v37, %v3416_v33  ;;  %v3654_v48 = vmul.f32 %v3647_v43, %v7807_v8  ;;  %v3655_v52 = vmul.f32 %v3645_v42, %v7815_v14 }
 0x7d3   : > { %v3653_v47 = vmul.f32 %v3648_v45, %v7798_v60  ;;  %v3656_v54 = vmul.f32 %v3648_v45, %v7802_v63  ;;  %v3657_v55 = vmul.f32 %v3647_v43, %v7820_v18 }
 0x7d4   : > { %6841 = vrot.lane.b32.xlu1 %v6840_v39, %s7201_s8  ;;  %6836 = vrot.lane.b32.xlu0 %v6835_v40, %s7201_s8  ;;  %v3775_v49 = vpop.permute.xlu1 %3774  ;;  %v6890_v62 = vpack.i.bf16 %v3655_v52, %v3652_v51 }
 0x7d5   : > { %6190 = vmatmul.mubr.msk.f32.vlgmr.msra.gmra.mrb[12].mxu1 %vm338_vm4, %v3053_v12  ;;  %v3777_v50 = vpop.permute.xlu0 %3776  ;;  %v6880_v53 = vpack.i.bf16 %v3654_v48, %v3653_v47  ;;  %v6885_v7 = vpack.i.bf16 %v3657_v55, %v3656_v54  ;;  %v3782_v10 = vmul.f32 %v3775_v49, %v7813_v13  ;;  %v3785_v16 = vmul.f32 %v3775_v49, %v7815_v14 }
 0x7d6   : > { %3131 = vmatprep.mubr.f32.mxu1 %v7193_v1  ;;  %v3778_v56 = vsel %vm1070_vm6, %v3775_v49, %v3777_v50  ;;  %v3787_v61 = vmul.f32 %v3777_v50, %v7820_v18  ;;  %v3784_v4 = vmul.f32 %v3777_v50, %v7807_v8  ;;  %v3149_v50 = vld [vmem:[#allocation3 + $0x150] sm:$0xff] }
 0x7d7   : > { %v3786_v58 = vmul.f32 %v3778_v56, %v7802_v63  ;;  %v3783_v3 = vmul.f32 %v3778_v56, %v7798_v60  ;;  %v6905_v34 = vpack.i.bf16 %v3785_v16, %v3782_v10 }
 0x7d8   : > { %6851 = vrot.lane.b32.xlu1 %v6850_v28, %s7202_s9  ;;  %6846 = vrot.lane.b32.xlu0 %v6845_v24, %s7201_s8  ;;  %v4015_v22 = vpop.permute.xlu1 %4014 }
 0x7d9   : > { %6191 = vmatmul.mubr.msk.f32.gmra.mrb[14].mxu1 %vm338_vm4, %v3054_v41  ;;  %v6900_v9 = vpack.i.bf16 %v3787_v61, %v3786_v58  ;;  %v6895_v17 = vpack.i.bf16 %v3784_v4, %v3783_v3  ;;  %v4017_v29 = vpop.permute.xlu0 %4016  ;;  %v4022_v35 = vmul.f32 %v4015_v22, %v7813_v13  ;;  %v6189_v13 = vld [vmem:[%s8517_s3 + $0x48] sm:$0xff] }
 0x7da   : > { %3247 = vmatprep.mubr.f32.mxu1 %v7193_v1  ;;  %v4018_v32 = vsel %vm1313_vm7, %v4015_v22, %v4017_v29  ;;  %v4027_v20 = vmul.f32 %v4017_v29, %v7820_v18  ;;  %v4024_v19 = vmul.f32 %v4017_v29, %v7807_v8  ;;  %v6209_v8 = vld [vmem:[%s8517_s3 + $0x70] sm:$0xff]  ;;  %v3150_v4 = vld [vmem:[#allocation3 + $0x158] sm:$0xff] }
 0x7db   : > { %v4026_v38 = vmul.f32 %v4018_v32, %v7802_v63  ;;  %v4023_v23 = vmul.f32 %v4018_v32, %v7798_v60  ;;  %v6188_v60 = vld [vmem:[%s8517_s3 + $0x40] sm:$0xff] }
 0x7dc   : > { %6861 = vrot.lane.b32.xlu1 %v6860_v44, %s7202_s9  ;;  %6856 = vrot.lane.b32.xlu0 %v6855_v46, %s7202_s9 }
 0x7dd   : > { %v6930_v31 = vpack.i.bf16 %v4027_v20, %v4026_v38  ;;  %v6925_v36 = vpack.i.bf16 %v4024_v19, %v4023_v23  ;;  %v3289_v38 = vld [vmem:[#allocation3 + $0x160] sm:$0xff] }
 0x7e0   : > { %6871 = vrot.lane.b32.xlu1 %v7833_v30, %s7203_s10  ;;  %6866 = vrot.lane.b32.xlu0 %v7811_v11, %s7203_s10 }
 0x7e4   : > { %6881 = vrot.lane.b32.xlu1 %v6880_v53, %s7204_s11  ;;  %6876 = vrot.lane.b32.xlu0 %v7824_v25, %s7203_s10 }
 0x7e8   : > { %6891 = vrot.lane.b32.xlu1 %v6890_v62, %s7204_s11  ;;  %6886 = vrot.lane.b32.xlu0 %v6885_v7, %s7204_s11 }
 0x7ec   : > { %6901 = vrot.lane.b32.xlu1 %v6900_v9, %s7205_s12  ;;  %6896 = vrot.lane.b32.xlu0 %v6895_v17, %s7205_s12 }
 0x7f0   : > { %6911 = vrot.lane.b32.xlu1 %v7811_v11, %s8533_s15  ;;  %6906 = vrot.lane.b32.xlu0 %v6905_v34, %s7205_s12  ;;  %v4025_v11 = vmul.f32 %v4015_v22, %v7815_v14  ;;  %v6210_v14 = vld [vmem:[%s8517_s3 + $0x78] sm:$0xff] }
 0x7f2   : > { %v6935_v63 = vpack.i.bf16 %v4025_v11, %v4022_v35 }
 0x7f4   : > { %6921 = vrot.lane.b32.xlu1 %v7824_v25, %s8533_s15  ;;  %6916 = vrot.lane.b32.xlu0 %v7833_v30, %s8533_s15 }
 0x7f8   : > { %6931 = vrot.lane.b32.xlu1 %v6930_v31, %s8534_s16  ;;  %6926 = vrot.lane.b32.xlu0 %v6925_v36, %s8534_s16 }
 0x7fc   : > { %3024 = vperm.xlu1 %6699, %v6188_v60   ;;  %6936 = vrot.lane.b32.xlu0 %v6935_v63, %s8534_s16 }
 0x800   : > { %4176 = vperm.xlu1 %6699, %v6209_v8   ;;  %3029 = vperm.xlu0 %6698, %v6189_v13  }
 0x804   : > { %4181 = vperm.xlu0 %6698, %v6210_v14   ;;  %v3290_v14 = vld [vmem:[#allocation3 + $0x168] sm:$0xff] }
 0x83e   : > { %v6822_v18 = vpop.permute.xlu1 %6821 }
 0x83f   : > { %v6824_v25 = vunpack.i.h.bf16 %v6822_v18  ;;  %v6823_v30 = vunpack.i.l.bf16 %v6822_v18 }
 0x841   : > { %v3170_v37 = vsel %vm453_vm8, %v6823_v30, %v6824_v25 }
 0x842   : > { %v6832_v39 = vpop.permute.xlu1 %6831  ;;  %v6827_v26 = vpop.permute.xlu0 %6826 }
 0x843   : > { %v6834_v40 = vunpack.i.h.bf16 %v6832_v39  ;;  %v6833_v12 = vunpack.i.l.bf16 %v6832_v39  ;;  %v6829_v15 = vunpack.i.h.bf16 %v6827_v26  ;;  %v6828_v21 = vunpack.i.l.bf16 %v6827_v26 }
 0x845   : > { %v3169_v27 = vsel %vm453_vm8, %v6833_v12, %v6823_v30  ;;  %v3171_v28 = vsel %vm453_vm8, %v6834_v40, %v6828_v21  ;;  %v3172_v24 = vsel %vm453_vm8, %v6828_v21, %v6829_v15 }
 0x846   : > { %v6842_v33 = vpop.permute.xlu1 %6841  ;;  %v6837_v41 = vpop.permute.xlu0 %6836  ;;  %v6325_v44 = vpack.c.bf16 %v3172_v24, %v3170_v37  ;;  %v6327_v45 = vpack.c.bf16 %v3171_v28, %v3169_v27  ;;  %v3419_v28 = vld [vmem:[#allocation3 + $0x170] sm:$0xff] }
 0x847   : > { %v6844_v42 = vunpack.i.h.bf16 %v6842_v33  ;;  %v6843_v43 = vunpack.i.l.bf16 %v6842_v33  ;;  %v6839_v46 = vunpack.i.h.bf16 %v6837_v41  ;;  %v6838_v47 = vunpack.i.l.bf16 %v6837_v41 }
 0x848   : > { %6326 = vmatprep.subr.bf16.mxu1 %v6325_v44 }
 0x849   : > { %v3312_v48 = vsel %vm596_vm9, %v6843_v43, %v6844_v42  ;;  %6328 = vmatpush1.bf16.msra.mxu1 %v6327_v45  ;;  %v3310_v51 = vsel %vm596_vm9, %v6838_v47, %v6839_v46  ;;  %v3420_v45 = vld [vmem:[#allocation3 + $0x178] sm:$0xff] }
 0x84a   : > { %v6852_v49 = vpop.permute.xlu1 %6851  ;;  %v6847_v52 = vpop.permute.xlu0 %6846  ;;  %v6329_v53 = vpack.c.bf16 %v3312_v48, %v3310_v51 }
 0x84b   : > { %v6849_v54 = vunpack.i.h.bf16 %v6847_v52  ;;  %v6848_v55 = vunpack.i.l.bf16 %v6847_v52  ;;  %v6854_v61 = vunpack.i.h.bf16 %v6852_v49  ;;  %v6853_v62 = vunpack.i.l.bf16 %v6852_v49 }
 0x84c   : > { %6192 = vmatmul.mubr.msk.f32.vlgmr.msra.gmra.mrb[12].mxu1 %vm338_vm4, %v3149_v50  ;;  %6330 = vmatprep.subr.bf16.mxu1 %v6329_v53 }
 0x84d   : > { %v3309_v56 = vsel %vm596_vm9, %v6848_v55, %v6838_v47  ;;  %v3311_v58 = vsel %vm596_vm9, %v6849_v54, %v6843_v43  ;;  %3253 = vmatprep.mubr.f32.mxu1 %v7193_v1  ;;  %v3440_v20 = vsel %vm727_vm10, %v6853_v62, %v6854_v61  ;;  %v3535_v61 = vld [vmem:[#allocation3 + $0x180] sm:$0xff] }
 0x84e   : > { %v6862_v3 = vpop.permute.xlu1 %6861  ;;  %v6857_v7 = vpop.permute.xlu0 %6856  ;;  %v6331_v16 = vpack.c.bf16 %v3311_v58, %v3309_v56 }
 0x84f   : > { %v6864_v9 = vunpack.i.h.bf16 %v6862_v3  ;;  %v6863_v10 = vunpack.i.l.bf16 %v6862_v3  ;;  %v6859_v17 = vunpack.i.h.bf16 %v6857_v7  ;;  %v6858_v22 = vunpack.i.l.bf16 %v6857_v7 }
 0x850   : > { %6193 = vmatmul.mubr.msk.f32.gmra.mrb[14].mxu1 %vm338_vm4, %v3150_v4 }
 0x851   : > { %v3439_v29 = vsel %vm727_vm10, %v6863_v10, %v6853_v62  ;;  %v3441_v32 = vsel %vm727_vm10, %v6864_v9, %v6858_v22  ;;  %6332 = vmatpush1.bf16.msra.mxu1 %v6331_v16  ;;  %3387 = vmatprep.mubr.f32.mxu1 %v7193_v1  ;;  %v3442_v23 = vsel %vm727_vm10, %v6858_v22, %v6859_v17 }
 0x852   : > { %v6872_v34 = vpop.permute.xlu1 %6871  ;;  %v6867_v19 = vpop.permute.xlu0 %6866  ;;  %v6333_v11 = vpack.c.bf16 %v3442_v23, %v3440_v20  ;;  %v6335_v36 = vpack.c.bf16 %v3441_v32, %v3439_v29  ;;  %v3536_v29 = vld [vmem:[#allocation3 + $0x188] sm:$0xff] }
 0x853   : > { %v6874_v31 = vunpack.i.h.bf16 %v6872_v34  ;;  %v6873_v35 = vunpack.i.l.bf16 %v6872_v34  ;;  %v6869_v60 = vunpack.i.h.bf16 %v6867_v19  ;;  %v6868_v63 = vunpack.i.l.bf16 %v6867_v19  ;;  %v3659_v19 = vld [vmem:[#allocation3 + $0x190] sm:$0xff] }
 0x854   : > { %6195 = vmatmul.mubr.msk.f32.vlgmr.msra.gmra.mrb[12].mxu1 %vm338_vm4, %v3289_v38  ;;  %6334 = vmatprep.subr.bf16.mxu1 %v6333_v11 }
 0x855   : > { %v3552_v8 = vsel %vm838_vm11, %v6873_v35, %v6874_v31  ;;  %6336 = vmatpush1.bf16.msra.mxu1 %v6335_v36  ;;  %3393 = vmatprep.mubr.f32.mxu1 %v7193_v1  ;;  %v3550_v18 = vsel %vm838_vm11, %v6868_v63, %v6869_v60 }
 0x856   : > { %v6882_v13 = vpop.permute.xlu1 %6881  ;;  %v6877_v25 = vpop.permute.xlu0 %6876  ;;  %v6337_v30 = vpack.c.bf16 %v3552_v8, %v3550_v18 }
 0x857   : > { %v6879_v39 = vunpack.i.h.bf16 %v6877_v25  ;;  %v6878_v26 = vunpack.i.l.bf16 %v6877_v25  ;;  %v6884_v15 = vunpack.i.h.bf16 %v6882_v13  ;;  %v6883_v21 = vunpack.i.l.bf16 %v6882_v13 }
 0x858   : > { %6196 = vmatmul.mubr.msk.f32.gmra.mrb[14].mxu1 %vm338_vm4, %v3290_v14  ;;  %6338 = vmatprep.subr.bf16.mxu1 %v6337_v30 }
 0x859   : > { %v3549_v40 = vsel %vm838_vm11, %v6878_v26, %v6868_v63  ;;  %v3551_v12 = vsel %vm838_vm11, %v6879_v39, %v6873_v35  ;;  %3517 = vmatprep.mubr.f32.mxu1 %v7193_v1  ;;  %v3680_v46 = vsel %vm970_vm12, %v6883_v21, %v6884_v15  ;;  %v3660_v39 = vld [vmem:[#allocation3 + $0x198] sm:$0xff]  ;;  %v3789_v15 = vld [vmem:[#allocation3 + $0x1a0] sm:$0xff] }
 0x85a   : > { %v6892_v27 = vpop.permute.xlu1 %6891  ;;  %v6887_v33 = vpop.permute.xlu0 %6886  ;;  %v6339_v37 = vpack.c.bf16 %v3551_v12, %v3549_v40 }
 0x85b   : > { %v6889_v24 = vunpack.i.h.bf16 %v6887_v33  ;;  %v6888_v41 = vunpack.i.l.bf16 %v6887_v33  ;;  %v6894_v42 = vunpack.i.h.bf16 %v6892_v27  ;;  %v6893_v43 = vunpack.i.l.bf16 %v6892_v27 }
 0x85c   : > { %6197 = vmatmul.mubr.msk.f32.vlgmr.msra.gmra.mrb[12].mxu1 %vm338_vm4, %v3419_v28 }
 0x85d   : > { %6340 = vmatpush1.bf16.msra.mxu1 %v6339_v37  ;;  %3523 = vmatprep.mubr.f32.mxu1 %v7193_v1  ;;  %v3682_v47 = vsel %vm970_vm12, %v6888_v41, %v6889_v24  ;;  %v3681_v54 = vsel %vm970_vm12, %v6894_v42, %v6888_v41  ;;  %v3679_v55 = vsel %vm970_vm12, %v6893_v43, %v6883_v21  ;;  %v3790_v41 = vld [vmem:[#allocation3 + $0x1a8] sm:$0xff] }
 0x85e   : > { %v6902_v44 = vpop.permute.xlu1 %6901  ;;  %v6897_v48 = vpop.permute.xlu0 %6896  ;;  %v6341_v51 = vpack.c.bf16 %v3682_v47, %v3680_v46  ;;  %v6343_v7 = vpack.c.bf16 %v3681_v54, %v3679_v55  ;;  %v3906_v46 = vld [vmem:[#allocation3 + $0x1b8] sm:$0xff]  ;;  %v4029_v47 = vld [vmem:[#allocation3 + $0x1c0] sm:$0xff] }
 0x85f   : > { %v6904_v49 = vunpack.i.h.bf16 %v6902_v44  ;;  %v6903_v50 = vunpack.i.l.bf16 %v6902_v44  ;;  %v6899_v52 = vunpack.i.h.bf16 %v6897_v48  ;;  %v6898_v53 = vunpack.i.l.bf16 %v6897_v48  ;;  %v3905_v44 = vld [vmem:[#allocation3 + $0x1b0] sm:$0xff]  ;;  %v4030_v48 = vld [vmem:[#allocation3 + $0x1c8] sm:$0xff] }
 0x860   : > { %6198 = vmatmul.mubr.msk.f32.gmra.mrb[14].mxu1 %vm338_vm4, %v3420_v45  ;;  %6342 = vmatprep.subr.bf16.mxu1 %v6341_v51 }
 0x861   : > { %v3812_v56 = vsel %vm1102_vm13, %v6903_v50, %v6904_v49  ;;  %3627 = vmatprep.mubr.f32.mxu1 %v7193_v1  ;;  %v3810_v62 = vsel %vm1102_vm13, %v6898_v53, %v6899_v52 }
 0x862   : > { %v6912_v58 = vpop.permute.xlu1 %6911  ;;  %v6907_v3 = vpop.permute.xlu0 %6906  ;;  %v6345_v4 = vpack.c.bf16 %v3812_v56, %v3810_v62 }
 0x863   : > { %v6909_v9 = vunpack.i.h.bf16 %v6907_v3  ;;  %v6908_v10 = vunpack.i.l.bf16 %v6907_v3  ;;  %v6914_v16 = vunpack.i.h.bf16 %v6912_v58  ;;  %v6913_v17 = vunpack.i.l.bf16 %v6912_v58 }
 0x864   : > { %6199 = vmatmul.mubr.msk.f32.vlgmr.msra.gmra.mrb[12].mxu1 %vm338_vm4, %v3535_v61 }
 0x865   : > { %6344 = vmatpush1.bf16.msra.mxu1 %v6343_v7  ;;  %3633 = vmatprep.mubr.f32.mxu1 %v7193_v1  ;;  %v3809_v20 = vsel %vm1102_vm13, %v6908_v10, %v6898_v53  ;;  %v3811_v23 = vsel %vm1102_vm13, %v6909_v9, %v6903_v50  ;;  %v3920_v31 = vsel %vm1213_vm14, %v6913_v17, %v6914_v16 }
 0x866   : > { %v6922_v22 = vpop.permute.xlu1 %6921  ;;  %6346 = vmatprep.subr.bf16.mxu1 %v6345_v4  ;;  %v6917_v32 = vpop.permute.xlu0 %6916  ;;  %v6347_v63 = vpack.c.bf16 %v3811_v23, %v3809_v20 }
 0x867   : > { %v6919_v34 = vunpack.i.h.bf16 %v6917_v32  ;;  %v6918_v38 = vunpack.i.l.bf16 %v6917_v32  ;;  %v6924_v8 = vunpack.i.h.bf16 %v6922_v22  ;;  %v6923_v13 = vunpack.i.l.bf16 %v6922_v22 }
 0x868   : > { %6200 = vmatmul.mubr.msk.f32.gmra.mrb[14].mxu1 %vm338_vm4, %v3536_v29 }
 0x869   : > { %3757 = vmatprep.mubr.f32.mxu1 %v7193_v1  ;;  %v3922_v35 = vsel %vm1213_vm14, %v6918_v38, %v6919_v34  ;;  %v3921_v26 = vsel %vm1213_vm14, %v6924_v8, %v6918_v38  ;;  %v3919_v40 = vsel %vm1213_vm14, %v6923_v13, %v6913_v17 }
 0x86a   : > { %v6927_v11 = vpop.permute.xlu0 %6926  ;;  %v6932_v36 = vpop.permute.xlu1 %6931  ;;  %v6349_v60 = vpack.c.bf16 %v3922_v35, %v3920_v31  ;;  %v6351_v28 = vpack.c.bf16 %v3921_v26, %v3919_v40 }
 0x86b   : > { %v6929_v14 = vunpack.i.h.bf16 %v6927_v11  ;;  %v6928_v18 = vunpack.i.l.bf16 %v6927_v11  ;;  %v6934_v25 = vunpack.i.h.bf16 %v6932_v36  ;;  %v6933_v30 = vunpack.i.l.bf16 %v6932_v36 }
 0x86c   : > { %6201 = vmatmul.mubr.msk.f32.vlgmr.msra.gmra.mrb[12].mxu1 %vm338_vm4, %v3659_v19 }
 0x86d   : > { %6348 = vmatpush1.bf16.msra.mxu1 %v6347_v63  ;;  %3763 = vmatprep.mubr.f32.mxu1 %v7193_v1  ;;  %v4050_v21 = vsel %vm1345_vm15, %v6928_v18, %v6929_v14  ;;  %v4052_v27 = vsel %vm1345_vm15, %v6933_v30, %v6934_v25  ;;  %v4169_v25 = vld [vmem:[#allocation3 + $0x270] sm:$0xff] }
 0x86e   : > { %6350 = vmatprep.subr.bf16.mxu1 %v6349_v60  ;;  %v6937_v12 = vpop.permute.xlu0 %6936  ;;  %v6353_v24 = vpack.c.bf16 %v4052_v27, %v4050_v21 }
 0x86f   : > { %v6939_v33 = vunpack.i.h.bf16 %v6937_v12  ;;  %v6938_v37 = vunpack.i.l.bf16 %v6937_v12 }
 0x870   : > { %6202 = vmatmul.mubr.msk.f32.gmra.mrb[14].mxu1 %vm338_vm4, %v3660_v39 }
 0x871   : > { %3887 = vmatprep.mubr.f32.mxu1 %v7193_v1  ;;  %v4049_v42 = vsel %vm1345_vm15, %v6938_v37, %v6928_v18  ;;  %v4051_v43 = vsel %vm1345_vm15, %v6939_v33, %v6933_v30  ;;  %v4170_v30 = vld [vmem:[#allocation3 + $0x278] sm:$0xff] }
 0x872   : > { %v6355_v45 = vpack.c.bf16 %v4051_v43, %v4049_v42 }
 0x874   : > { %6203 = vmatmul.mubr.msk.f32.vlgmr.msra.gmra.mrb[12].mxu1 %vm338_vm4, %v3789_v15 }
 0x875   : > { %6352 = vmatpush1.bf16.msra.mxu1 %v6351_v28  ;;  %3893 = vmatprep.mubr.f32.mxu1 %v7193_v1 }
 0x876   : > { %6354 = vmatprep.subr.bf16.mxu1 %v6353_v24 }
 0x878   : > { %6204 = vmatmul.mubr.msk.f32.gmra.mrb[14].mxu1 %vm338_vm4, %v3790_v41 }
 0x879   : > { %3997 = vmatprep.mubr.f32.mxu1 %v7193_v1 }
 0x87b   : > { %v3025_v49 = vpop.permute.xlu1 %3024 }
 0x87c   : > { %6205 = vmatmul.mubr.msk.f32.vlgmr.msra.gmra.mrb[12].mxu1 %vm338_vm4, %v3905_v44 }
 0x87d   : > { %6356 = vmatpush1.bf16.msra.mxu1 %v6355_v45  ;;  %4003 = vmatprep.mubr.f32.mxu1 %v7193_v1 }
 0x87f   : > { %v3030_v55 = vpop.permute.xlu0 %3029 }
 0x880   : > { %6206 = vmatmul.mubr.msk.f32.gmra.mrb[14].mxu1 %vm338_vm4, %v3906_v46 }
 0x881   : > { %4127 = vmatprep.mubr.f32.mxu1 %v7193_v1 }
 0x883   : > { %v4182_v40 = vpop.permute.xlu0 %4181 }
 0x884   : > { %6207 = vmatmul.mubr.msk.f32.vlgmr.msra.gmra.mrb[12].mxu1 %vm338_vm4, %v4029_v47 }
 0x885   : > { %4133 = vmatprep.mubr.f32.mxu1 %v7193_v1 }
 0x888   : > { %6208 = vmatmul.mubr.msk.f32.gmra.mrb[14].mxu1 %vm338_vm4, %v4030_v48 }
 0x957   : > { %v4129_v50 = vpop.f32.mrb[12].mxu1 }
 0x958   : > { %v6409_v51 = vadd.f32 %v4129_v50, %v3025_v49  ;;  %v4131_v52 = vpop.f32.mrb[13].mxu1 }
 0x959   : > { %v6410_v53 = vadd.f32 %v4131_v52, %v3025_v49 }
 0x95a   : > { %v4144_v54 = vmul.f32 0.5, %v6409_v51 }
 0x95b   : > { %v4145_v56 = vmul.f32 0.5, %v6410_v53  ;;  %v4135_v58 = vpop.f32.mrb[14].mxu1 }
 0x95c   : > { %7130 = vtanh.f32 %v4144_v54  ;;  %v6411_v61 = vadd.f32 %v4135_v58, %v3030_v55  ;;  %v4137_v62 = vpop.f32.mrb[15].mxu1  ;;  %v6213_v58 = vld [vmem:[%s8517_s3 + $0x60] sm:$0xff] }
 0x95d   : > { %7132 = vtanh.f32 %v4145_v56  ;;  %v6412_v3 = vadd.f32 %v4137_v62, %v3030_v55  ;;  %v6218_v55 = vld [vmem:[%s8515_s1 + $0x1] ss:$2 sm:$0x3]  ;;  %v4324_v62 = vld [vmem:[%s8515_s1] ss:$2 sm:$0x3] }
 0x95e   : > { %v4146_v4 = vmul.f32 0.5, %v6411_v61 }
 0x95f   : > { %v4147_v7 = vmul.f32 0.5, %v6412_v3 }
 0x960   : > { %7134 = vtanh.f32 %v4146_v4  ;;  %v4329_v4 = vrot.slane %v4324_v62, %v7327_v5 }
 0x961   : > { %7136 = vtanh.f32 %v4147_v7  ;;  %v4333_v7 = vrot.slane %v4324_v62, %v7329_v6 }
 0x966   : > { %v7131_v9 = vpop.eup %7130 }
 0x967   : > { %v7133_v10 = vpop.eup %7132  ;;  %v4152_v16 = vadd.f32 1.0, %v7131_v9 }
 0x968   : > { %v4153_v17 = vadd.f32 1.0, %v7133_v10 }
 0x969   : > { %v4156_v22 = vmul.f32 0.5, %v4152_v16 }
 0x96a   : > { %v7135_v29 = vpop.eup %7134  ;;  %v4157_v32 = vmul.f32 0.5, %v4153_v17 }
 0x96b   : > { %v7137_v34 = vpop.eup %7136  ;;  %v4154_v38 = vadd.f32 1.0, %v7135_v29  ;;  %v4160_v23 = vmul.f32 %v6409_v51, %v4156_v22 }
 0x96c   : > { %v4155_v20 = vadd.f32 1.0, %v7137_v34  ;;  %v4161_v31 = vmul.f32 %v6410_v53, %v4157_v32 }
 0x96d   : > { %v4158_v19 = vmul.f32 0.5, %v4154_v38  ;;  %v4164_v60 = vadd.f32 %v4160_v23, %v7539_v57  ;;  %v4177_v57 = vpop.permute.xlu1 %4176 }
 0x96e   : > { %v4159_v35 = vmul.f32 0.5, %v4155_v20  ;;  %v4165_v8 = vadd.f32 %v4161_v31, %v7541_v59 }
 0x96f   : > { %v4162_v11 = vmul.f32 %v6411_v61, %v4158_v19  ;;  %v7995_v61 = vrot.slane %v6218_v55, %v7329_v6 }
 0x970   : > { %v4163_v36 = vmul.f32 %v6412_v3, %v4159_v35  ;;  %v8001_v3 = vrot.slane %v6218_v55, %v7327_v5 }
 0x971   : > { %v4166_v63 = vadd.f32 %v4162_v11, %v7550_v0 }
 0x972   : > { %v4167_v13 = vadd.f32 %v4163_v36, %v7552_v2 }
 0x973   : > { %v6359_v14 = vpack.c.bf16 %v4166_v63, %v4164_v60 }
 0x974   : > { %v6357_v18 = vpack.c.bf16 %v4167_v13, %v4165_v8 }
 0x976   : > { %6358 = vmatprep.subr.bf16.mxu0 %v6357_v18 }
 0x977   : > { %6360 = vmatpush1.bf16.msra.mxu0 %v6359_v14 }
 0x97a   : > { %6211 = vmatmul.mubr.msk.f32.vlgmr.msra.gmra.mrb[12].mxu0 %vm338_vm4, %v4169_v25 }
 0x97b   : > { %4260 = vmatprep.mubr.f32.mxu0 %v7193_v1 }
 0x97e   : > { %6212 = vmatmul.mubr.msk.f32.gmra.mrb[14].mxu0 %vm338_vm4, %v4170_v30  ;;  %v4341_v30 = vld [vmem:[#allocation3 + $0x1e0] sm:$0xff] }
 0x97f   : > { %4413 = vmatprep.mubr.f32.mxu0 %v7193_v1 }
 0xa4d   : > { %v4256_v0 = vpop.f32.mrb[12].mxu0 }
 0xa4e   : > { %v4257_v39 = vadd.f32 %v4256_v0, %v4177_v57  ;;  %v4258_v59 = vpop.f32.mrb[13].mxu0 }
 0xa4f   : > { %v4259_v26 = vadd.f32 %v4258_v59, %v4177_v57 }
 0xa50   : > { %v4267_v2 = vmul.f32 0.5, %v4257_v39 }
 0xa51   : > { %v4268_v12 = vmul.f32 0.5, %v4259_v26  ;;  %v4262_v15 = vpop.f32.mrb[14].mxu0 }
 0xa52   : > { %7138 = vtanh.f32 %v4267_v2  ;;  %v4263_v21 = vadd.f32 %v4262_v15, %v4182_v40  ;;  %v4264_v27 = vpop.f32.mrb[15].mxu0 }
 0xa53   : > { %7140 = vtanh.f32 %v4268_v12  ;;  %v4265_v28 = vadd.f32 %v4264_v27, %v4182_v40 }
 0xa54   : > { %v4269_v33 = vmul.f32 0.5, %v4263_v21 }
 0xa55   : > { %v4270_v37 = vmul.f32 0.5, %v4265_v28 }
 0xa56   : > { %7142 = vtanh.f32 %v4269_v33 }
 0xa57   : > { %7144 = vtanh.f32 %v4270_v37 }
 0xa5c   : > { %v7139_v24 = vpop.eup %7138 }
 0xa5d   : > { %v7141_v41 = vpop.eup %7140  ;;  %v4275_v42 = vadd.f32 1.0, %v7139_v24 }
 0xa5e   : > { %v4276_v43 = vadd.f32 1.0, %v7141_v41 }
 0xa5f   : > { %v4279_v44 = vmul.f32 0.5, %v4275_v42 }
 0xa60   : > { %v7143_v45 = vpop.eup %7142  ;;  %v4280_v46 = vmul.f32 0.5, %v4276_v43 }
 0xa61   : > { %v7145_v47 = vpop.eup %7144  ;;  %v4283_v48 = vmul.f32 %v4279_v44, %v4257_v39  ;;  %v4277_v49 = vadd.f32 1.0, %v7143_v45 }
 0xa62   : > { %v4284_v50 = vmul.f32 %v4280_v46, %v4259_v26  ;;  %v4278_v51 = vadd.f32 1.0, %v7145_v47 }
 0xa63   : > { %v4281_v52 = vmul.f32 0.5, %v4277_v49  ;;  %4291 = vrot.lane.b32.xlu1 %v4283_v48, %s7194_s19 }
 0xa64   : > { %v4282_v53 = vmul.f32 0.5, %v4278_v51  ;;  %4293 = vrot.lane.b32.xlu0 %v4284_v50, %s7194_s19 }
 0xa65   : > { %v4285_v54 = vmul.f32 %v4281_v52, %v4263_v21  ;;  %v4342_v21 = vld [vmem:[#allocation3 + $0x1e8] sm:$0xff] }
 0xa66   : > { %v4286_v56 = vmul.f32 %v4282_v53, %v4265_v28 }
 0xa67   : > { %4295 = vrot.lane.b32.xlu1 %v4285_v54, %s7194_s19 }
 0xa68   : > { %4297 = vrot.lane.b32.xlu0 %v4286_v56, %s7194_s19  ;;  %s7226_s19 = smov 48  }
 0xa6b   : > { %4317 = vperm.xlu1 %6699, %v6213_v58  }
 0xa6c   : > { %4556 = vrot.lane.b32.xlu0 %v7995_v61, %s7195_s26 }
 0xa6f   : > { %4554 = vrot.lane.b32.xlu1 %v8001_v3, %s7195_s26 }
 0xa70   : > { %4680 = vrot.lane.b32.xlu0 %v4329_v4, %s7196_s27 }
 0xa73   : > { %4682 = vrot.lane.b32.xlu1 %v4333_v7, %s7196_s27 }
 0xa74   : > { %4914 = vrot.lane.b32.xlu0 %v7995_v61, %s7197_s28 }
 0xa77   : > { %4912 = vrot.lane.b32.xlu1 %v8001_v3, %s7197_s28 }
 0xa78   : > { %5038 = vrot.lane.b32.xlu0 %v4329_v4, %s7198_s29 }
 0xa7b   : > { %5040 = vrot.lane.b32.xlu1 %v4333_v7, %s7198_s29 }
 0xad5   : > { %v4292_v9 = vpop.permute.xlu1 %4291 }
 0xad6   : > { %4307 = vst.msk [vmem:[#allocation2] sm:$0xff] %vm297_vm2, %v4292_v9  ;;  %v4294_v10 = vpop.permute.xlu0 %4293 }
 0xad7   : > { %v8019_v6 = vsel %vm267_vm0, %v4292_v9, %v4294_v10  ;;  %4309 = vst.msk [vmem:[#allocation2 + $0x10] sm:$0xff] %vm267_vm0, %v4294_v10 }
 0xad8   : > { %v4337_v29 = vmul.f32 %v4333_v7, %v8019_v6 }
 0xad9   : > { %v4296_v16 = vpop.permute.xlu1 %4295 }
 0xada   : > { %4310 = vst.msk [vmem:[#allocation2 + $0x18] sm:$0xff] %vm297_vm2, %v4296_v16  ;;  %v4298_v17 = vpop.permute.xlu0 %4297 }
 0xadb   : > { %v8024_v22 = vsel %vm267_vm0, %v4296_v16, %v4298_v17  ;;  %4312 = vst.msk [vmem:[#allocation2 + $0x28] sm:$0xff] %vm267_vm0, %v4298_v17 }
 0xadc   : > { %v4339_v32 = vmul.f32 %v4333_v7, %v8024_v22 }
 0xadd   : > { %v8029_v34 = vld [vmem:[#allocation2] sm:$0xff] }
 0xade   : > { %v8033_v38 = vpack.i.bf16 %v8019_v6, %v8029_v34  ;;  %v6361_v20 = vpack.c.bf16 %v4339_v32, %v4337_v29  ;;  %v8037_v23 = vld [vmem:[#allocation2 + $0x10] sm:$0xff]  ;;  %v4336_v35 = vmul.f32 %v8029_v34, %v4329_v4  ;;  %v4557_v60 = vpop.permute.xlu0 %4556 }
 0xadf   : > { %v4564_v42 = vmul.f32 %v4557_v60, %v8037_v23 }
 0xae0   : > { %6941 = vrot.lane.b32.xlu0 %v8033_v38, %s7200_s7  ;;  %6362 = vmatprep.subr.bf16.mxu0 %v6361_v20 }
 0xae1   : > { %v8039_v19 = vld [vmem:[#allocation2 + $0x18] sm:$0xff] }
 0xae2   : > { %v8043_v31 = vpack.i.bf16 %v8039_v19, %v8037_v23  ;;  %v4338_v11 = vmul.f32 %v8039_v19, %v4329_v4  ;;  %v4681_v18 = vpop.permute.xlu0 %4680  ;;  %v8062_v12 = vld [vmem:[#allocation2 + $0x28] sm:$0xff] }
 0xae3   : > { %v4691_v39 = vmul.f32 %v4681_v18, %v8039_v19  ;;  %v4688_v2 = vmul.f32 %v4681_v18, %v8029_v34  ;;  %v4567_v33 = vmul.f32 %v4557_v60, %v8062_v12  ;;  %v6960_v41 = vpack.i.bf16 %v8062_v12, %v8024_v22 }
 0xae4   : > { %6946 = vrot.lane.b32.xlu1 %v8043_v31, %s7200_s7  ;;  %v6363_v36 = vpack.c.bf16 %v4338_v11, %v4336_v35 }
 0xae6   : > { %6364 = vmatpush1.bf16.msra.mxu0 %v6363_v36  ;;  %v4915_v47 = vpop.permute.xlu0 %4914 }
 0xae7   : > { %v4922_v54 = vmul.f32 %v4915_v47, %v8037_v23  ;;  %v4925_v16 = vmul.f32 %v4915_v47, %v8062_v12 }
 0xae9   : > { %6214 = vmatmul.mubr.msk.f32.vlgmr.msra.gmra.mrb[16].mxu0 %vm338_vm4, %v4341_v30 }
 0xaea   : > { %v8049_v63 = vpop.permute.xlu1 %4317  ;;  %4419 = vmatprep.mubr.f32.mxu0 %v7193_v1  ;;  %v5039_v50 = vpop.permute.xlu0 %5038 }
 0xaeb   : > { %v5049_v20 = vmul.f32 %v5039_v50, %v8039_v19 }
 0xaed   : > { %6215 = vmatmul.mubr.msk.f32.gmra.mrb[18].mxu0 %vm338_vm4, %v4342_v21 }
 0xaee   : > { %v4555_v8 = vpop.permute.xlu1 %4554  ;;  %4531 = vmatprep.mubr.f32.mxu0 %v7193_v1 }
 0xaef   : > { %v4558_v13 = vsel %vm564_vm3, %v4555_v8, %v4557_v60  ;;  %v4562_v14 = vmul.f32 %v4555_v8, %v8029_v34  ;;  %v4565_v37 = vmul.f32 %v4555_v8, %v8039_v19 }
 0xaf0   : > { %v4563_v25 = vmul.f32 %v4558_v13, %v8019_v6  ;;  %v4566_v27 = vmul.f32 %v4558_v13, %v8024_v22 }
 0xaf1   : > { %v6965_v46 = vpack.i.bf16 %v4565_v37, %v4564_v42 }
 0xaf2   : > { %v4683_v57 = vpop.permute.xlu1 %4682  ;;  %v6950_v0 = vpack.i.bf16 %v4563_v25, %v4562_v14  ;;  %v6975_v24 = vpack.i.bf16 %v4567_v33, %v4566_v27 }
 0xaf3   : > { %v4684_v59 = vsel %vm338_vm4, %v4681_v18, %v4683_v57  ;;  %v4690_v26 = vmul.f32 %v4683_v57, %v8037_v23  ;;  %v4693_v44 = vmul.f32 %v4683_v57, %v8062_v12 }
 0xaf4   : > { %v4689_v40 = vmul.f32 %v4684_v59, %v8019_v6  ;;  %6951 = vrot.lane.b32.xlu1 %v6950_v0, %s7201_s8  ;;  %v4692_v43 = vmul.f32 %v4684_v59, %v8024_v22 }
 0xaf5   : > { %v6970_v15 = vpack.i.bf16 %v4691_v39, %v4690_v26 }
 0xaf6   : > { %v6955_v28 = vpack.i.bf16 %v4689_v40, %v4688_v2  ;;  %v4913_v45 = vpop.permute.xlu1 %4912  ;;  %v6980_v48 = vpack.i.bf16 %v4693_v44, %v4692_v43 }
 0xaf7   : > { %v4923_v51 = vmul.f32 %v4913_v45, %v8039_v19  ;;  %v4916_v52 = vsel %vm938_vm5, %v4913_v45, %v4915_v47  ;;  %v4920_v55 = vmul.f32 %v4913_v45, %v8029_v34  ;;  %v4433_v47 = vld [vmem:[#allocation3 + $0x1f0] sm:$0xff] }
 0xaf8   : > { %6971 = vrot.lane.b32.xlu1 %v6970_v15, %s7202_s9  ;;  %6956 = vrot.lane.b32.xlu0 %v6955_v28, %s7202_s9  ;;  %v4921_v56 = vmul.f32 %v4916_v52, %v8019_v6  ;;  %v4924_v4 = vmul.f32 %v4916_v52, %v8024_v22 }
 0xaf9   : > { %v7005_v62 = vpack.i.bf16 %v4923_v51, %v4922_v54 }
 0xafa   : > { %v5041_v49 = vpop.permute.xlu1 %5040  ;;  %v7000_v9 = vpack.i.bf16 %v4921_v56, %v4920_v55  ;;  %v7010_v29 = vpack.i.bf16 %v4925_v16, %v4924_v4  ;;  %v4434_v56 = vld [vmem:[#allocation3 + $0x1f8] sm:$0xff] }
 0xafb   : > { %v5042_v53 = vsel %vm1070_vm6, %v5039_v50, %v5041_v49  ;;  %v5048_v17 = vmul.f32 %v5041_v49, %v8037_v23 }
 0xafc   : > { %6976 = vrot.lane.b32.xlu1 %v6975_v24, %s7201_s8  ;;  %6961 = vrot.lane.b32.xlu0 %v6960_v41, %s7200_s7  ;;  %v5047_v58 = vmul.f32 %v5042_v53, %v8019_v6  ;;  %v5050_v7 = vmul.f32 %v5042_v53, %v8024_v22 }
 0xafd   : > { %v7020_v35 = vpack.i.bf16 %v5049_v20, %v5048_v17 }
 0xb00   : > { %5270 = vrot.lane.b32.xlu1 %v8001_v3, %s7199_s30  ;;  %6966 = vrot.lane.b32.xlu0 %v6965_v46, %s7201_s8  ;;  %v5046_v3 = vmul.f32 %v5039_v50, %v8029_v34 }
 0xb02   : > { %v7015_v10 = vpack.i.bf16 %v5047_v58, %v5046_v3 }
 0xb04   : > { %6986 = vrot.lane.b32.xlu1 %v8033_v38, %s7203_s10  ;;  %6981 = vrot.lane.b32.xlu0 %v6980_v48, %s7202_s9 }
 0xb08   : > { %6996 = vrot.lane.b32.xlu1 %v6960_v41, %s7203_s10  ;;  %5272 = vrot.lane.b32.xlu0 %v7995_v61, %s7199_s30  ;;  %v5051_v61 = vmul.f32 %v5041_v49, %v8062_v12 }
 0xb0a   : > { %v7025_v32 = vpack.i.bf16 %v5051_v61, %v5050_v7 }
 0xb0c   : > { %6991 = vrot.lane.b32.xlu0 %v8043_v31, %s7203_s10  ;;  %7006 = vrot.lane.b32.xlu1 %v7005_v62, %s7204_s11 }
 0xb10   : > { %7001 = vrot.lane.b32.xlu0 %v7000_v9, %s7204_s11  ;;  %7016 = vrot.lane.b32.xlu1 %v7015_v10, %s7205_s12 }
 0xb14   : > { %7011 = vrot.lane.b32.xlu0 %v7010_v29, %s7204_s11  ;;  %7026 = vrot.lane.b32.xlu1 %v7025_v32, %s7205_s12 }
 0xb18   : > { %7021 = vrot.lane.b32.xlu0 %v7020_v35, %s7205_s12  ;;  %7036 = vrot.lane.b32.xlu1 %v8043_v31, %s8533_s15 }
 0xb1c   : > { %7031 = vrot.lane.b32.xlu0 %v8033_v38, %s8533_s15 }
 0xb20   : > { %7041 = vrot.lane.b32.xlu0 %v6960_v41, %s8533_s15 }
 0xb52   : > { %v6942_v36 = vpop.permute.xlu0 %6941 }
 0xb53   : > { %v6944_v14 = vunpack.i.h.bf16 %v6942_v36  ;;  %v6943_v18 = vunpack.i.l.bf16 %v6942_v36 }
 0xb55   : > { %v4453_v31 = vsel %vm453_vm8, %v6943_v18, %v6944_v14 }
 0xb56   : > { %v6947_v11 = vpop.permute.xlu1 %6946 }
 0xb57   : > { %v6948_v25 = vunpack.i.l.bf16 %v6947_v11  ;;  %v6949_v0 = vunpack.i.h.bf16 %v6947_v11 }
 0xb59   : > { %v4454_v2 = vsel %vm453_vm8, %v6944_v14, %v6948_v25 }
 0xb66   : > { %v6952_v60 = vpop.permute.xlu1 %6951 }
 0xb67   : > { %v6954_v26 = vunpack.i.h.bf16 %v6952_v60  ;;  %v6953_v38 = vunpack.i.l.bf16 %v6952_v60 }
 0xb69   : > { %v4589_v43 = vsel %vm596_vm9, %v6953_v38, %v6954_v26 }
 0xb6a   : > { %v8114_v8 = vpop.permute.xlu0 %6956  ;;  %v6972_v13 = vpop.permute.xlu1 %6971 }
 0xb6b   : > { %v6959_v44 = vunpack.i.h.bf16 %v8114_v8  ;;  %v6973_v45 = vunpack.i.l.bf16 %v6972_v13  ;;  %v6958_v61 = vunpack.i.l.bf16 %v8114_v8  ;;  %v6974_v9 = vunpack.i.h.bf16 %v6972_v13  ;;  %v4569_v13 = vld [vmem:[#allocation3 + $0x200] sm:$0xff] }
 0xb6d   : > { %v4716_v58 = vsel %vm727_vm10, %v6959_v44, %v6973_v45  ;;  %v5409_v45 = vld [vmem:[%s8519_s5 + $0x18] sm:$0xff] }
 0xb6e   : > { %v6962_v30 = vpop.permute.xlu0 %6961  ;;  %v6977_v57 = vpop.permute.xlu1 %6976 }
 0xb6f   : > { %v6964_v39 = vunpack.i.h.bf16 %v6962_v30  ;;  %v6963_v59 = vunpack.i.l.bf16 %v6962_v30  ;;  %v6979_v15 = vunpack.i.h.bf16 %v6977_v57  ;;  %v6978_v21 = vunpack.i.l.bf16 %v6977_v57 }
 0xb71   : > { %v4455_v40 = vsel %vm453_vm8, %v6949_v0, %v6963_v59  ;;  %v4456_v27 = vsel %vm453_vm8, %v6963_v59, %v6964_v39  ;;  %v4592_v49 = vsel %vm596_vm9, %v6978_v21, %v6979_v15  ;;  %v5408_v15 = vld [vmem:[%s8519_s5 + $0x10] sm:$0xff] }
 0xb72   : > { %v6967_v28 = vpop.permute.xlu0 %6966  ;;  %v5271_v33 = vpop.permute.xlu1 %5270  ;;  %v6365_v37 = vpack.c.bf16 %v4456_v27, %v4454_v2  ;;  %v6367_v24 = vpack.c.bf16 %v4455_v40, %v4453_v31  ;;  %v4570_v31 = vld [vmem:[#allocation3 + $0x208] sm:$0xff] }
 0xb73   : > { %v6969_v41 = vunpack.i.h.bf16 %v6967_v28  ;;  %v6968_v42 = vunpack.i.l.bf16 %v6967_v28  ;;  %v5278_v17 = vmul.f32 %v5271_v33, %v8029_v34  ;;  %v5281_v18 = vmul.f32 %v5271_v33, %v8039_v19  ;;  %v4695_v28 = vld [vmem:[#allocation3 + $0x210] sm:$0xff] }
 0xb74   : > { %6366 = vmatprep.subr.bf16.mxu0 %v6365_v37 }
 0xb75   : > { %v4591_v46 = vsel %vm596_vm9, %v6969_v41, %v6978_v21  ;;  %6368 = vmatpush1.bf16.msra.mxu0 %v6367_v24  ;;  %v4590_v48 = vsel %vm596_vm9, %v6954_v26, %v6968_v42  ;;  %v5407_v21 = vld [vmem:[%s8519_s5 + $0x8] sm:$0xff] }
 0xb76   : > { %v6982_v50 = vpop.permute.xlu0 %6981  ;;  %v8125_v51 = vpop.permute.xlu1 %6986  ;;  %v6369_v52 = vpack.c.bf16 %v4592_v49, %v4590_v48  ;;  %v6371_v53 = vpack.c.bf16 %v4591_v46, %v4589_v43 }
 0xb77   : > { %v6984_v54 = vunpack.i.h.bf16 %v6982_v50  ;;  %v6983_v55 = vunpack.i.l.bf16 %v6982_v50  ;;  %v6988_v38 = vunpack.i.l.bf16 %v8125_v51 }
 0xb78   : > { %6216 = vmatmul.mubr.msk.f32.vlgmr.msra.gmra.mrb[16].mxu0 %vm338_vm4, %v4433_v47  ;;  %6370 = vmatprep.subr.bf16.mxu0 %v6369_v52 }
 0xb79   : > { %6372 = vmatpush1.bf16.msra.mxu0 %v6371_v53  ;;  %4537 = vmatprep.mubr.f32.mxu0 %v7193_v1  ;;  %v4718_v62 = vsel %vm727_vm10, %v6983_v55, %v6984_v54  ;;  %v4717_v20 = vsel %vm727_vm10, %v6974_v9, %v6983_v55 }
 0xb7a   : > { %v5273_v3 = vpop.permute.xlu0 %5272  ;;  %v6997_v4 = vpop.permute.xlu1 %6996  ;;  %v6373_v7 = vpack.c.bf16 %v4718_v62, %v4716_v58  ;;  %v8190_v62 = vld [vmem:[%s8518_s4 + $0x10] sm:$0xff] }
 0xb7b   : > { %v5274_v10 = vsel %vm1313_vm7, %v5271_v33, %v5273_v3  ;;  %v5280_v16 = vmul.f32 %v5273_v3, %v8037_v23  ;;  %v6999_v35 = vunpack.i.h.bf16 %v6997_v4  ;;  %v6998_v11 = vunpack.i.l.bf16 %v6997_v4 }
 0xb7c   : > { %v5279_v29 = vmul.f32 %v5274_v10, %v8019_v6  ;;  %v5282_v32 = vmul.f32 %v5274_v10, %v8024_v22  ;;  %6217 = vmatmul.mubr.msk.f32.gmra.mrb[20].mxu0 %vm338_vm4, %v4434_v56  ;;  %6374 = vmatprep.subr.bf16.mxu0 %v6373_v7  ;;  %v5283_v36 = vmul.f32 %v5273_v3, %v8062_v12  ;;  %v6989_v22 = vunpack.i.h.bf16 %v8125_v51  ;;  %v5406_v12 = vld [vmem:[%s8519_s5] sm:$0xff]  ;;  %v4696_v51 = vld [vmem:[#allocation3 + $0x218] sm:$0xff] }
 0xb7d   : > { %4667 = vmatprep.mubr.f32.mxu0 %v7193_v1  ;;  %v4715_v6 = vsel %vm727_vm10, %v6958_v61, %v6959_v44  ;;  %v4824_v0 = vsel %vm838_vm11, %v6998_v11, %v6999_v35  ;;  %v8174_v44 = vld [vmem:[%s8518_s4] sm:$0xff]  ;;  %v8195_v3 = vld [vmem:[%s8518_s4 + $0x8] sm:$0xff]  ;;  %v4807_v61 = vld [vmem:[#allocation3 + $0x220] sm:$0xff] }
 0xb7e   : > { %v6992_v60 = vpop.permute.xlu0 %6991  ;;  %v8141_v8 = vpop.permute.xlu1 %7006  ;;  %v7050_v23 = vpack.i.bf16 %v5282_v32, %v5280_v16  ;;  %v7045_v34 = vpack.i.bf16 %v5279_v29, %v5278_v17  ;;  %v6375_v25 = vpack.c.bf16 %v4717_v20, %v4715_v6  ;;  %v7055_v19 = vpack.i.bf16 %v5281_v18, %v5283_v36  ;;  %v8207_v20 = vld [vmem:[%s8518_s4 + $0x18] sm:$0xff] }
 0xb7f   : > { %v6993_v14 = vunpack.i.l.bf16 %v6992_v60  ;;  %v6994_v30 = vunpack.i.h.bf16 %v6992_v60  ;;  %v4821_v33 = vsel %vm838_vm11, %v6988_v38, %v6989_v22  ;;  %v7008_v37 = vunpack.i.l.bf16 %v8141_v8  ;;  %v4808_v36 = vld [vmem:[#allocation3 + $0x228] sm:$0xff] }
 0xb80   : > { %7051 = vrot.lane.b32.xlu0 %v7050_v23, %s8534_s16  ;;  %7046 = vrot.lane.b32.xlu1 %v7045_v34, %s8534_s16  ;;  %v7009_v53 = vunpack.i.h.bf16 %v8141_v8 }
 0xb81   : > { %6219 = vmatmul.mubr.msk.f32.vlgmr.msra.gmra.mrb[16].mxu0 %vm338_vm4, %v4569_v13  ;;  %v4822_v57 = vsel %vm838_vm11, %v6989_v22, %v6993_v14  ;;  %v4823_v2 = vsel %vm838_vm11, %v6994_v30, %v6998_v11  ;;  %v7209_v13 = vmov 1   ;;  %v4927_v14 = vld [vmem:[#allocation3 + $0x230] sm:$0xff] }
 0xb82   : > { %6376 = vmatpush1.bf16.msra.mxu0 %v6375_v25  ;;  %v7002_v39 = vpop.permute.xlu0 %7001  ;;  %v8154_v59 = vpop.permute.xlu1 %7016  ;;  %4673 = vmatprep.mubr.f32.mxu0 %v7193_v1  ;;  %v6377_v26 = vpack.c.bf16 %v4824_v0, %v4822_v57  ;;  %v6379_v43 = vpack.c.bf16 %v4823_v2, %v4821_v33  ;;  %v4928_v57 = vld [vmem:[#allocation3 + $0x238] sm:$0xff]  ;;  %v5054_v2 = vld [vmem:[#allocation3 + $0x248] sm:$0xff]  ;;  %v7214_v33 = vmov 6  }
 0xb83   : > { %v7004_v40 = vunpack.i.h.bf16 %v7002_v39  ;;  %v7003_v54 = vunpack.i.l.bf16 %v7002_v39  ;;  %v7019_v55 = vunpack.i.h.bf16 %v8154_v59  ;;  %v7018_v60 = vunpack.i.l.bf16 %v8154_v59 }
 0xb84   : > { %5412 = vperm.xlu0 %6698, %v5406_v12   ;;  %7056 = vrot.lane.b32.xlu1 %v7055_v19, %s8534_s16  ;;  %v5053_v19 = vld [vmem:[#allocation3 + $0x240] sm:$0xff] }
 0xb85   : > { %6220 = vmatmul.mubr.msk.f32.gmra.mrb[22].mxu0 %vm338_vm4, %v4570_v31  ;;  %6378 = vmatprep.subr.bf16.mxu0 %v6377_v26  ;;  %v4948_v46 = vsel %vm970_vm12, %v7004_v40, %v7008_v37  ;;  %v4947_v10 = vsel %vm970_vm12, %v7003_v54, %v7004_v40  ;;  %v5073_v25 = vsel %vm1102_vm13, %v7018_v60, %v7019_v55  ;;  %v7210_v26 = vmov 2  }
 0xb86   : > { %v7012_v27 = vpop.permute.xlu0 %7011  ;;  %4793 = vmatprep.mubr.f32.mxu0 %v7193_v1  ;;  %v7027_v42 = vpop.permute.xlu1 %7026  ;;  %v7211_v40 = vmov 3   ;;  %v7215_v37 = vmov 7  }
 0xb87   : > { %v7014_v24 = vunpack.i.h.bf16 %v7012_v27  ;;  %v7013_v41 = vunpack.i.l.bf16 %v7012_v27  ;;  %v7029_v48 = vunpack.i.h.bf16 %v7027_v42  ;;  %v7028_v49 = vunpack.i.l.bf16 %v7027_v42 }
 0xb88   : > { %5422 = vperm.xlu0 %6698, %v5408_v15   ;;  %5417 = vperm.xlu1 %6699, %v5407_v21   ;;  %v5165_v15 = vld [vmem:[#allocation3 + $0x250] sm:$0xff]  ;;  %v5166_v21 = vld [vmem:[#allocation3 + $0x258] sm:$0xff]  ;;  %v7212_v27 = vmov 4  }
 0xb89   : > { %6221 = vmatmul.mubr.msk.f32.vlgmr.msra.gmra.mrb[16].mxu0 %vm338_vm4, %v4695_v28  ;;  %v4950_v47 = vsel %vm970_vm12, %v7013_v41, %v7014_v24  ;;  %v4949_v58 = vsel %vm970_vm12, %v7009_v53, %v7013_v41  ;;  %v5076_v9 = vsel %vm1102_vm13, %v7028_v49, %v7029_v48  ;;  %v7213_v28 = vmov 5  }
 0xb8a   : > { %6380 = vmatpush1.bf16.msra.mxu0 %v6379_v43  ;;  %v7022_v50 = vpop.permute.xlu0 %7021  ;;  %4799 = vmatprep.mubr.f32.mxu0 %v7193_v1  ;;  %v6381_v52 = vpack.c.bf16 %v4950_v47, %v4948_v46  ;;  %v6383_v17 = vpack.c.bf16 %v4949_v58, %v4947_v10  ;;  %v7037_v32 = vpop.permute.xlu1 %7036  ;;  %v7216_v41 = vmov 8   ;;  %v7217_v43 = vmov 9  }
 0xb8b   : > { %v7023_v56 = vunpack.i.l.bf16 %v7022_v50  ;;  %v7024_v29 = vunpack.i.h.bf16 %v7022_v50  ;;  %v7038_v34 = vunpack.i.l.bf16 %v7037_v32  ;;  %v7039_v0 = vunpack.i.h.bf16 %v7037_v32  ;;  %v5285_v32 = vld [vmem:[#allocation3 + $0x260] sm:$0xff] }
 0xb8c   : > { %5436 = vperm.xlu0 %6698, %v8174_v44   ;;  %5427 = vperm.xlu1 %6699, %v5409_v45   ;;  %v7218_v45 = vmov 10   ;;  %v7219_v46 = vmov 11   ;;  %v7220_v47 = vmov 12   ;;  %v7221_v48 = vmov 13  }
 0xb8d   : > { %6222 = vmatmul.mubr.msk.f32.gmra.mrb[24].mxu0 %vm338_vm4, %v4696_v51  ;;  %6382 = vmatprep.subr.bf16.mxu0 %v6381_v52  ;;  %v5074_v4 = vsel %vm1102_vm13, %v7019_v55, %v7023_v56  ;;  %v5075_v6 = vsel %vm1102_vm13, %v7024_v29, %v7028_v49  ;;  %v7222_v53 = vmov 14  }
 0xb8e   : > { %v7032_v7 = vpop.permute.xlu0 %7031  ;;  %4899 = vmatprep.mubr.f32.mxu0 %v7193_v1  ;;  %v6385_v16 = vpack.c.bf16 %v5076_v9, %v5074_v4  ;;  %v6387_v12 = vpack.c.bf16 %v5075_v6, %v5073_v25  ;;  %v5286_v25 = vld [vmem:[#allocation3 + $0x268] sm:$0xff] }
 0xb8f   : > { %v7034_v35 = vunpack.i.h.bf16 %v7032_v7  ;;  %v7033_v39 = vunpack.i.l.bf16 %v7032_v7 }
 0xb90   : > { %5446 = vperm.xlu0 %6698, %v8190_v62   ;;  %5441 = vperm.xlu1 %6699, %v8195_v3  }
 0xb91   : > { %6223 = vmatmul.mubr.msk.f32.vlgmr.msra.gmra.mrb[16].mxu0 %vm338_vm4, %v4807_v61  ;;  %v5180_v18 = vsel %vm1213_vm14, %v7034_v35, %v7038_v34  ;;  %v5179_v31 = vsel %vm1213_vm14, %v7033_v39, %v7034_v35 }
 0xb92   : > { %6384 = vmatpush1.bf16.msra.mxu0 %v6383_v17  ;;  %v7042_v11 = vpop.permute.xlu0 %7041  ;;  %4905 = vmatprep.mubr.f32.mxu0 %v7193_v1 }
 0xb93   : > { %6386 = vmatprep.subr.bf16.mxu0 %v6385_v16  ;;  %v7044_v8 = vunpack.i.h.bf16 %v7042_v11  ;;  %v7043_v23 = vunpack.i.l.bf16 %v7042_v11  ;;  %v7223_v16 = vmov 15  }
 0xb94   : > { %5451 = vperm.xlu1 %6699, %v8207_v20   ;;  %7060 = vset.pattern.permute.xlu0 %v7209_v13 }
 0xb95   : > { %6224 = vmatmul.mubr.msk.f32.gmra.mrb[26].mxu0 %vm338_vm4, %v4808_v36  ;;  %v5182_v22 = vsel %vm1213_vm14, %v7043_v23, %v7044_v8  ;;  %5467 = vperm.xlu0 %7060, %v8174_v44   ;;  %v5181_v59 = vsel %vm1213_vm14, %v7039_v0, %v7043_v23 }
 0xb96   : > { %5025 = vmatprep.mubr.f32.mxu0 %v7193_v1  ;;  %v6389_v30 = vpack.c.bf16 %v5182_v22, %v5180_v18  ;;  %v6391_v38 = vpack.c.bf16 %v5181_v59, %v5179_v31 }
 0xb98   : > { %7061 = vset.pattern.permute.xlu1 %v7209_v13 }
 0xb99   : > { %6225 = vmatmul.mubr.msk.f32.vlgmr.msra.gmra.mrb[16].mxu0 %vm338_vm4, %v4927_v14  ;;  %5471 = vperm.xlu1 %7061, %v8195_v3  }
 0xb9a   : > { %6388 = vmatpush1.bf16.msra.mxu0 %v6387_v12  ;;  %5031 = vmatprep.mubr.f32.mxu0 %v7193_v1 }
 0xb9b   : > { %6390 = vmatprep.subr.bf16.mxu0 %v6389_v30  ;;  %5479 = vperm.xlu0 %7060, %v8207_v20  }
 0xb9d   : > { %6226 = vmatmul.mubr.msk.f32.gmra.mrb[28].mxu0 %vm338_vm4, %v4928_v57  ;;  %5475 = vperm.xlu1 %7061, %v8190_v62  }
 0xb9e   : > { %5151 = vmatprep.mubr.f32.mxu0 %v7193_v1 }
 0xb9f   : > { %7063 = vset.pattern.permute.xlu0 %v7210_v26 }
 0xba0   : > { %5511 = vperm.xlu0 %7063, %v8195_v3  }
 0xba1   : > { %6227 = vmatmul.mubr.msk.f32.vlgmr.msra.gmra.mrb[16].mxu0 %vm338_vm4, %v5053_v19  ;;  %7062 = vset.pattern.permute.xlu1 %v7210_v26 }
 0xba2   : > { %6392 = vmatpush1.bf16.msra.mxu0 %v6391_v38  ;;  %5507 = vperm.xlu1 %7062, %v8174_v44  }
 0xba3   : > { %5157 = vmatprep.mubr.f32.mxu0 %v7193_v1 }
 0xba4   : > { %7064 = vset.pattern.permute.xlu0 %v7211_v40 }
 0xba5   : > { %6228 = vmatmul.mubr.msk.f32.gmra.mrb[30].mxu0 %vm338_vm4, %v5054_v2  ;;  %5547 = vperm.xlu0 %7064, %v8174_v44  }
 0xba6   : > { %5515 = vperm.xlu1 %7062, %v8190_v62   ;;  %5257 = vmatprep.mubr.f32.mxu0 %v7193_v1 }
 0xba9   : > { %6229 = vmatmul.mubr.msk.f32.vlgmr.msra.gmra.mrb[16].mxu0 %vm338_vm4, %v5165_v15  ;;  %5559 = vperm.xlu0 %7064, %v8207_v20  }
 0xbaa   : > { %5519 = vperm.xlu1 %7062, %v8207_v20   ;;  %5263 = vmatprep.mubr.f32.mxu0 %v7193_v1 }
 0xbad   : > { %6230 = vmatmul.mubr.msk.f32.gmra.mrb[32].mxu0 %vm338_vm4, %v5166_v21  ;;  %7067 = vset.pattern.permute.xlu0 %v7212_v27 }
 0xbae   : > { %7065 = vset.pattern.permute.xlu1 %v7211_v40  ;;  %5383 = vmatprep.mubr.f32.mxu0 %v7193_v1 }
 0xbaf   : > { %5551 = vperm.xlu1 %7065, %v8195_v3   ;;  %5591 = vperm.xlu0 %7067, %v8195_v3  }
 0xbb3   : > { %5555 = vperm.xlu1 %7065, %v8190_v62   ;;  %7068 = vset.pattern.permute.xlu0 %v7213_v28 }
 0xbb4   : > { %5627 = vperm.xlu0 %7068, %v8174_v44  }
 0xbb7   : > { %7066 = vset.pattern.permute.xlu1 %v7212_v27 }
 0xbb8   : > { %5587 = vperm.xlu1 %7066, %v8174_v44   ;;  %5639 = vperm.xlu0 %7068, %v8207_v20  }
 0xbbc   : > { %5595 = vperm.xlu1 %7066, %v8190_v62   ;;  %7071 = vset.pattern.permute.xlu0 %v7214_v33 }
 0xbbd   : > { %5671 = vperm.xlu0 %7071, %v8195_v3  }
 0xbc0   : > { %5599 = vperm.xlu1 %7066, %v8207_v20   ;;  %v4421_v24 = vpop.f32.mrb[18].mxu0 }
 0xbc1   : > { %7072 = vset.pattern.permute.xlu0 %v7215_v37  ;;  %v4422_v42 = vpop.f32.mrb[19].mxu0 }
 0xbc2   : > { %5707 = vperm.xlu0 %7072, %v8174_v44  }
 0xbc4   : > { %7069 = vset.pattern.permute.xlu1 %v7213_v28 }
 0xbc5   : > { %5631 = vperm.xlu1 %7069, %v8195_v3  }
 0xbc6   : > { %5719 = vperm.xlu0 %7072, %v8207_v20  }
 0xbc9   : > { %5635 = vperm.xlu1 %7069, %v8190_v62  }
 0xbca   : > { %7075 = vset.pattern.permute.xlu0 %v7216_v41 }
 0xbcb   : > { %5751 = vperm.xlu0 %7075, %v8195_v3  }
 0xbcd   : > { %7070 = vset.pattern.permute.xlu1 %v7214_v33 }
 0xbce   : > { %5667 = vperm.xlu1 %7070, %v8174_v44  }
 0xbcf   : > { %7076 = vset.pattern.permute.xlu0 %v7217_v43 }
 0xbd0   : > { %5775 = vperm.xlu0 %7076, %v8174_v44  }
 0xbd2   : > { %5675 = vperm.xlu1 %7070, %v8190_v62  }
 0xbd4   : > { %5787 = vperm.xlu0 %7076, %v8207_v20  }
 0xbd6   : > { %5679 = vperm.xlu1 %7070, %v8207_v20  }
 0xbd8   : > { %7079 = vset.pattern.permute.xlu0 %v7218_v45 }
 0xbd9   : > { %5819 = vperm.xlu0 %7079, %v8195_v3  }
 0xbda   : > { %7073 = vset.pattern.permute.xlu1 %v7215_v37 }
 0xbdb   : > { %5711 = vperm.xlu1 %7073, %v8195_v3  }
 0xbdd   : > { %7080 = vset.pattern.permute.xlu0 %v7219_v46 }
 0xbde   : > { %5855 = vperm.xlu0 %7080, %v8174_v44  }
 0xbdf   : > { %5715 = vperm.xlu1 %7073, %v8190_v62  }
 0xbe2   : > { %5867 = vperm.xlu0 %7080, %v8207_v20  }
 0xbe3   : > { %7074 = vset.pattern.permute.xlu1 %v7216_v41 }
 0xbe4   : > { %5747 = vperm.xlu1 %7074, %v8174_v44  }
 0xbe6   : > { %7083 = vset.pattern.permute.xlu0 %v7220_v47 }
 0xbe7   : > { %5899 = vperm.xlu0 %7083, %v8195_v3  }
 0xbe8   : > { %5755 = vperm.xlu1 %7074, %v8190_v62  }
 0xbeb   : > { %7084 = vset.pattern.permute.xlu0 %v7221_v48 }
 0xbec   : > { %5759 = vperm.xlu1 %7074, %v8207_v20   ;;  %5935 = vperm.xlu0 %7084, %v8174_v44  }
 0xbf0   : > { %7077 = vset.pattern.permute.xlu1 %v7217_v43  ;;  %5947 = vperm.xlu0 %7084, %v8207_v20  }
 0xbf1   : > { %5779 = vperm.xlu1 %7077, %v8195_v3  }
 0xbf2   : > { %v7052_v49 = vpop.permute.xlu0 %7051  ;;  %v7047_v50 = vpop.permute.xlu1 %7046 }
 0xbf3   : > { %v7049_v51 = vunpack.i.h.bf16 %v7047_v50  ;;  %v7048_v52 = vunpack.i.l.bf16 %v7047_v50  ;;  %v7053_v54 = vunpack.i.l.bf16 %v7052_v49  ;;  %v7054_v56 = vunpack.i.h.bf16 %v7052_v49 }
 0xbf4   : > { %7087 = vset.pattern.permute.xlu0 %v7222_v53 }
 0xbf5   : > { %5783 = vperm.xlu1 %7077, %v8190_v62   ;;  %5979 = vperm.xlu0 %7087, %v8195_v3   ;;  %v5305_v7 = vsel %vm1345_vm15, %v7048_v52, %v7049_v51  ;;  %v5306_v9 = vsel %vm1345_vm15, %v7049_v51, %v7053_v54 }
 0xbf6   : > { %v7057_v55 = vpop.permute.xlu1 %7056 }
 0xbf7   : > { %v7059_v58 = vunpack.i.h.bf16 %v7057_v55  ;;  %v7058_v4 = vunpack.i.l.bf16 %v7057_v55 }
 0xbf9   : > { %v5307_v61 = vsel %vm1345_vm15, %v7059_v58, %v7054_v56  ;;  %v5308_v10 = vsel %vm1345_vm15, %v7054_v56, %v7058_v4  ;;  %7078 = vset.pattern.permute.xlu1 %v7218_v45  ;;  %7088 = vset.pattern.permute.xlu0 %v7223_v16 }
 0xbfa   : > { %v6393_v17 = vpack.c.bf16 %v5308_v10, %v5306_v9  ;;  %v6395_v29 = vpack.c.bf16 %v5307_v61, %v5305_v7  ;;  %5815 = vperm.xlu1 %7078, %v8174_v44   ;;  %6015 = vperm.xlu0 %7088, %v8174_v44  }
 0xbfc   : > { %6394 = vmatprep.subr.bf16.mxu0 %v6393_v17 }
 0xbfd   : > { %6396 = vmatpush1.bf16.msra.mxu0 %v6395_v29 }
 0xbfe   : > { %5823 = vperm.xlu1 %7078, %v8190_v62   ;;  %6027 = vperm.xlu0 %7088, %v8207_v20  }
 0xc00   : > { %6231 = vmatmul.mubr.msk.f32.vlgmr.msra.gmra.mrb[16].mxu0 %vm338_vm4, %v5285_v32 }
 0xc01   : > { %5389 = vmatprep.mubr.f32.mxu0 %v7193_v1 }
 0xc02   : > { %5827 = vperm.xlu1 %7078, %v8207_v20  }
 0xc03   : > { %v8315_v15 = vpop.permute.xlu0 %5412 }
 0xc04   : > { %6232 = vmatmul.mubr.msk.f32.gmra.mrb[34].mxu0 %vm338_vm4, %v5286_v25 }
 0xc06   : > { %7081 = vset.pattern.permute.xlu1 %v7219_v46 }
 0xc07   : > { %5859 = vperm.xlu1 %7081, %v8195_v3   ;;  %v8298_v23 = vpop.permute.xlu1 %5417  ;;  %v8319_v27 = vpop.permute.xlu0 %5422 }
 0xc0b   : > { %5863 = vperm.xlu1 %7081, %v8190_v62   ;;  %v8323_v33 = vpop.permute.xlu0 %5436 }
 0xc0f   : > { %7082 = vset.pattern.permute.xlu1 %v7220_v47  ;;  %v8327_v24 = vpop.permute.xlu0 %5446 }
 0xc10   : > { %5895 = vperm.xlu1 %7082, %v8174_v44  }
 0xc14   : > { %5903 = vperm.xlu1 %7082, %v8190_v62   ;;  %v5468_v41 = vpop.permute.xlu0 %5467 }
 0xc18   : > { %5907 = vperm.xlu1 %7082, %v8207_v20  }
 0xc1a   : > { %v5480_v47 = vpop.permute.xlu0 %5479 }
 0xc1c   : > { %7085 = vset.pattern.permute.xlu1 %v7221_v48 }
 0xc1d   : > { %5939 = vperm.xlu1 %7085, %v8195_v3  }
 0xc1f   : > { %v5512_v50 = vpop.permute.xlu0 %5511 }
 0xc21   : > { %5943 = vperm.xlu1 %7085, %v8190_v62  }
 0xc25   : > { %7086 = vset.pattern.permute.xlu1 %v7222_v53  ;;  %v5548_v53 = vpop.permute.xlu0 %5547 }
 0xc26   : > { %5975 = vperm.xlu1 %7086, %v8174_v44   ;;  %v8300_v44 = vpop.permute.xlu1 %5427 }
 0xc29   : > { %v5560_v4 = vpop.permute.xlu0 %5559 }
 0xc2a   : > { %5983 = vperm.xlu1 %7086, %v8190_v62  }
 0xc2e   : > { %5987 = vperm.xlu1 %7086, %v8207_v20   ;;  %v8302_v20 = vpop.permute.xlu1 %5441 }
 0xc32   : > { %7089 = vset.pattern.permute.xlu1 %v7223_v16  ;;  %v5592_v16 = vpop.permute.xlu0 %5591 }
 0xc33   : > { %6019 = vperm.xlu1 %7089, %v8195_v3   ;;  %v8304_v3 = vpop.permute.xlu1 %5451 }
 0xc37   : > { %6023 = vperm.xlu1 %7089, %v8190_v62   ;;  %v5472_v18 = vpop.permute.xlu1 %5471 }
 0xc3b   : > { %v5476_v57 = vpop.permute.xlu1 %5475 }
 0xc3f   : > { %v5508_v0 = vpop.permute.xlu1 %5507 }
 0xc43   : > { %v5516_v39 = vpop.permute.xlu1 %5515 }
 0xc47   : > { %v5520_v59 = vpop.permute.xlu1 %5519 }
 0xc4b   : > { %v5552_v19 = vpop.permute.xlu1 %5551 }
 0xc4f   : > { %v4539_v1 = vpop.f32.mrb[20].mxu0  ;;  %v5556_v31 = vpop.permute.xlu1 %5555 }
 0xc50   : > { %v4540_v35 = vpop.f32.mrb[21].mxu0 }
 0xc51   : > { %v5628_v35 = vpop.permute.xlu0 %5627 }
 0xc53   : > { %v8307_v26 = vpop.permute.xlu1 %5587 }
 0xc57   : > { %v8309_v38 = vpop.permute.xlu1 %5595 }
 0xc58   : > { %v4675_v11 = vpop.f32.mrb[22].mxu0 }
 0xc59   : > { %v4676_v36 = vpop.f32.mrb[23].mxu0 }
 0xc5b   : > { %v8311_v2 = vpop.permute.xlu1 %5599 }
 0xc5f   : > { %v8313_v40 = vpop.permute.xlu1 %5631 }
 0xc60   : > { %v4801_v60 = vpop.f32.mrb[24].mxu0 }
 0xc61   : > { %v4802_v8 = vpop.f32.mrb[25].mxu0 }
 0xc63   : > { %v8317_v21 = vpop.permute.xlu1 %5635 }
 0xc67   : > { %v8321_v28 = vpop.permute.xlu1 %5667 }
 0xc68   : > { %v4907_v34 = vpop.f32.mrb[26].mxu0 }
 0xc69   : > { %v4908_v13 = vpop.f32.mrb[27].mxu0  ;;  %v5640_v34 = vpop.permute.xlu0 %5639 }
 0xc6b   : > { %v8325_v37 = vpop.permute.xlu1 %5675 }
 0xc6f   : > { %v8329_v42 = vpop.permute.xlu1 %5679 }
 0xc70   : > { %v5033_v6 = vpop.f32.mrb[28].mxu0 }
 0xc71   : > { %v5034_v22 = vpop.f32.mrb[29].mxu0 }
 0xc73   : > { %v8332_v49 = vpop.permute.xlu1 %5711 }
 0xc77   : > { %v8334_v51 = vpop.permute.xlu1 %5715 }
 0xc78   : > { %v5159_v14 = vpop.f32.mrb[30].mxu0 }
 0xc79   : > { %v5160_v62 = vpop.f32.mrb[31].mxu0 }
 0xc7b   : > { %v8336_v54 = vpop.permute.xlu1 %5747 }
 0xc7f   : > { %v8338_v7 = vpop.permute.xlu1 %5755 }
 0xc80   : > { %v5265_v30 = vpop.f32.mrb[32].mxu0 }
 0xc81   : > { %v5266_v12 = vpop.f32.mrb[33].mxu0 }
 0xc83   : > { %v8347_v17 = vpop.permute.xlu1 %5759 }
 0xc87   : > { %v8355_v36 = vpop.permute.xlu1 %5779 }
 0xc8b   : > { %v8363_v13 = vpop.permute.xlu1 %5783 }
 0xc8f   : > { %v8372_v30 = vpop.permute.xlu1 %5815 }
 0xcd3   : > { %v5385_v43 = vpop.f32.mrb[16].mxu0 }
 0xcd4   : > { %v6413_v45 = vadd.f32 %v5385_v43, %v8049_v63  ;;  %v5387_v46 = vpop.f32.mrb[17].mxu0 }
 0xcd5   : > { %v6414_v14 = vadd.f32 %v5387_v46, %v8049_v63 }
 0xcd6   : > { %v5396_v48 = vmul.f32 0.5, %v6413_v45 }
 0xcd7   : > { %v5397_v12 = vmul.f32 0.5, %v6414_v14 }
 0xcd8   : > { %7146 = vtanh.f32 %v5396_v48 }
 0xcd9   : > { %7148 = vtanh.f32 %v5397_v12 }
 0xce2   : > { %v7147_v52 = vpop.eup %7146 }
 0xce3   : > { %v5400_v55 = vadd.f32 1.0, %v7147_v52 }
 0xce5   : > { %v5402_v56 = vmul.f32 0.5, %v5400_v55 }
 0xce7   : > { %v5404_v58 = vmul.f32 %v6413_v45, %v5402_v56  ;;  %v7149_v45 = vpop.eup %7148 }
 0xce9   : > { %v8341_v61 = vrot.slane %v5404_v58, %v7327_v5 }
 0xceb   : > { %v5483_v9 = vmul.f32 %v5472_v18, %v8341_v61  ;;  %v5482_v10 = vmul.f32 %v5468_v41, %v8341_v61  ;;  %v5485_v29 = vmul.f32 %v5480_v47, %v8341_v61  ;;  %v5484_v32 = vmul.f32 %v5476_v57, %v8341_v61  ;;  %v5672_v18 = vpop.permute.xlu0 %5671 }
 0xcec   : > { %v5522_v1 = vmul.f32 %v5508_v0, %v8341_v61  ;;  %v5523_v11 = vmul.f32 %v5512_v50, %v8341_v61  ;;  %v5524_v60 = vmul.f32 %v5516_v39, %v8341_v61  ;;  %v5525_v8 = vmul.f32 %v5520_v59, %v8341_v61  ;;  %v5824_v39 = vpop.permute.xlu1 %5823 }
 0xced   : > { %5492 = vrot.lane.b32.xlu0 %v5483_v9, %s7202_s9  ;;  %5490 = vrot.lane.b32.xlu1 %v5482_v10, %s7202_s9  ;;  %v5563_v6 = vmul.f32 %v5552_v19, %v8341_v61  ;;  %v5562_v22 = vmul.f32 %v5548_v53, %v8341_v61  ;;  %v5565_v62 = vmul.f32 %v5560_v4, %v8341_v61  ;;  %v5401_v47 = vadd.f32 1.0, %v7149_v45 }
 0xcee   : > { %v5564_v25 = vmul.f32 %v5556_v31, %v8341_v61  ;;  %v5602_v57 = vmul.f32 %v8307_v26, %v8341_v61  ;;  %v5603_v0 = vmul.f32 %v5592_v16, %v8341_v61  ;;  %v5604_v59 = vmul.f32 %v8309_v38, %v8341_v61 }
 0xcef   : > { %v5708_v63 = vpop.permute.xlu0 %5707  ;;  %v5605_v19 = vmul.f32 %v8311_v2, %v8341_v61  ;;  %v5643_v31 = vmul.f32 %v8313_v40, %v8341_v61  ;;  %v5642_v41 = vmul.f32 %v5628_v35, %v8341_v61  ;;  %v5645_v38 = vmul.f32 %v5640_v34, %v8341_v61 }
 0xcf0   : > { %v5828_v43 = vpop.permute.xlu1 %5827  ;;  %v5644_v2 = vmul.f32 %v8317_v21, %v8341_v61  ;;  %v5682_v48 = vmul.f32 %v8321_v28, %v8341_v61  ;;  %v5683_v50 = vmul.f32 %v5672_v18, %v8341_v61  ;;  %v5403_v52 = vmul.f32 0.5, %v5401_v47 }
 0xcf1   : > { %5496 = vrot.lane.b32.xlu0 %v5485_v29, %s7202_s9  ;;  %5494 = vrot.lane.b32.xlu1 %v5484_v32, %s7202_s9  ;;  %v5684_v21 = vmul.f32 %v8325_v37, %v8341_v61  ;;  %v5685_v55 = vmul.f32 %v8329_v42, %v8341_v61  ;;  %v5723_v58 = vmul.f32 %v8332_v49, %v8341_v61 }
 0xcf2   : > { %v5405_v28 = vmul.f32 %v6414_v14, %v5403_v52  ;;  %v5722_v4 = vmul.f32 %v5708_v63, %v8341_v61  ;;  %v5724_v16 = vmul.f32 %v8334_v51, %v8341_v61 }
 0xcf3   : > { %v5720_v26 = vpop.permute.xlu0 %5719 }
 0xcf4   : > { %v5860_v40 = vpop.permute.xlu1 %5859  ;;  %v8416_v10 = vrot.slane %v5405_v28, %v7327_v5  ;;  %v5725_v42 = vmul.f32 %v5720_v26, %v8341_v61 }
 0xcf5   : > { %5530 = vrot.lane.b32.xlu0 %v5522_v1, %s7205_s12  ;;  %5532 = vrot.lane.b32.xlu1 %v5523_v11, %s7205_s12 }
 0xcf6   : > { %v5791_v49 = vmul.f32 %v8355_v36, %v8416_v10  ;;  %v5792_v51 = vmul.f32 %v8363_v13, %v8416_v10  ;;  %v5832_v13 = vmul.f32 %v5824_v39, %v8416_v10 }
 0xcf7   : > { %v8396_v46 = vpop.permute.xlu0 %5751 }
 0xcf8   : > { %v5864_v56 = vpop.permute.xlu1 %5863 }
 0xcf9   : > { %5534 = vrot.lane.b32.xlu0 %v5524_v60, %s7205_s12  ;;  %5536 = vrot.lane.b32.xlu1 %v5525_v8, %s7205_s12  ;;  %v5830_v60 = vmul.f32 %v8372_v30, %v8416_v10  ;;  %v5833_v8 = vmul.f32 %v5828_v43, %v8416_v10  ;;  %v5872_v30 = vmul.f32 %v5864_v56, %v8416_v10 }
 0xcfb   : > { %v5776_v53 = vpop.permute.xlu0 %5775 }
 0xcfc   : > { %v5896_v37 = vpop.permute.xlu1 %5895  ;;  %v5790_v32 = vmul.f32 %v5776_v53, %v8416_v10  ;;  %v5391_v53 = vpop.f32.mrb[34].mxu0 }
 0xcfd   : > { %5572 = vrot.lane.b32.xlu0 %v5563_v6, %s7224_s13  ;;  %5570 = vrot.lane.b32.xlu1 %v5562_v22, %s7224_s13  ;;  %v5871_v22 = vmul.f32 %v5860_v40, %v8416_v10 }
 0xcff   : > { %v5788_v9 = vpop.permute.xlu0 %5787 }
 0xd00   : > { %v5904_v1 = vpop.permute.xlu1 %5903  ;;  %v5793_v5 = vmul.f32 %v5788_v9, %v8416_v10 }
 0xd01   : > { %5576 = vrot.lane.b32.xlu0 %v5565_v62, %s7224_s13  ;;  %5574 = vrot.lane.b32.xlu1 %v5564_v25, %s7224_s13 }
 0xd03   : > { %v5820_v29 = vpop.permute.xlu0 %5819 }
 0xd04   : > { %v5908_v11 = vpop.permute.xlu1 %5907  ;;  %v5831_v36 = vmul.f32 %v5820_v29, %v8416_v10  ;;  %v5461_v29 = vmul.f32 %v8341_v61, %v8304_v3 }
 0xd05   : > { %5610 = vrot.lane.b32.xlu0 %v5602_v57, %s7225_s14  ;;  %5612 = vrot.lane.b32.xlu1 %v5603_v0, %s7225_s14  ;;  %v5910_v0 = vmul.f32 %v5896_v37, %v8416_v10  ;;  %v5913_v39 = vmul.f32 %v5908_v11, %v8416_v10 }
 0xd07   : > { %v5856_v35 = vpop.permute.xlu0 %5855 }
 0xd08   : > { %v5940_v6 = vpop.permute.xlu1 %5939  ;;  %v5870_v14 = vmul.f32 %v5856_v35, %v8416_v10 }
 0xd09   : > { %5614 = vrot.lane.b32.xlu0 %v5604_v59, %s7225_s14  ;;  %5616 = vrot.lane.b32.xlu1 %v5605_v19, %s7225_s14  ;;  %v5912_v59 = vmul.f32 %v5904_v1, %v8416_v10  ;;  %v5951_v26 = vmul.f32 %v5940_v6, %v8416_v10 }
 0xd0b   : > { %v5868_v34 = vpop.permute.xlu0 %5867 }
 0xd0c   : > { %v5944_v18 = vpop.permute.xlu1 %5943  ;;  %v5873_v25 = vmul.f32 %v5868_v34, %v8416_v10 }
 0xd0d   : > { %5652 = vrot.lane.b32.xlu0 %v5643_v31, %s7226_s19  ;;  %5650 = vrot.lane.b32.xlu1 %v5642_v41, %s7226_s19 }
 0xd0f   : > { %v5900_v62 = vpop.permute.xlu0 %5899 }
 0xd10   : > { %v5911_v12 = vmul.f32 %v5900_v62, %v8416_v10  ;;  %v5976_v63 = vpop.permute.xlu1 %5975 }
 0xd11   : > { %5656 = vrot.lane.b32.xlu0 %v5645_v38, %s7226_s19  ;;  %5654 = vrot.lane.b32.xlu1 %v5644_v2, %s7226_s19  ;;  %v5952_v38 = vmul.f32 %v5944_v18, %v8416_v10  ;;  %v5990_v47 = vmul.f32 %v5976_v63, %v8416_v10 }
 0xd13   : > { %v5936_v57 = vpop.permute.xlu0 %5935 }
 0xd14   : > { %v5984_v31 = vpop.permute.xlu1 %5983  ;;  %v5950_v41 = vmul.f32 %v5936_v57, %v8416_v10 }
 0xd15   : > { %5690 = vrot.lane.b32.xlu0 %v5682_v48, %s7198_s29  ;;  %5692 = vrot.lane.b32.xlu1 %v5683_v50, %s7198_s29 }
 0xd17   : > { %v5948_v19 = vpop.permute.xlu0 %5947 }
 0xd18   : > { %v5953_v43 = vmul.f32 %v5948_v19, %v8416_v10  ;;  %v5988_v2 = vpop.permute.xlu1 %5987 }
 0xd19   : > { %5694 = vrot.lane.b32.xlu0 %v5684_v21, %s7198_s29  ;;  %5696 = vrot.lane.b32.xlu1 %v5685_v55, %s7198_s29  ;;  %v5993_v50 = vmul.f32 %v5988_v2, %v8416_v10  ;;  %v5992_v21 = vmul.f32 %v5984_v31, %v8416_v10  ;;  %v5392_v55 = vpop.f32.mrb[35].mxu0 }
 0xd1b   : > { %v5980_v45 = vpop.permute.xlu0 %5979 }
 0xd1c   : > { %v5991_v40 = vmul.f32 %v5980_v45, %v8416_v10  ;;  %v6020_v52 = vpop.permute.xlu1 %6019 }
 0xd1d   : > { %5732 = vrot.lane.b32.xlu0 %v5723_v58, %s7196_s27  ;;  %5730 = vrot.lane.b32.xlu1 %v5722_v4, %s7196_s27  ;;  %v6031_v56 = vmul.f32 %v6020_v52, %v8416_v10 }
 0xd1f   : > { %v6016_v48 = vpop.permute.xlu0 %6015 }
 0xd20   : > { %v6030_v28 = vmul.f32 %v6016_v48, %v8416_v10  ;;  %v6024_v4 = vpop.permute.xlu1 %6023 }
 0xd21   : > { %5736 = vrot.lane.b32.xlu0 %v5725_v42, %s7196_s27  ;;  %5734 = vrot.lane.b32.xlu1 %v5724_v16, %s7196_s27  ;;  %v6032_v37 = vmul.f32 %v6024_v4, %v8416_v10  ;;  %v5459_v42 = vmul.f32 %v8341_v61, %v8302_v20  ;;  %v5458_v16 = vmul.f32 %v8341_v61, %v8323_v33 }
 0xd22   : > { %v5767_v4 = vmul.f32 %v8416_v10, %v8396_v46 }
 0xd23   : > { %v6028_v58 = vpop.permute.xlu0 %6027  ;;  %v5462_v1 = vadd.f32 %v5458_v16, %v8315_v15 }
 0xd24   : > { %v6033_v9 = vmul.f32 %v6028_v58, %v8416_v10 }
 0xd25   : > { %5800 = vrot.lane.b32.xlu0 %v5791_v49, %s7202_s9  ;;  %5798 = vrot.lane.b32.xlu1 %v5790_v32, %s7202_s9  ;;  %v5463_v49 = vadd.f32 %v5459_v42, %v8298_v23  ;;  %v5766_v42 = vmul.f32 %v8416_v10, %v8336_v54 }
 0xd29   : > { %5804 = vrot.lane.b32.xlu0 %v5793_v5, %s7202_s9  ;;  %5802 = vrot.lane.b32.xlu1 %v5792_v51, %s7202_s9  ;;  %v5460_v5 = vmul.f32 %v8341_v61, %v8327_v24 }
 0xd2d   : > { %5840 = vrot.lane.b32.xlu0 %v5831_v36, %s7205_s12  ;;  %5838 = vrot.lane.b32.xlu1 %v5830_v60, %s7205_s12  ;;  %v5465_v36 = vadd.f32 %v5461_v29, %v8300_v44  ;;  %v5464_v60 = vadd.f32 %v5460_v5, %v8319_v27 }
 0xd31   : > { %5844 = vrot.lane.b32.xlu0 %v5833_v8, %s7205_s12  ;;  %5842 = vrot.lane.b32.xlu1 %v5832_v13, %s7205_s12 }
 0xd35   : > { %5880 = vrot.lane.b32.xlu0 %v5871_v22, %s7224_s13  ;;  %5878 = vrot.lane.b32.xlu1 %v5870_v14, %s7224_s13 }
 0xd39   : > { %5884 = vrot.lane.b32.xlu0 %v5873_v25, %s7224_s13  ;;  %5882 = vrot.lane.b32.xlu1 %v5872_v30, %s7224_s13 }
 0xd3d   : > { %5920 = vrot.lane.b32.xlu0 %v5911_v12, %s7225_s14  ;;  %5918 = vrot.lane.b32.xlu1 %v5910_v0, %s7225_s14 }
 0xd41   : > { %5924 = vrot.lane.b32.xlu0 %v5913_v39, %s7225_s14  ;;  %5922 = vrot.lane.b32.xlu1 %v5912_v59, %s7225_s14 }
 0xd45   : > { %5960 = vrot.lane.b32.xlu0 %v5951_v26, %s7226_s19  ;;  %5958 = vrot.lane.b32.xlu1 %v5950_v41, %s7226_s19 }
 0xd49   : > { %5964 = vrot.lane.b32.xlu0 %v5953_v43, %s7226_s19  ;;  %5962 = vrot.lane.b32.xlu1 %v5952_v38, %s7226_s19 }
 0xd4d   : > { %6000 = vrot.lane.b32.xlu0 %v5991_v40, %s7198_s29  ;;  %5998 = vrot.lane.b32.xlu1 %v5990_v47, %s7198_s29 }
 0xd51   : > { %6004 = vrot.lane.b32.xlu0 %v5993_v50, %s7198_s29  ;;  %6002 = vrot.lane.b32.xlu1 %v5992_v21, %s7198_s29 }
 0xd55   : > { %6040 = vrot.lane.b32.xlu0 %v6031_v56, %s7196_s27  ;;  %6038 = vrot.lane.b32.xlu1 %v6030_v28, %s7196_s27 }
 0xd59   : > { %6044 = vrot.lane.b32.xlu0 %v6033_v9, %s7196_s27  ;;  %6042 = vrot.lane.b32.xlu1 %v6032_v37, %s7196_s27  ;;  %s8535_s27 = sshll.u32 %s8537_s22, 5 }
 0xd5a   : > { %s266_s12 = scalar_lea.vmem %s8520_s6, %s8535_s27 }
 0xd5f   : > { %v5493_v32 = vpop.permute.xlu0 %5492  ;;  %v5491_v35 = vpop.permute.xlu1 %5490 }
 0xd60   : > { %v5503_v51 = vadd.f32 %v5493_v32, %v5463_v49  ;;  %v5502_v11 = vadd.f32 %v5491_v35, %v5462_v1  ;;  %v5769_v35 = vmul.f32 %v8416_v10, %v8347_v17 }
 0xd63   : > { %v5497_v20 = vpop.permute.xlu0 %5496  ;;  %v5495_v8 = vpop.permute.xlu1 %5494 }
 0xd64   : > { %v5505_v33 = vadd.f32 %v5497_v20, %v5465_v36  ;;  %v5504_v23 = vadd.f32 %v5495_v8, %v5464_v60  ;;  %v5768_v36 = vmul.f32 %v8416_v10, %v8338_v7 }
 0xd67   : > { %v5531_v34 = vpop.permute.xlu0 %5530  ;;  %v5533_v3 = vpop.permute.xlu1 %5532 }
 0xd68   : > { %v5542_v13 = vadd.f32 %v5531_v34, %v5502_v11  ;;  %v5543_v6 = vadd.f32 %v5533_v3, %v5503_v51 }
 0xd6b   : > { %v5535_v22 = vpop.permute.xlu0 %5534  ;;  %v5537_v14 = vpop.permute.xlu1 %5536 }
 0xd6c   : > { %v5544_v15 = vadd.f32 %v5535_v22, %v5504_v23  ;;  %v5545_v62 = vadd.f32 %v5537_v14, %v5505_v33 }
 0xd6f   : > { %v5573_v24 = vpop.permute.xlu0 %5572  ;;  %v5571_v18 = vpop.permute.xlu1 %5570 }
 0xd70   : > { %v5583_v61 = vadd.f32 %v5573_v24, %v5543_v6  ;;  %v5582_v25 = vadd.f32 %v5571_v18, %v5542_v13 }
 0xd73   : > { %v5577_v30 = vpop.permute.xlu0 %5576  ;;  %v5575_v12 = vpop.permute.xlu1 %5574 }
 0xd74   : > { %v5585_v44 = vadd.f32 %v5577_v30, %v5545_v62  ;;  %v5584_v57 = vadd.f32 %v5575_v12, %v5544_v15 }
 0xd77   : > { %v5611_v27 = vpop.permute.xlu0 %5610  ;;  %v5613_v0 = vpop.permute.xlu1 %5612 }
 0xd78   : > { %v5623_v38 = vadd.f32 %v5613_v0, %v5583_v61  ;;  %v5622_v45 = vadd.f32 %v5611_v27, %v5582_v25 }
 0xd7b   : > { %v5615_v63 = vpop.permute.xlu0 %5614  ;;  %v5617_v39 = vpop.permute.xlu1 %5616 }
 0xd7c   : > { %v5625_v50 = vadd.f32 %v5617_v39, %v5585_v44  ;;  %v5624_v21 = vadd.f32 %v5615_v63, %v5584_v57 }
 0xd7f   : > { %v5653_v59 = vpop.permute.xlu0 %5652  ;;  %v5651_v19 = vpop.permute.xlu1 %5650 }
 0xd80   : > { %v5663_v40 = vadd.f32 %v5653_v59, %v5623_v38  ;;  %v5662_v48 = vadd.f32 %v5651_v19, %v5622_v45 }
 0xd83   : > { %v5657_v31 = vpop.permute.xlu0 %5656  ;;  %v5655_v26 = vpop.permute.xlu1 %5654 }
 0xd84   : > { %v5665_v56 = vadd.f32 %v5657_v31, %v5625_v50  ;;  %v5664_v9 = vadd.f32 %v5655_v26, %v5624_v21 }
 0xd87   : > { %v5691_v41 = vpop.permute.xlu0 %5690  ;;  %v5693_v43 = vpop.permute.xlu1 %5692 }
 0xd88   : > { %v5703_v52 = vadd.f32 %v5693_v43, %v5663_v40  ;;  %v5702_v53 = vadd.f32 %v5691_v41, %v5662_v48 }
 0xd8b   : > { %v5695_v2 = vpop.permute.xlu0 %5694  ;;  %v5697_v47 = vpop.permute.xlu1 %5696 }
 0xd8c   : > { %v5705_v16 = vadd.f32 %v5697_v47, %v5665_v56  ;;  %v5704_v29 = vadd.f32 %v5695_v2, %v5664_v9 }
 0xd8f   : > { %v5733_v55 = vpop.permute.xlu0 %5732  ;;  %v5731_v58 = vpop.permute.xlu1 %5730 }
 0xd90   : > { %v5743_v28 = vadd.f32 %v5733_v55, %v5703_v52  ;;  %v5742_v37 = vadd.f32 %v5731_v58, %v5702_v53 }
 0xd92   : > { %v5771_v49 = vadd.f32 %v5767_v4, %v5743_v28  ;;  %v5770_v1 = vadd.f32 %v5766_v42, %v5742_v37 }
 0xd93   : > { %v5737_v32 = vpop.permute.xlu0 %5736  ;;  %v5735_v51 = vpop.permute.xlu1 %5734 }
 0xd94   : > { %v5745_v5 = vadd.f32 %v5737_v32, %v5705_v16  ;;  %v5744_v11 = vadd.f32 %v5735_v51, %v5704_v29 }
 0xd96   : > { %v5773_v46 = vadd.f32 %v5769_v35, %v5745_v5  ;;  %v5772_v60 = vadd.f32 %v5768_v36, %v5744_v11 }
 0xd97   : > { %v5801_v20 = vpop.permute.xlu0 %5800  ;;  %v5799_v33 = vpop.permute.xlu1 %5798 }
 0xd98   : > { %v5811_v25 = vadd.f32 %v5801_v20, %v5771_v49  ;;  %v5810_v44 = vadd.f32 %v5799_v33, %v5770_v1 }
 0xd9b   : > { %v5805_v8 = vpop.permute.xlu0 %5804  ;;  %v5803_v54 = vpop.permute.xlu1 %5802 }
 0xd9c   : > { %v5813_v0 = vadd.f32 %v5805_v8, %v5773_v46  ;;  %v5812_v59 = vadd.f32 %v5803_v54, %v5772_v60 }
 0xd9f   : > { %v5841_v23 = vpop.permute.xlu0 %5840  ;;  %v5839_v34 = vpop.permute.xlu1 %5838 }
 0xda0   : > { %v5851_v12 = vadd.f32 %v5841_v23, %v5811_v25  ;;  %v5850_v57 = vadd.f32 %v5839_v34, %v5810_v44 }
 0xda3   : > { %v5845_v13 = vpop.permute.xlu0 %5844  ;;  %v5843_v3 = vpop.permute.xlu1 %5842 }
 0xda4   : > { %v5853_v31 = vadd.f32 %v5845_v13, %v5813_v0  ;;  %v5852_v41 = vadd.f32 %v5843_v3, %v5812_v59 }
 0xda7   : > { %v5881_v6 = vpop.permute.xlu0 %5880  ;;  %v5879_v22 = vpop.permute.xlu1 %5878 }
 0xda8   : > { %v5891_v63 = vadd.f32 %v5881_v6, %v5851_v12  ;;  %v5890_v19 = vadd.f32 %v5879_v22, %v5850_v57 }
 0xdab   : > { %v5885_v15 = vpop.permute.xlu0 %5884  ;;  %v5883_v14 = vpop.permute.xlu1 %5882 }
 0xdac   : > { %v5893_v45 = vadd.f32 %v5885_v15, %v5853_v31  ;;  %v5892_v47 = vadd.f32 %v5883_v14, %v5852_v41 }
 0xdaf   : > { %v5921_v62 = vpop.permute.xlu0 %5920  ;;  %v5919_v17 = vpop.permute.xlu1 %5918 }
 0xdb0   : > { %v5931_v26 = vadd.f32 %v5921_v62, %v5891_v63  ;;  %v5930_v43 = vadd.f32 %v5919_v17, %v5890_v19 }
 0xdb3   : > { %v5925_v24 = vpop.permute.xlu0 %5924  ;;  %v5923_v61 = vpop.permute.xlu1 %5922 }
 0xdb4   : > { %v5933_v50 = vadd.f32 %v5925_v24, %v5893_v45  ;;  %v5932_v21 = vadd.f32 %v5923_v61, %v5892_v47 }
 0xdb7   : > { %v5961_v18 = vpop.permute.xlu0 %5960  ;;  %v5959_v7 = vpop.permute.xlu1 %5958 }
 0xdb8   : > { %v5971_v2 = vadd.f32 %v5961_v18, %v5931_v26  ;;  %v5970_v48 = vadd.f32 %v5959_v7, %v5930_v43 }
 0xdbb   : > { %v5965_v10 = vpop.permute.xlu0 %5964  ;;  %v5963_v30 = vpop.permute.xlu1 %5962 }
 0xdbc   : > { %v5973_v56 = vadd.f32 %v5965_v10, %v5933_v50  ;;  %v5972_v4 = vadd.f32 %v5963_v30, %v5932_v21 }
 0xdbf   : > { %v6001_v27 = vpop.permute.xlu0 %6000  ;;  %v5999_v39 = vpop.permute.xlu1 %5998 }
 0xdc0   : > { %v6011_v52 = vadd.f32 %v6001_v27, %v5971_v2  ;;  %v6010_v53 = vadd.f32 %v5999_v39, %v5970_v48 }
 0xdc3   : > { %v6005_v38 = vpop.permute.xlu0 %6004  ;;  %v6003_v40 = vpop.permute.xlu1 %6002 }
 0xdc4   : > { %v6013_v37 = vadd.f32 %v6005_v38, %v5973_v56  ;;  %v6012_v42 = vadd.f32 %v6003_v40, %v5972_v4 }
 0xdc7   : > { %v6041_v55 = vpop.permute.xlu0 %6040  ;;  %v6039_v58 = vpop.permute.xlu1 %6038 }
 0xdc8   : > { %v6051_v28 = vadd.f32 %v6041_v55, %v6011_v52  ;;  %v6050_v9 = vadd.f32 %v6039_v58, %v6010_v53 }
 0xdca   : > { %6055 = vst.msk [vmem:[%s266_s12 + $0x8] sm:$0xff] %vm338_vm4, %v6051_v28  ;;  %6054 = vst.msk [vmem:[%s266_s12] sm:$0xff] %vm338_vm4, %v6050_v9 }
 0xdcb   : > { %v6045_v16 = vpop.permute.xlu0 %6044  ;;  %v6043_v29 = vpop.permute.xlu1 %6042 }
 0xdcc   : > { %v6053_v49 = vadd.f32 %v6045_v16, %v6013_v37  ;;  %v6052_v32 = vadd.f32 %v6043_v29, %v6012_v42 }
 0xdce   : > { %6057 = vst.msk [vmem:[%s266_s12 + $0x18] sm:$0xff] %vm338_vm4, %v6053_v49  ;;  %6056 = vst.msk [vmem:[%s266_s12 + $0x10] sm:$0xff] %vm338_vm4, %v6052_v32 }
 0xdcf PF: > { %s17_s21 = sadd.s32 1, %s7188_s21  }
 0xdd0   : > { %p14_p3 = scmp.ge.s32.totalorder %s17_s21, 4  }
 0xdd2   :  { %16 = sbr.rel (!%p14_p3) target bundleno = 1 (0x1), region = 126 }
 0xdd9   :  { %6079 = vsyncpa [#allocation4], 1 }
 0xdda   :  { %6081 = vsyncpa [#allocation4 + $0x1], 1 }

</bundles_post_ra>
